<compile_context>
chip_gen: v5e
topology: v5e:2x2
jax: 0.10.0
libtpu: 0.0.40
codegen_flags: <defaults>
</compile_context>

<pallas_src>
import math

import jax
import jax.numpy as jnp
from jax import lax
from jax.experimental import pallas as pl
from jax.experimental.pallas import tpu as pltpu

NC = 2   # classes per yolo head
NA = 3   # anchors per yolo head

# Synthetic Darknet-style config (stands in for Parser(cfg).torch_layers()).
LAYER_CFG = [
    dict(type='convolutional', filters=8,             size=3, stride=1, bn=True,  act='leaky'),
    dict(type='convolutional', filters=16,            size=3, stride=2, bn=True,  act='leaky'),
    dict(type='convolutional', filters=8,             size=1, stride=1, bn=True,  act='leaky'),
    dict(type='convolutional', filters=16,            size=3, stride=1, bn=True,  act='leaky'),
    dict(type='shortcut',      from_=-3,              act='linear'),
    dict(type='convolutional', filters=NA * (5 + NC), size=1, stride=1, bn=False, act='linear'),
    dict(type='yolo',          stride=2,              classes=NC, anchors=NA),
    dict(type='route',         layers=[-5]),
    dict(type='convolutional', filters=16,            size=3, stride=2, bn=True,  act='leaky'),
    dict(type='convolutional', filters=NA * (5 + NC), size=1, stride=1, bn=False, act='linear'),
    dict(type='yolo',          stride=4,              classes=NC, anchors=NA),
]


# ---------------------------------------------------------------------------
# Small static helpers
# ---------------------------------------------------------------------------
def _round_up(x, m):
    return ((x + m - 1) // m) * m


def _conv_out_hw(H, W, K, stride):
    pad = K // 2
    Ho = (H + 2 * pad - K) // stride + 1
    Wo = (W + 2 * pad - K) // stride + 1
    return Ho, Wo


def _model_static_info(layer_cfg, in_ch, H, W):
    """Per-layer output (C,H,W), per-conv input shape, yolo head info, flops/image."""
    shapes, conv_in, heads = [], {}, []
    flops = 0
    c, h, w = in_ch, H, W
    for i, cfg in enumerate(layer_cfg):
        t = cfg['type']
        if t == 'convolutional':
            K, s = cfg['size'], cfg['stride']
            conv_in[i] = (c, h, w)
            flops += 2 * cfg['filters'] * c * K * K * h * w
            Ho, Wo = _conv_out_hw(h, w, K, s)
            if s != 1:
                flops += 2 * cfg['filters'] * (h * w) * (Ho * Wo)  # selection matmul
            c, h, w = cfg['filters'], Ho, Wo
        elif t == 'route':
            ids = [i + li if li < 0 else li for li in cfg['layers']]
            c = sum(shapes[a][0] for a in ids)
            h, w = shapes[ids[0]][1], shapes[ids[0]][2]
        elif t == 'yolo':
            heads.append((i, (c, h, w)))
        # shortcut: channel/spatial unchanged
        shapes.append((c, h, w))
    return shapes, conv_in, heads, flops


# ---------------------------------------------------------------------------
# In-kernel building blocks (traced inside the fused kernel body)
# ---------------------------------------------------------------------------
def _flat_w_coord(H, W):
    """(1, H*W) int32 with the w-coordinate of each flat index (no vector int div)."""
    idx = lax.broadcasted_iota(jnp.int32, (1, H * W), 1)
    if W & (W - 1) == 0:                      # power of two -> bit mask
        return idx & (W - 1)
    wrow = lax.broadcasted_iota(jnp.int32, (1, W), 1)
    return jnp.concatenate([wrow] * H, axis=1)


def _flat_h_coord(H, W):
    idx = lax.broadcasted_iota(jnp.int32, (1, H * W), 1)
    if W & (W - 1) == 0:
        return idx >> int(math.log2(W))
    rows = [jnp.full((1, W), i, jnp.int32) for i in range(H)]
    return jnp.concatenate(rows, axis=1)


def _decimate(y, H, W, Ho, Wo, stride):
    """Select rows stride*ho, cols stride*wo from flat (C, H*W) -> (C, Ho*Wo).

    Exact 0/1 selection matmul (MXU slack is huge here).
    TODO(synk): at production resolutions use space-to-depth phase planes or
    strided VMEM reads instead of an (HW, Ho*Wo) selection matrix.
    """
    ho = _flat_h_coord(Ho, Wo)
    wo = _flat_w_coord(Ho, Wo)
    tgt = stride * W * ho + stride * wo                       # (1, Ho*Wo) source index
    src = lax.broadcasted_iota(jnp.int32, (H * W, Ho * Wo), 0)
    sel = jnp.where(src == tgt, jnp.float32(1), jnp.float32(0))
    return jnp.dot(y, sel, preferred_element_type=jnp.float32)


def _conv_layer(pieces, H, W, w_ref, scale_ref, shift_ref, *, K, stride, act,
                pad_scratch, margin):
    """Conv2d (same padding) + folded BN/bias + activation on one image, fully in VMEM.

    pieces: list of (Cin_i, H*W) f32 values whose channel concat is the conv input
            (x||r and route concats are folded here via scratch row offsets).
    Returns (Cout, Ho*Wo) f32.
    """
    HW = H * W
    pad = K // 2
    cout, total_cin = w_ref.shape[1], w_ref.shape[2]
    assert sum(p.shape[0] for p in pieces) == total_cin

    if K == 1 and len(pieces) == 1:
        acc = jnp.dot(w_ref[0], pieces[0].astype(jnp.bfloat16),
                      preferred_element_type=jnp.float32)
    else:
        # Stage the input into the zero-bordered VMEM slab; every (kh, kw) tap is a
        # plain shifted static-slice read -- no HBM-materialized im2col.
        pad_scratch[...] = jnp.zeros(pad_scratch.shape, pad_scratch.dtype)
        row = 0
        for p in pieces:
            pad_scratch[row:row + p.shape[0], margin:margin + HW] = p
            row += p.shape[0]
        wcoord = _flat_w_coord(H, W)
        acc = jnp.zeros((cout, HW), jnp.float32)
        for kh in range(K):
            for kw in range(K):
                dh, dw = kh - pad, kw - pad
                d = dh * W + dw
                tap = pad_scratch[0:total_cin, margin + d:margin + d + HW]
                if dw != 0:
                    # zero out horizontal row-bleed; vertical OOB already hits the
                    # zeroed border of the slab.
                    valid = (wcoord + dw >= 0) & (wcoord + dw < W)
                    tap = jnp.where(valid, tap, 0.0)
                acc = acc + jnp.dot(w_ref[kh * K + kw], tap.astype(jnp.bfloat16),
                                    preferred_element_type=jnp.float32)

    Ho, Wo = _conv_out_hw(H, W, K, stride)
    y = acc
    if stride != 1:
        y = _decimate(y, H, W, Ho, Wo, stride)
    # f32 epilogue (folded BN scale/shift or bias, then LeakyReLU)
    y = y * scale_ref[...] + shift_ref[...]
    if act == 'leaky':
        y = jnp.where(y > 0, y, jnp.float32(0.1) * y)
    return y, Ho, Wo


def _single(pieces):
    if len(pieces) == 1:
        return pieces[0]
    # TODO(synk): only needed if a shortcut / yolo consumes a multi-input route.
    return jnp.concatenate(pieces, axis=0)


def _make_fused_kernel(layer_cfg, c_img, H0, W0, margin):
    """Build the fused whole-network kernel body for one batch element per grid step."""
    conv_ids = [i for i, c in enumerate(layer_cfg) if c['type'] == 'convolutional']
    yolo_ids = [i for i, c in enumerate(layer_cfg) if c['type'] == 'yolo']
    nconv, nyolo = len(conv_ids), len(yolo_ids)

    def kernel(*refs):
        x_ref, r_ref = refs[0], refs[1]
        p_refs = refs[2:2 + 3 * nconv]
        o_refs = refs[2 + 3 * nconv:2 + 3 * nconv + nyolo]
        pad_scratch = refs[-1]
        params = {li: (p_refs[3 * j], p_refs[3 * j + 1], p_refs[3 * j + 2])
                  for j, li in enumerate(conv_ids)}
        outs = {li: o_refs[j] for j, li in enumerate(yolo_ids)}

        xv = x_ref[0].astype(jnp.float32)        # (c_img, H0*W0)
        rv = r_ref[0].astype(jnp.float32)        # (1, H0*W0)
        cur_pieces = [xv, rv]                    # torch.cat([x, r], dim=1) folded here
        cur_hw = (H0, W0)
        cur_f32 = None
        cache, cache_hw = [], []
        for i, cfg in enumerate(layer_cfg):
            t = cfg['type']
            if t == 'convolutional':
                w_ref, sc_ref, sh_ref = params[i]
                y, Ho, Wo = _conv_layer(
                    cur_pieces, cur_hw[0], cur_hw[1], w_ref, sc_ref, sh_ref,
                    K=cfg['size'], stride=cfg['stride'], act=cfg['act'],
                    pad_scratch=pad_scratch, margin=margin)
                cur_f32, cur_pieces, cur_hw = y, [y], (Ho, Wo)
            elif t == 'shortcut':
                y = _single(cur_pieces) + _single(cache[i + cfg['from_']])
                if cfg.get('act', 'linear') == 'leaky':
                    y = jnp.where(y > 0, y, jnp.float32(0.1) * y)
                cur_f32, cur_pieces = y, [y]
            elif t == 'route':
                ids = [i + li if li < 0 else li for li in cfg['layers']]
                pieces = []
                for sid in ids:
                    pieces.extend(cache[sid])
                cur_pieces, cur_hw, cur_f32 = pieces, cache_hw[ids[0]], None
            elif t == 'yolo':
                head = cur_f32 if cur_f32 is not None else _single(cur_pieces)
                # TODO(synk): YOLO decode (sigmoid/anchor-grid) is not in the reference
                # source; raw head maps are emitted (training / raw path).
                outs[i][0] = head.astype(outs[i].dtype)
            else:
                raise ValueError('unknown layer type: %s' % t)
            # torch caches the (stride, x) tuple for yolo layers; nothing downstream
            # consumes it in this cfg, so we cache the raw pieces instead.
            cache.append(list(cur_pieces))
            cache_hw.append(cur_hw)

    return kernel, conv_ids, yolo_ids


# ---------------------------------------------------------------------------
# Parameter construction (deterministic) + DetectionModel.initialize_biases
# ---------------------------------------------------------------------------
def make_params(key, in_ch):
    params, channels = [], []
    c = in_ch
    for i, cfg in enumerate(LAYER_CFG):
        t = cfg['type']
        if t == 'convolutional':
            K, cout = cfg['size'], cfg['filters']
            key, k1, k2 = jax.random.split(key, 3)
            w = jax.random.normal(k1, (cout, c, K, K), jnp.float32) / math.sqrt(K * K * c)
            if cfg['bn']:
                params.append(dict(w=w,
                                   gamma=jnp.ones((cout,), jnp.float32),
                                   beta=jnp.zeros((cout,), jnp.float32),
                                   mean=jnp.zeros((cout,), jnp.float32),
                                   var=jnp.ones((cout,), jnp.float32)))
            else:
                params.append(dict(w=w,
                                   bias=jax.random.normal(k2, (cout,), jnp.float32) * 0.01))
            c = cout
        elif t == 'route':
            abs_ids = [i + li if li < 0 else li for li in cfg['layers']]
            c = sum(channels[a] for a in abs_ids)
            params.append(None)
        else:   # shortcut / yolo keep channel count
            params.append(None)
        channels.append(c)
    return params


def initialize_biases(params):
    pre_i = None
    for i, cfg in enumerate(LAYER_CFG):
        if (cfg['type'] == 'shortcut' and cfg.get('act', 'linear') != 'linear'
                and pre_i is not None
                and LAYER_CFG[pre_i]['type'] == 'convolutional'
                and LAYER_CFG[pre_i].get('bn', False)):
            params[pre_i]['gamma'] = jnp.zeros_like(params[pre_i]['gamma'])
        if cfg['type'] == 'yolo':
            conv_p = params[pre_i]                   # `pre.conv` in the reference
            stride, num_cls = cfg['stride'], cfg['classes']
            b = conv_p['bias'].reshape(-1, 5 + num_cls)
            b = b.at[:, 4].add(math.log(8.0 / (608.0 / stride) ** 2))
            b = b.at[:, 5:].add(math.log(0.6 / (num_cls - 0.99)))
            conv_p['bias'] = b.reshape(-1)
        pre_i = i
    return params


def prepare_params(params):
    """One-time prep (hoisted out of forward): weight re-layout + BN fold, bf16 cast."""
    prepared = []
    for i, cfg in enumerate(LAYER_CFG):
        if cfg['type'] != 'convolutional':
            prepared.append(None)
            continue
        p = params[i]
        w = p['w']                                          # (Cout, Cin, K, K)
        cout, cin, K, _ = w.shape
        # (Cout, Cin, K, K) -> (K*K, Cout, Cin): w_ref[kh*K + kw] == W[:, :, kh, kw]
        wt = jnp.transpose(w, (2, 3, 0, 1)).reshape(K * K, cout, cin).astype(jnp.bfloat16)
        if cfg['bn']:
            eps = 1e-5
            scale = p['gamma'] / jnp.sqrt(p['var'] + eps)
            shift = p['beta'] - p['mean'] * scale
        else:
            scale = jnp.ones((cout,), jnp.float32)
            shift = p['bias']
        prepared.append(dict(wt=wt,
                             scale=scale.reshape(cout, 1).astype(jnp.float32),
                             shift=shift.reshape(cout, 1).astype(jnp.float32)))
    return prepared


# ---------------------------------------------------------------------------
# DetectionModel.forward (fused: one pallas_call for the whole network)
# ---------------------------------------------------------------------------
def detection_model_forward(prepared, x_nchw, r):
    N, c_img, H, W = x_nchw.shape
    s = int(math.sqrt(r.shape[-1]))
    assert s * s == r.shape[-1] and (s, s) == (H, W)
    HW = H * W
    in_ch = c_img + 1

    # Layout folding: NCHW -> (N, C, H*W) is a free reshape; no transposes anywhere.
    x_flat = x_nchw.reshape(N, c_img, HW)
    r_flat = r.reshape(N, 1, HW).astype(x_flat.dtype)

    _, conv_in, heads, flops_per_img = _model_static_info(LAYER_CFG, in_ch, H, W)

    conv_ids_all = sorted(conv_in)
    max_cin = max(conv_in[i][0] for i in conv_ids_all)
    max_hw = max(conv_in[i][1] * conv_in[i][2] for i in conv_ids_all)
    max_w = max(conv_in[i][2] for i in conv_ids_all)
    margin = 128
    while margin < max_w + 1:                       # border must cover the largest tap shift
        margin += 128
    scratch = pltpu.VMEM((_round_up(max_cin, 8), max_hw + 2 * margin), jnp.float32)

    kernel, conv_ids, yolo_ids = _make_fused_kernel(LAYER_CFG, c_img, H, W, margin)

    in_specs = [
        pl.BlockSpec((1, c_img, HW), lambda n: (n, 0, 0)),
        pl.BlockSpec((1, 1, HW), lambda n: (n, 0, 0)),
    ]
    operands = [x_flat, r_flat]
    bytes_accessed = (x_flat.size * x_flat.dtype.itemsize
                      + r_flat.size * r_flat.dtype.itemsize)
    for li in conv_ids:
        p = prepared[li]
        for arr in (p['wt'], p['scale'], p['shift']):
            in_specs.append(pl.BlockSpec(arr.shape, lambda n, nd=arr.ndim: (0,) * nd))
            operands.append(arr)
            bytes_accessed += arr.size * arr.dtype.itemsize

    out_shapes, out_specs, head_meta = [], [], []
    for li, (ch, hh, wh) in heads:
        out_shapes.append(jax.ShapeDtypeStruct((N, ch, hh * wh), jnp.float32))
        out_specs.append(pl.BlockSpec((1, ch, hh * wh), lambda n: (n, 0, 0)))
        head_meta.append((LAYER_CFG[li]['stride'], ch, hh, wh))
        bytes_accessed += N * ch * hh * wh * 4

    outs = pl.pallas_call(
        kernel,
        grid=(N,),
        in_specs=in_specs,
        out_specs=tuple(out_specs),
        out_shape=tuple(out_shapes),
        scratch_shapes=[scratch],
        compiler_params=pltpu.CompilerParams(
            # "parallel" is portable across v5e/v6e/v7x; an explicit core split
            # (pltpu.CORE_PARALLEL) over the batch axis is the next v7x lever.
            dimension_semantics=("parallel",)),
        cost_estimate=pl.CostEstimate(flops=int(flops_per_img) * int(N),
                                      transcendentals=0,
                                      bytes_accessed=int(bytes_accessed)),
    )(*operands)

    if not isinstance(outs, (list, tuple)):
        outs = (outs,)
    heads_out = []
    for (stride, ch, hh, wh), o in zip(head_meta, outs):
        heads_out.append((stride, o.reshape(N, ch, hh, wh)))   # free reshape, already NCHW
    heads_out.sort(key=lambda e: e[0])
    # training / raw path: raw head maps sorted by stride.
    # TODO(synk): detection_post_process is not defined in the reference source.
    return [o for _, o in heads_out]


# ---------------------------------------------------------------------------
# Pure-JAX f32 reference (for a loose-tolerance correctness check)
# ---------------------------------------------------------------------------
def _reference_forward(params, x_nchw, r):
    s = int(math.sqrt(r.shape[-1]))
    x = jnp.concatenate([x_nchw, r.reshape(-1, 1, s, s)], axis=1)
    cache, outs = [], []
    for i, cfg in enumerate(LAYER_CFG):
        t = cfg['type']
        if t == 'convolutional':
            p = params[i]
            K, stride = cfg['size'], cfg['stride']
            pad = K // 2
            y = lax.conv_general_dilated(
                x, p['w'], window_strides=(stride, stride),
                padding=[(pad, pad), (pad, pad)],
                dimension_numbers=('NCHW', 'OIHW', 'NCHW'),
                precision=lax.Precision.HIGHEST)
            if cfg['bn']:
                eps = 1e-5
                sc = (p['gamma'] / jnp.sqrt(p['var'] + eps)).reshape(1, -1, 1, 1)
                sh = (p['beta'].reshape(1, -1, 1, 1) - p['mean'].reshape(1, -1, 1, 1) * sc)
                y = y * sc + sh
            else:
                y = y + p['bias'].reshape(1, -1, 1, 1)
            if cfg['act'] == 'leaky':
                y = jnp.where(y > 0, y, 0.1 * y)
            x = y
        elif t == 'shortcut':
            x = x + cache[i + cfg['from_']]
        elif t == 'route':
            xs = [cache[i + li if li < 0 else li] for li in cfg['layers']]
            x = xs[0] if len(xs) == 1 else jnp.concatenate(xs, axis=1)
        elif t == 'yolo':
            x = (cfg['stride'], x)
            outs.append(x)
        cache.append(x)
    return [o[1] for o in sorted(outs, key=lambda e: e[0])]


if __name__ == "__main__":
    key = jax.random.PRNGKey(0)
    kx, kr, kp = jax.random.split(key, 3)

    x = jax.random.normal(kx, (2, 3, 16, 16), jnp.float32)    # NCHW image
    r = jax.random.normal(kr, (2, 256), jnp.float32)           # -> (2, 1, 16, 16)

    params = make_params(kp, in_ch=x.shape[1] + 1)
    params = initialize_biases(params)
    prepared = prepare_params(params)   # weight layout + BN fold hoisted out of forward

    fwd = jax.jit(detection_model_forward)
    outs = jax.block_until_ready(fwd(prepared, x, r))

    assert outs[0].shape == (2, NA * (5 + NC), 8, 8)
    assert outs[1].shape == (2, NA * (5 + NC), 4, 4)

    # Loose-tolerance check against an f32 XLA reference (bf16 MXU operands => ~1e-2
    # relative drift is expected; structural errors would show O(1) differences).
    ref = _reference_forward(params, x, r)
    for o, o_ref in zip(outs, ref):
        assert o.shape == o_ref.shape
        max_err = float(jnp.max(jnp.abs(o - o_ref)))
        assert bool(jnp.allclose(o, o_ref, rtol=5e-2, atol=1.5e-1)), max_err

    print("KERNEL_OK")
</pallas_src>

<mosaic_0001>
module attributes {stable_mosaic.version = 11 : i64} {
  func.func @kernel(%arg0: i32, %arg1: memref<1x3x256xf32, #tpu.memory_space<vmem>>, %arg2: memref<1x1x256xf32, #tpu.memory_space<vmem>>, %arg3: memref<9x8x4xbf16, #tpu.memory_space<vmem>>, %arg4: memref<8x1xf32, #tpu.memory_space<vmem>>, %arg5: memref<8x1xf32, #tpu.memory_space<vmem>>, %arg6: memref<9x16x8xbf16, #tpu.memory_space<vmem>>, %arg7: memref<16x1xf32, #tpu.memory_space<vmem>>, %arg8: memref<16x1xf32, #tpu.memory_space<vmem>>, %arg9: memref<1x8x16xbf16, #tpu.memory_space<vmem>>, %arg10: memref<8x1xf32, #tpu.memory_space<vmem>>, %arg11: memref<8x1xf32, #tpu.memory_space<vmem>>, %arg12: memref<9x16x8xbf16, #tpu.memory_space<vmem>>, %arg13: memref<16x1xf32, #tpu.memory_space<vmem>>, %arg14: memref<16x1xf32, #tpu.memory_space<vmem>>, %arg15: memref<1x21x16xbf16, #tpu.memory_space<vmem>>, %arg16: memref<21x1xf32, #tpu.memory_space<vmem>>, %arg17: memref<21x1xf32, #tpu.memory_space<vmem>>, %arg18: memref<9x16x8xbf16, #tpu.memory_space<vmem>>, %arg19: memref<16x1xf32, #tpu.memory_space<vmem>>, %arg20: memref<16x1xf32, #tpu.memory_space<vmem>>, %arg21: memref<1x21x16xbf16, #tpu.memory_space<vmem>>, %arg22: memref<21x1xf32, #tpu.memory_space<vmem>>, %arg23: memref<21x1xf32, #tpu.memory_space<vmem>>, %arg24: memref<1x21x64xf32, #tpu.memory_space<vmem>>, %arg25: memref<1x21x16xf32, #tpu.memory_space<vmem>>, %arg26: memref<16x512xf32, #tpu.memory_space<vmem>>) attributes {dimension_semantics = [#tpu.dimension_semantics<parallel>], iteration_bounds = array<i64: 2>, scalar_prefetch = 0 : i64, scratch_operands = 1 : i64, tpu.core_type = #tpu.core_type<tc>, window_params = [{transform_indices = @transform_0, window_bounds = array<i64: 1, 3, 256>}, {transform_indices = @transform_1, window_bounds = array<i64: 1, 1, 256>}, {pipeline_mode = #tpu.pipeline_mode<synchronous>, transform_indices = @transform_2, window_bounds = array<i64: 9, 8, 4>}, {pipeline_mode = #tpu.pipeline_mode<synchronous>, transform_indices = @transform_3, window_bounds = array<i64: 8, 1>}, {pipeline_mode = #tpu.pipeline_mode<synchronous>, transform_indices = @transform_4, window_bounds = array<i64: 8, 1>}, {pipeline_mode = #tpu.pipeline_mode<synchronous>, transform_indices = @transform_5, window_bounds = array<i64: 9, 16, 8>}, {pipeline_mode = #tpu.pipeline_mode<synchronous>, transform_indices = @transform_6, window_bounds = array<i64: 16, 1>}, {pipeline_mode = #tpu.pipeline_mode<synchronous>, transform_indices = @transform_7, window_bounds = array<i64: 16, 1>}, {pipeline_mode = #tpu.pipeline_mode<synchronous>, transform_indices = @transform_8, window_bounds = array<i64: 1, 8, 16>}, {pipeline_mode = #tpu.pipeline_mode<synchronous>, transform_indices = @transform_9, window_bounds = array<i64: 8, 1>}, {pipeline_mode = #tpu.pipeline_mode<synchronous>, transform_indices = @transform_10, window_bounds = array<i64: 8, 1>}, {pipeline_mode = #tpu.pipeline_mode<synchronous>, transform_indices = @transform_11, window_bounds = array<i64: 9, 16, 8>}, {pipeline_mode = #tpu.pipeline_mode<synchronous>, transform_indices = @transform_12, window_bounds = array<i64: 16, 1>}, {pipeline_mode = #tpu.pipeline_mode<synchronous>, transform_indices = @transform_13, window_bounds = array<i64: 16, 1>}, {pipeline_mode = #tpu.pipeline_mode<synchronous>, transform_indices = @transform_14, window_bounds = array<i64: 1, 21, 16>}, {pipeline_mode = #tpu.pipeline_mode<synchronous>, transform_indices = @transform_15, window_bounds = array<i64: 21, 1>}, {pipeline_mode = #tpu.pipeline_mode<synchronous>, transform_indices = @transform_16, window_bounds = array<i64: 21, 1>}, {pipeline_mode = #tpu.pipeline_mode<synchronous>, transform_indices = @transform_17, window_bounds = array<i64: 9, 16, 8>}, {pipeline_mode = #tpu.pipeline_mode<synchronous>, transform_indices = @transform_18, window_bounds = array<i64: 16, 1>}, {pipeline_mode = #tpu.pipeline_mode<synchronous>, transform_indices = @transform_19, window_bounds = array<i64: 16, 1>}, {pipeline_mode = #tpu.pipeline_mode<synchronous>, transform_indices = @transform_20, window_bounds = array<i64: 1, 21, 16>}, {pipeline_mode = #tpu.pipeline_mode<synchronous>, transform_indices = @transform_21, window_bounds = array<i64: 21, 1>}, {pipeline_mode = #tpu.pipeline_mode<synchronous>, transform_indices = @transform_22, window_bounds = array<i64: 21, 1>}, {transform_indices = @transform_23, window_bounds = array<i64: 1, 21, 64>}, {transform_indices = @transform_24, window_bounds = array<i64: 1, 21, 16>}]} {
    %c0 = arith.constant 0 : index
    %c0_0 = arith.constant 0 : index
    %c0_1 = arith.constant 0 : index
    %0 = vector.load %arg1[%c0, %c0_0, %c0_1] : memref<1x3x256xf32, #tpu.memory_space<vmem>>, vector<1x3x256xf32>
    %1 = vector.shape_cast %0 : vector<1x3x256xf32> to vector<3x256xf32>
    %c0_2 = arith.constant 0 : index
    %c0_3 = arith.constant 0 : index
    %c0_4 = arith.constant 0 : index
    %2 = vector.load %arg2[%c0_2, %c0_3, %c0_4] : memref<1x1x256xf32, #tpu.memory_space<vmem>>, vector<1x1x256xf32>
    %3 = vector.shape_cast %2 : vector<1x1x256xf32> to vector<1x256xf32>
    %cst = arith.constant 0.000000e+00 : f32
    %4 = vector.broadcast %cst : f32 to vector<16x512xf32>
    %c0_5 = arith.constant 0 : index
    %c0_6 = arith.constant 0 : index
    %5 = vector.load %arg26[%c0_5, %c0_6] : memref<16x512xf32, #tpu.memory_space<vmem>>, vector<16x512xf32>
    tpu.vector_store %arg26[%c0_5, %c0_6], %4 {strides = array<i32>} : memref<16x512xf32, #tpu.memory_space<vmem>>, vector<16x512xf32>,
    %c0_7 = arith.constant 0 : index
    %c128 = arith.constant 128 : index
    %6 = vector.load %arg26[%c0_7, %c128] : memref<16x512xf32, #tpu.memory_space<vmem>>, vector<3x256xf32>
    tpu.vector_store %arg26[%c0_7, %c128], %1 {strides = array<i32>} : memref<16x512xf32, #tpu.memory_space<vmem>>, vector<3x256xf32>,
    %c3 = arith.constant 3 : index
    %c128_8 = arith.constant 128 : index
    %7 = vector.load %arg26[%c3, %c128_8] : memref<16x512xf32, #tpu.memory_space<vmem>>, vector<1x256xf32>
    tpu.vector_store %arg26[%c3, %c128_8], %3 {strides = array<i32>} : memref<16x512xf32, #tpu.memory_space<vmem>>, vector<1x256xf32>,
    %8 = tpu.iota {dimensions = array<i32: 1>} : vector<1x256xi32>
    %c15_i32 = arith.constant 15 : i32
    %9 = vector.broadcast %c15_i32 : i32 to vector<1x256xi32>
    %10 = arith.andi %8, %9 : vector<1x256xi32>
    %cst_9 = arith.constant 0.000000e+00 : f32
    %11 = vector.broadcast %cst_9 : f32 to vector<8x256xf32>
    %c0_10 = arith.constant 0 : index
    %c111 = arith.constant 111 : index
    %12 = vector.load %arg26[%c0_10, %c111] : memref<16x512xf32, #tpu.memory_space<vmem>>, vector<4x256xf32>
    %c-1_i32 = arith.constant -1 : i32
    %13 = vector.broadcast %c-1_i32 : i32 to vector<1x256xi32>
    %14 = arith.addi %10, %13 : vector<1x256xi32>
    %c0_i32 = arith.constant 0 : i32
    %15 = vector.broadcast %c0_i32 : i32 to vector<1x256xi32>
    %16 = arith.cmpi sge, %14, %15 : vector<1x256xi32>
    %c-1_i32_11 = arith.constant -1 : i32
    %17 = vector.broadcast %c-1_i32_11 : i32 to vector<1x256xi32>
    %18 = arith.addi %10, %17 : vector<1x256xi32>
    %c16_i32 = arith.constant 16 : i32
    %19 = vector.broadcast %c16_i32 : i32 to vector<1x256xi32>
    %20 = arith.cmpi slt, %18, %19 : vector<1x256xi32>
    %21 = arith.andi %16, %20 : vector<1x256xi1>
    %cst_12 = arith.constant 0.000000e+00 : f32
    %22 = vector.shape_cast %21 : vector<1x256xi1> to vector<1x256xi1>
    %23 = vector.broadcast %22 : vector<1x256xi1> to vector<4x256xi1>
    %24 = vector.broadcast %cst_12 : f32 to vector<4x256xf32>
    %25 = arith.select %23, %12, %24 : vector<4x256xi1>, vector<4x256xf32>
    %c0_13 = arith.constant 0 : index
    %c0_14 = arith.constant 0 : index
    %c0_15 = arith.constant 0 : index
    %26 = vector.load %arg3[%c0_13, %c0_14, %c0_15] : memref<9x8x4xbf16, #tpu.memory_space<vmem>>, vector<1x8x4xbf16>
    %27 = vector.shape_cast %26 : vector<1x8x4xbf16> to vector<8x4xbf16>
    %28 = arith.truncf %25 : vector<4x256xf32> to vector<4x256xbf16>
    %cst_16 = arith.constant dense<0.000000e+00> : vector<8x256xf32>
    %29 = tpu.matmul %27, %28, %cst_16 {dimension_numbers = #tpu.dot_dimension_numbers<[1], [0], [0], [1], [0, 0, 1, 1], [], []>} : vector<8x4xbf16>, vector<4x256xbf16>, vector<8x256xf32> -> vector<8x256xf32>
    %30 = arith.addf %11, %29 : vector<8x256xf32>
    %c0_17 = arith.constant 0 : index
    %c112 = arith.constant 112 : index
    %31 = vector.load %arg26[%c0_17, %c112] : memref<16x512xf32, #tpu.memory_space<vmem>>, vector<4x256xf32>
    %c1 = arith.constant 1 : index
    %c0_18 = arith.constant 0 : index
    %c0_19 = arith.constant 0 : index
    %32 = vector.load %arg3[%c1, %c0_18, %c0_19] : memref<9x8x4xbf16, #tpu.memory_space<vmem>>, vector<1x8x4xbf16>
    %33 = vector.shape_cast %32 : vector<1x8x4xbf16> to vector<8x4xbf16>
    %34 = arith.truncf %31 : vector<4x256xf32> to vector<4x256xbf16>
    %cst_20 = arith.constant dense<0.000000e+00> : vector<8x256xf32>
    %35 = tpu.matmul %33, %34, %cst_20 {dimension_numbers = #tpu.dot_dimension_numbers<[1], [0], [0], [1], [0, 0, 1, 1], [], []>} : vector<8x4xbf16>, vector<4x256xbf16>, vector<8x256xf32> -> vector<8x256xf32>
    %36 = arith.addf %30, %35 : vector<8x256xf32>
    %c0_21 = arith.constant 0 : index
    %c113 = arith.constant 113 : index
    %37 = vector.load %arg26[%c0_21, %c113] : memref<16x512xf32, #tpu.memory_space<vmem>>, vector<4x256xf32>
    %c1_i32 = arith.constant 1 : i32
    %38 = vector.broadcast %c1_i32 : i32 to vector<1x256xi32>
    %39 = arith.addi %10, %38 : vector<1x256xi32>
    %c0_i32_22 = arith.constant 0 : i32
    %40 = vector.broadcast %c0_i32_22 : i32 to vector<1x256xi32>
    %41 = arith.cmpi sge, %39, %40 : vector<1x256xi32>
    %c1_i32_23 = arith.constant 1 : i32
    %42 = vector.broadcast %c1_i32_23 : i32 to vector<1x256xi32>
    %43 = arith.addi %10, %42 : vector<1x256xi32>
    %c16_i32_24 = arith.constant 16 : i32
    %44 = vector.broadcast %c16_i32_24 : i32 to vector<1x256xi32>
    %45 = arith.cmpi slt, %43, %44 : vector<1x256xi32>
    %46 = arith.andi %41, %45 : vector<1x256xi1>
    %cst_25 = arith.constant 0.000000e+00 : f32
    %47 = vector.shape_cast %46 : vector<1x256xi1> to vector<1x256xi1>
    %48 = vector.broadcast %47 : vector<1x256xi1> to vector<4x256xi1>
    %49 = vector.broadcast %cst_25 : f32 to vector<4x256xf32>
    %50 = arith.select %48, %37, %49 : vector<4x256xi1>, vector<4x256xf32>
    %c2 = arith.constant 2 : index
    %c0_26 = arith.constant 0 : index
    %c0_27 = arith.constant 0 : index
    %51 = vector.load %arg3[%c2, %c0_26, %c0_27] : memref<9x8x4xbf16, #tpu.memory_space<vmem>>, vector<1x8x4xbf16>
    %52 = vector.shape_cast %51 : vector<1x8x4xbf16> to vector<8x4xbf16>
    %53 = arith.truncf %50 : vector<4x256xf32> to vector<4x256xbf16>
    %cst_28 = arith.constant dense<0.000000e+00> : vector<8x256xf32>
    %54 = tpu.matmul %52, %53, %cst_28 {dimension_numbers = #tpu.dot_dimension_numbers<[1], [0], [0], [1], [0, 0, 1, 1], [], []>} : vector<8x4xbf16>, vector<4x256xbf16>, vector<8x256xf32> -> vector<8x256xf32>
    %55 = arith.addf %36, %54 : vector<8x256xf32>
    %c0_29 = arith.constant 0 : index
    %c127 = arith.constant 127 : index
    %56 = vector.load %arg26[%c0_29, %c127] : memref<16x512xf32, #tpu.memory_space<vmem>>, vector<4x256xf32>
    %c-1_i32_30 = arith.constant -1 : i32
    %57 = vector.broadcast %c-1_i32_30 : i32 to vector<1x256xi32>
    %58 = arith.addi %10, %57 : vector<1x256xi32>
    %c0_i32_31 = arith.constant 0 : i32
    %59 = vector.broadcast %c0_i32_31 : i32 to vector<1x256xi32>
    %60 = arith.cmpi sge, %58, %59 : vector<1x256xi32>
    %c-1_i32_32 = arith.constant -1 : i32
    %61 = vector.broadcast %c-1_i32_32 : i32 to vector<1x256xi32>
    %62 = arith.addi %10, %61 : vector<1x256xi32>
    %c16_i32_33 = arith.constant 16 : i32
    %63 = vector.broadcast %c16_i32_33 : i32 to vector<1x256xi32>
    %64 = arith.cmpi slt, %62, %63 : vector<1x256xi32>
    %65 = arith.andi %60, %64 : vector<1x256xi1>
    %cst_34 = arith.constant 0.000000e+00 : f32
    %66 = vector.shape_cast %65 : vector<1x256xi1> to vector<1x256xi1>
    %67 = vector.broadcast %66 : vector<1x256xi1> to vector<4x256xi1>
    %68 = vector.broadcast %cst_34 : f32 to vector<4x256xf32>
    %69 = arith.select %67, %56, %68 : vector<4x256xi1>, vector<4x256xf32>
    %c3_35 = arith.constant 3 : index
    %c0_36 = arith.constant 0 : index
    %c0_37 = arith.constant 0 : index
    %70 = vector.load %arg3[%c3_35, %c0_36, %c0_37] : memref<9x8x4xbf16, #tpu.memory_space<vmem>>, vector<1x8x4xbf16>
    %71 = vector.shape_cast %70 : vector<1x8x4xbf16> to vector<8x4xbf16>
    %72 = arith.truncf %69 : vector<4x256xf32> to vector<4x256xbf16>
    %cst_38 = arith.constant dense<0.000000e+00> : vector<8x256xf32>
    %73 = tpu.matmul %71, %72, %cst_38 {dimension_numbers = #tpu.dot_dimension_numbers<[1], [0], [0], [1], [0, 0, 1, 1], [], []>} : vector<8x4xbf16>, vector<4x256xbf16>, vector<8x256xf32> -> vector<8x256xf32>
    %74 = arith.addf %55, %73 : vector<8x256xf32>
    %c0_39 = arith.constant 0 : index
    %c128_40 = arith.constant 128 : index
    %75 = vector.load %arg26[%c0_39, %c128_40] : memref<16x512xf32, #tpu.memory_space<vmem>>, vector<4x256xf32>
    %c4 = arith.constant 4 : index
    %c0_41 = arith.constant 0 : index
    %c0_42 = arith.constant 0 : index
    %76 = vector.load %arg3[%c4, %c0_41, %c0_42] : memref<9x8x4xbf16, #tpu.memory_space<vmem>>, vector<1x8x4xbf16>
    %77 = vector.shape_cast %76 : vector<1x8x4xbf16> to vector<8x4xbf16>
    %78 = arith.truncf %75 : vector<4x256xf32> to vector<4x256xbf16>
    %cst_43 = arith.constant dense<0.000000e+00> : vector<8x256xf32>
    %79 = tpu.matmul %77, %78, %cst_43 {dimension_numbers = #tpu.dot_dimension_numbers<[1], [0], [0], [1], [0, 0, 1, 1], [], []>} : vector<8x4xbf16>, vector<4x256xbf16>, vector<8x256xf32> -> vector<8x256xf32>
    %80 = arith.addf %74, %79 : vector<8x256xf32>
    %c0_44 = arith.constant 0 : index
    %c129 = arith.constant 129 : index
    %81 = vector.load %arg26[%c0_44, %c129] : memref<16x512xf32, #tpu.memory_space<vmem>>, vector<4x256xf32>
    %c1_i32_45 = arith.constant 1 : i32
    %82 = vector.broadcast %c1_i32_45 : i32 to vector<1x256xi32>
    %83 = arith.addi %10, %82 : vector<1x256xi32>
    %c0_i32_46 = arith.constant 0 : i32
    %84 = vector.broadcast %c0_i32_46 : i32 to vector<1x256xi32>
    %85 = arith.cmpi sge, %83, %84 : vector<1x256xi32>
    %c1_i32_47 = arith.constant 1 : i32
    %86 = vector.broadcast %c1_i32_47 : i32 to vector<1x256xi32>
    %87 = arith.addi %10, %86 : vector<1x256xi32>
    %c16_i32_48 = arith.constant 16 : i32
    %88 = vector.broadcast %c16_i32_48 : i32 to vector<1x256xi32>
    %89 = arith.cmpi slt, %87, %88 : vector<1x256xi32>
    %90 = arith.andi %85, %89 : vector<1x256xi1>
    %cst_49 = arith.constant 0.000000e+00 : f32
    %91 = vector.shape_cast %90 : vector<1x256xi1> to vector<1x256xi1>
    %92 = vector.broadcast %91 : vector<1x256xi1> to vector<4x256xi1>
    %93 = vector.broadcast %cst_49 : f32 to vector<4x256xf32>
    %94 = arith.select %92, %81, %93 : vector<4x256xi1>, vector<4x256xf32>
    %c5 = arith.constant 5 : index
    %c0_50 = arith.constant 0 : index
    %c0_51 = arith.constant 0 : index
    %95 = vector.load %arg3[%c5, %c0_50, %c0_51] : memref<9x8x4xbf16, #tpu.memory_space<vmem>>, vector<1x8x4xbf16>
    %96 = vector.shape_cast %95 : vector<1x8x4xbf16> to vector<8x4xbf16>
    %97 = arith.truncf %94 : vector<4x256xf32> to vector<4x256xbf16>
    %cst_52 = arith.constant dense<0.000000e+00> : vector<8x256xf32>
    %98 = tpu.matmul %96, %97, %cst_52 {dimension_numbers = #tpu.dot_dimension_numbers<[1], [0], [0], [1], [0, 0, 1, 1], [], []>} : vector<8x4xbf16>, vector<4x256xbf16>, vector<8x256xf32> -> vector<8x256xf32>
    %99 = arith.addf %80, %98 : vector<8x256xf32>
    %c0_53 = arith.constant 0 : index
    %c143 = arith.constant 143 : index
    %100 = vector.load %arg26[%c0_53, %c143] : memref<16x512xf32, #tpu.memory_space<vmem>>, vector<4x256xf32>
    %c-1_i32_54 = arith.constant -1 : i32
    %101 = vector.broadcast %c-1_i32_54 : i32 to vector<1x256xi32>
    %102 = arith.addi %10, %101 : vector<1x256xi32>
    %c0_i32_55 = arith.constant 0 : i32
    %103 = vector.broadcast %c0_i32_55 : i32 to vector<1x256xi32>
    %104 = arith.cmpi sge, %102, %103 : vector<1x256xi32>
    %c-1_i32_56 = arith.constant -1 : i32
    %105 = vector.broadcast %c-1_i32_56 : i32 to vector<1x256xi32>
    %106 = arith.addi %10, %105 : vector<1x256xi32>
    %c16_i32_57 = arith.constant 16 : i32
    %107 = vector.broadcast %c16_i32_57 : i32 to vector<1x256xi32>
    %108 = arith.cmpi slt, %106, %107 : vector<1x256xi32>
    %109 = arith.andi %104, %108 : vector<1x256xi1>
    %cst_58 = arith.constant 0.000000e+00 : f32
    %110 = vector.shape_cast %109 : vector<1x256xi1> to vector<1x256xi1>
    %111 = vector.broadcast %110 : vector<1x256xi1> to vector<4x256xi1>
    %112 = vector.broadcast %cst_58 : f32 to vector<4x256xf32>
    %113 = arith.select %111, %100, %112 : vector<4x256xi1>, vector<4x256xf32>
    %c6 = arith.constant 6 : index
    %c0_59 = arith.constant 0 : index
    %c0_60 = arith.constant 0 : index
    %114 = vector.load %arg3[%c6, %c0_59, %c0_60] : memref<9x8x4xbf16, #tpu.memory_space<vmem>>, vector<1x8x4xbf16>
    %115 = vector.shape_cast %114 : vector<1x8x4xbf16> to vector<8x4xbf16>
    %116 = arith.truncf %113 : vector<4x256xf32> to vector<4x256xbf16>
    %cst_61 = arith.constant dense<0.000000e+00> : vector<8x256xf32>
    %117 = tpu.matmul %115, %116, %cst_61 {dimension_numbers = #tpu.dot_dimension_numbers<[1], [0], [0], [1], [0, 0, 1, 1], [], []>} : vector<8x4xbf16>, vector<4x256xbf16>, vector<8x256xf32> -> vector<8x256xf32>
    %118 = arith.addf %99, %117 : vector<8x256xf32>
    %c0_62 = arith.constant 0 : index
    %c144 = arith.constant 144 : index
    %119 = vector.load %arg26[%c0_62, %c144] : memref<16x512xf32, #tpu.memory_space<vmem>>, vector<4x256xf32>
    %c7 = arith.constant 7 : index
    %c0_63 = arith.constant 0 : index
    %c0_64 = arith.constant 0 : index
    %120 = vector.load %arg3[%c7, %c0_63, %c0_64] : memref<9x8x4xbf16, #tpu.memory_space<vmem>>, vector<1x8x4xbf16>
    %121 = vector.shape_cast %120 : vector<1x8x4xbf16> to vector<8x4xbf16>
    %122 = arith.truncf %119 : vector<4x256xf32> to vector<4x256xbf16>
    %cst_65 = arith.constant dense<0.000000e+00> : vector<8x256xf32>
    %123 = tpu.matmul %121, %122, %cst_65 {dimension_numbers = #tpu.dot_dimension_numbers<[1], [0], [0], [1], [0, 0, 1, 1], [], []>} : vector<8x4xbf16>, vector<4x256xbf16>, vector<8x256xf32> -> vector<8x256xf32>
    %124 = arith.addf %118, %123 : vector<8x256xf32>
    %c0_66 = arith.constant 0 : index
    %c145 = arith.constant 145 : index
    %125 = vector.load %arg26[%c0_66, %c145] : memref<16x512xf32, #tpu.memory_space<vmem>>, vector<4x256xf32>
    %c1_i32_67 = arith.constant 1 : i32
    %126 = vector.broadcast %c1_i32_67 : i32 to vector<1x256xi32>
    %127 = arith.addi %10, %126 : vector<1x256xi32>
    %c0_i32_68 = arith.constant 0 : i32
    %128 = vector.broadcast %c0_i32_68 : i32 to vector<1x256xi32>
    %129 = arith.cmpi sge, %127, %128 : vector<1x256xi32>
    %c1_i32_69 = arith.constant 1 : i32
    %130 = vector.broadcast %c1_i32_69 : i32 to vector<1x256xi32>
    %131 = arith.addi %10, %130 : vector<1x256xi32>
    %c16_i32_70 = arith.constant 16 : i32
    %132 = vector.broadcast %c16_i32_70 : i32 to vector<1x256xi32>
    %133 = arith.cmpi slt, %131, %132 : vector<1x256xi32>
    %134 = arith.andi %129, %133 : vector<1x256xi1>
    %cst_71 = arith.constant 0.000000e+00 : f32
    %135 = vector.shape_cast %134 : vector<1x256xi1> to vector<1x256xi1>
    %136 = vector.broadcast %135 : vector<1x256xi1> to vector<4x256xi1>
    %137 = vector.broadcast %cst_71 : f32 to vector<4x256xf32>
    %138 = arith.select %136, %125, %137 : vector<4x256xi1>, vector<4x256xf32>
    %c8 = arith.constant 8 : index
    %c0_72 = arith.constant 0 : index
    %c0_73 = arith.constant 0 : index
    %139 = vector.load %arg3[%c8, %c0_72, %c0_73] : memref<9x8x4xbf16, #tpu.memory_space<vmem>>, vector<1x8x4xbf16>
    %140 = vector.shape_cast %139 : vector<1x8x4xbf16> to vector<8x4xbf16>
    %141 = arith.truncf %138 : vector<4x256xf32> to vector<4x256xbf16>
    %cst_74 = arith.constant dense<0.000000e+00> : vector<8x256xf32>
    %142 = tpu.matmul %140, %141, %cst_74 {dimension_numbers = #tpu.dot_dimension_numbers<[1], [0], [0], [1], [0, 0, 1, 1], [], []>} : vector<8x4xbf16>, vector<4x256xbf16>, vector<8x256xf32> -> vector<8x256xf32>
    %143 = arith.addf %124, %142 : vector<8x256xf32>
    %c0_75 = arith.constant 0 : index
    %c0_76 = arith.constant 0 : index
    %144 = vector.load %arg4[%c0_75, %c0_76] : memref<8x1xf32, #tpu.memory_space<vmem>>, vector<8x1xf32>
    %145 = vector.broadcast %144 : vector<8x1xf32> to vector<8x256xf32>
    %146 = arith.mulf %143, %145 : vector<8x256xf32>
    %c0_77 = arith.constant 0 : index
    %c0_78 = arith.constant 0 : index
    %147 = vector.load %arg5[%c0_77, %c0_78] : memref<8x1xf32, #tpu.memory_space<vmem>>, vector<8x1xf32>
    %148 = vector.broadcast %147 : vector<8x1xf32> to vector<8x256xf32>
    %149 = arith.addf %146, %148 : vector<8x256xf32>
    %cst_79 = arith.constant 0.000000e+00 : f32
    %150 = vector.broadcast %cst_79 : f32 to vector<8x256xf32>
    %151 = arith.cmpf ogt, %149, %150 : vector<8x256xf32>
    %cst_80 = arith.constant 1.000000e-01 : f32
    %152 = vector.broadcast %cst_80 : f32 to vector<8x256xf32>
    %153 = arith.mulf %152, %149 : vector<8x256xf32>
    %154 = arith.select %151, %149, %153 : vector<8x256xi1>, vector<8x256xf32>
    %cst_81 = arith.constant 0.000000e+00 : f32
    %155 = vector.broadcast %cst_81 : f32 to vector<16x512xf32>
    %c0_82 = arith.constant 0 : index
    %c0_83 = arith.constant 0 : index
    %156 = vector.load %arg26[%c0_82, %c0_83] : memref<16x512xf32, #tpu.memory_space<vmem>>, vector<16x512xf32>
    tpu.vector_store %arg26[%c0_82, %c0_83], %155 {strides = array<i32>} : memref<16x512xf32, #tpu.memory_space<vmem>>, vector<16x512xf32>,
    %c0_84 = arith.constant 0 : index
    %c128_85 = arith.constant 128 : index
    %157 = vector.load %arg26[%c0_84, %c128_85] : memref<16x512xf32, #tpu.memory_space<vmem>>, vector<8x256xf32>
    tpu.vector_store %arg26[%c0_84, %c128_85], %154 {strides = array<i32>} : memref<16x512xf32, #tpu.memory_space<vmem>>, vector<8x256xf32>,
    %158 = tpu.iota {dimensions = array<i32: 1>} : vector<1x256xi32>
    %c15_i32_86 = arith.constant 15 : i32
    %159 = vector.broadcast %c15_i32_86 : i32 to vector<1x256xi32>
    %160 = arith.andi %158, %159 : vector<1x256xi32>
    %cst_87 = arith.constant 0.000000e+00 : f32
    %161 = vector.broadcast %cst_87 : f32 to vector<16x256xf32>
    %c0_88 = arith.constant 0 : index
    %c111_89 = arith.constant 111 : index
    %162 = vector.load %arg26[%c0_88, %c111_89] : memref<16x512xf32, #tpu.memory_space<vmem>>, vector<8x256xf32>
    %c-1_i32_90 = arith.constant -1 : i32
    %163 = vector.broadcast %c-1_i32_90 : i32 to vector<1x256xi32>
    %164 = arith.addi %160, %163 : vector<1x256xi32>
    %c0_i32_91 = arith.constant 0 : i32
    %165 = vector.broadcast %c0_i32_91 : i32 to vector<1x256xi32>
    %166 = arith.cmpi sge, %164, %165 : vector<1x256xi32>
    %c-1_i32_92 = arith.constant -1 : i32
    %167 = vector.broadcast %c-1_i32_92 : i32 to vector<1x256xi32>
    %168 = arith.addi %160, %167 : vector<1x256xi32>
    %c16_i32_93 = arith.constant 16 : i32
    %169 = vector.broadcast %c16_i32_93 : i32 to vector<1x256xi32>
    %170 = arith.cmpi slt, %168, %169 : vector<1x256xi32>
    %171 = arith.andi %166, %170 : vector<1x256xi1>
    %cst_94 = arith.constant 0.000000e+00 : f32
    %172 = vector.shape_cast %171 : vector<1x256xi1> to vector<1x256xi1>
    %173 = vector.broadcast %172 : vector<1x256xi1> to vector<8x256xi1>
    %174 = vector.broadcast %cst_94 : f32 to vector<8x256xf32>
    %175 = arith.select %173, %162, %174 : vector<8x256xi1>, vector<8x256xf32>
    %c0_95 = arith.constant 0 : index
    %c0_96 = arith.constant 0 : index
    %c0_97 = arith.constant 0 : index
    %176 = vector.load %arg6[%c0_95, %c0_96, %c0_97] : memref<9x16x8xbf16, #tpu.memory_space<vmem>>, vector<1x16x8xbf16>
    %177 = vector.shape_cast %176 : vector<1x16x8xbf16> to vector<16x8xbf16>
    %178 = arith.truncf %175 : vector<8x256xf32> to vector<8x256xbf16>
    %cst_98 = arith.constant dense<0.000000e+00> : vector<16x256xf32>
    %179 = tpu.matmul %177, %178, %cst_98 {dimension_numbers = #tpu.dot_dimension_numbers<[1], [0], [0], [1], [0, 0, 1, 1], [], []>} : vector<16x8xbf16>, vector<8x256xbf16>, vector<16x256xf32> -> vector<16x256xf32>
    %180 = arith.addf %161, %179 : vector<16x256xf32>
    %c0_99 = arith.constant 0 : index
    %c112_100 = arith.constant 112 : index
    %181 = vector.load %arg26[%c0_99, %c112_100] : memref<16x512xf32, #tpu.memory_space<vmem>>, vector<8x256xf32>
    %c1_101 = arith.constant 1 : index
    %c0_102 = arith.constant 0 : index
    %c0_103 = arith.constant 0 : index
    %182 = vector.load %arg6[%c1_101, %c0_102, %c0_103] : memref<9x16x8xbf16, #tpu.memory_space<vmem>>, vector<1x16x8xbf16>
    %183 = vector.shape_cast %182 : vector<1x16x8xbf16> to vector<16x8xbf16>
    %184 = arith.truncf %181 : vector<8x256xf32> to vector<8x256xbf16>
    %cst_104 = arith.constant dense<0.000000e+00> : vector<16x256xf32>
    %185 = tpu.matmul %183, %184, %cst_104 {dimension_numbers = #tpu.dot_dimension_numbers<[1], [0], [0], [1], [0, 0, 1, 1], [], []>} : vector<16x8xbf16>, vector<8x256xbf16>, vector<16x256xf32> -> vector<16x256xf32>
    %186 = arith.addf %180, %185 : vector<16x256xf32>
    %c0_105 = arith.constant 0 : index
    %c113_106 = arith.constant 113 : index
    %187 = vector.load %arg26[%c0_105, %c113_106] : memref<16x512xf32, #tpu.memory_space<vmem>>, vector<8x256xf32>
    %c1_i32_107 = arith.constant 1 : i32
    %188 = vector.broadcast %c1_i32_107 : i32 to vector<1x256xi32>
    %189 = arith.addi %160, %188 : vector<1x256xi32>
    %c0_i32_108 = arith.constant 0 : i32
    %190 = vector.broadcast %c0_i32_108 : i32 to vector<1x256xi32>
    %191 = arith.cmpi sge, %189, %190 : vector<1x256xi32>
    %c1_i32_109 = arith.constant 1 : i32
    %192 = vector.broadcast %c1_i32_109 : i32 to vector<1x256xi32>
    %193 = arith.addi %160, %192 : vector<1x256xi32>
    %c16_i32_110 = arith.constant 16 : i32
    %194 = vector.broadcast %c16_i32_110 : i32 to vector<1x256xi32>
    %195 = arith.cmpi slt, %193, %194 : vector<1x256xi32>
    %196 = arith.andi %191, %195 : vector<1x256xi1>
    %cst_111 = arith.constant 0.000000e+00 : f32
    %197 = vector.shape_cast %196 : vector<1x256xi1> to vector<1x256xi1>
    %198 = vector.broadcast %197 : vector<1x256xi1> to vector<8x256xi1>
    %199 = vector.broadcast %cst_111 : f32 to vector<8x256xf32>
    %200 = arith.select %198, %187, %199 : vector<8x256xi1>, vector<8x256xf32>
    %c2_112 = arith.constant 2 : index
    %c0_113 = arith.constant 0 : index
    %c0_114 = arith.constant 0 : index
    %201 = vector.load %arg6[%c2_112, %c0_113, %c0_114] : memref<9x16x8xbf16, #tpu.memory_space<vmem>>, vector<1x16x8xbf16>
    %202 = vector.shape_cast %201 : vector<1x16x8xbf16> to vector<16x8xbf16>
    %203 = arith.truncf %200 : vector<8x256xf32> to vector<8x256xbf16>
    %cst_115 = arith.constant dense<0.000000e+00> : vector<16x256xf32>
    %204 = tpu.matmul %202, %203, %cst_115 {dimension_numbers = #tpu.dot_dimension_numbers<[1], [0], [0], [1], [0, 0, 1, 1], [], []>} : vector<16x8xbf16>, vector<8x256xbf16>, vector<16x256xf32> -> vector<16x256xf32>
    %205 = arith.addf %186, %204 : vector<16x256xf32>
    %c0_116 = arith.constant 0 : index
    %c127_117 = arith.constant 127 : index
    %206 = vector.load %arg26[%c0_116, %c127_117] : memref<16x512xf32, #tpu.memory_space<vmem>>, vector<8x256xf32>
    %c-1_i32_118 = arith.constant -1 : i32
    %207 = vector.broadcast %c-1_i32_118 : i32 to vector<1x256xi32>
    %208 = arith.addi %160, %207 : vector<1x256xi32>
    %c0_i32_119 = arith.constant 0 : i32
    %209 = vector.broadcast %c0_i32_119 : i32 to vector<1x256xi32>
    %210 = arith.cmpi sge, %208, %209 : vector<1x256xi32>
    %c-1_i32_120 = arith.constant -1 : i32
    %211 = vector.broadcast %c-1_i32_120 : i32 to vector<1x256xi32>
    %212 = arith.addi %160, %211 : vector<1x256xi32>
    %c16_i32_121 = arith.constant 16 : i32
    %213 = vector.broadcast %c16_i32_121 : i32 to vector<1x256xi32>
    %214 = arith.cmpi slt, %212, %213 : vector<1x256xi32>
    %215 = arith.andi %210, %214 : vector<1x256xi1>
    %cst_122 = arith.constant 0.000000e+00 : f32
    %216 = vector.shape_cast %215 : vector<1x256xi1> to vector<1x256xi1>
    %217 = vector.broadcast %216 : vector<1x256xi1> to vector<8x256xi1>
    %218 = vector.broadcast %cst_122 : f32 to vector<8x256xf32>
    %219 = arith.select %217, %206, %218 : vector<8x256xi1>, vector<8x256xf32>
    %c3_123 = arith.constant 3 : index
    %c0_124 = arith.constant 0 : index
    %c0_125 = arith.constant 0 : index
    %220 = vector.load %arg6[%c3_123, %c0_124, %c0_125] : memref<9x16x8xbf16, #tpu.memory_space<vmem>>, vector<1x16x8xbf16>
    %221 = vector.shape_cast %220 : vector<1x16x8xbf16> to vector<16x8xbf16>
    %222 = arith.truncf %219 : vector<8x256xf32> to vector<8x256xbf16>
    %cst_126 = arith.constant dense<0.000000e+00> : vector<16x256xf32>
    %223 = tpu.matmul %221, %222, %cst_126 {dimension_numbers = #tpu.dot_dimension_numbers<[1], [0], [0], [1], [0, 0, 1, 1], [], []>} : vector<16x8xbf16>, vector<8x256xbf16>, vector<16x256xf32> -> vector<16x256xf32>
    %224 = arith.addf %205, %223 : vector<16x256xf32>
    %c0_127 = arith.constant 0 : index
    %c128_128 = arith.constant 128 : index
    %225 = vector.load %arg26[%c0_127, %c128_128] : memref<16x512xf32, #tpu.memory_space<vmem>>, vector<8x256xf32>
    %c4_129 = arith.constant 4 : index
    %c0_130 = arith.constant 0 : index
    %c0_131 = arith.constant 0 : index
    %226 = vector.load %arg6[%c4_129, %c0_130, %c0_131] : memref<9x16x8xbf16, #tpu.memory_space<vmem>>, vector<1x16x8xbf16>
    %227 = vector.shape_cast %226 : vector<1x16x8xbf16> to vector<16x8xbf16>
    %228 = arith.truncf %225 : vector<8x256xf32> to vector<8x256xbf16>
    %cst_132 = arith.constant dense<0.000000e+00> : vector<16x256xf32>
    %229 = tpu.matmul %227, %228, %cst_132 {dimension_numbers = #tpu.dot_dimension_numbers<[1], [0], [0], [1], [0, 0, 1, 1], [], []>} : vector<16x8xbf16>, vector<8x256xbf16>, vector<16x256xf32> -> vector<16x256xf32>
    %230 = arith.addf %224, %229 : vector<16x256xf32>
    %c0_133 = arith.constant 0 : index
    %c129_134 = arith.constant 129 : index
    %231 = vector.load %arg26[%c0_133, %c129_134] : memref<16x512xf32, #tpu.memory_space<vmem>>, vector<8x256xf32>
    %c1_i32_135 = arith.constant 1 : i32
    %232 = vector.broadcast %c1_i32_135 : i32 to vector<1x256xi32>
    %233 = arith.addi %160, %232 : vector<1x256xi32>
    %c0_i32_136 = arith.constant 0 : i32
    %234 = vector.broadcast %c0_i32_136 : i32 to vector<1x256xi32>
    %235 = arith.cmpi sge, %233, %234 : vector<1x256xi32>
    %c1_i32_137 = arith.constant 1 : i32
    %236 = vector.broadcast %c1_i32_137 : i32 to vector<1x256xi32>
    %237 = arith.addi %160, %236 : vector<1x256xi32>
    %c16_i32_138 = arith.constant 16 : i32
    %238 = vector.broadcast %c16_i32_138 : i32 to vector<1x256xi32>
    %239 = arith.cmpi slt, %237, %238 : vector<1x256xi32>
    %240 = arith.andi %235, %239 : vector<1x256xi1>
    %cst_139 = arith.constant 0.000000e+00 : f32
    %241 = vector.shape_cast %240 : vector<1x256xi1> to vector<1x256xi1>
    %242 = vector.broadcast %241 : vector<1x256xi1> to vector<8x256xi1>
    %243 = vector.broadcast %cst_139 : f32 to vector<8x256xf32>
    %244 = arith.select %242, %231, %243 : vector<8x256xi1>, vector<8x256xf32>
    %c5_140 = arith.constant 5 : index
    %c0_141 = arith.constant 0 : index
    %c0_142 = arith.constant 0 : index
    %245 = vector.load %arg6[%c5_140, %c0_141, %c0_142] : memref<9x16x8xbf16, #tpu.memory_space<vmem>>, vector<1x16x8xbf16>
    %246 = vector.shape_cast %245 : vector<1x16x8xbf16> to vector<16x8xbf16>
    %247 = arith.truncf %244 : vector<8x256xf32> to vector<8x256xbf16>
    %cst_143 = arith.constant dense<0.000000e+00> : vector<16x256xf32>
    %248 = tpu.matmul %246, %247, %cst_143 {dimension_numbers = #tpu.dot_dimension_numbers<[1], [0], [0], [1], [0, 0, 1, 1], [], []>} : vector<16x8xbf16>, vector<8x256xbf16>, vector<16x256xf32> -> vector<16x256xf32>
    %249 = arith.addf %230, %248 : vector<16x256xf32>
    %c0_144 = arith.constant 0 : index
    %c143_145 = arith.constant 143 : index
    %250 = vector.load %arg26[%c0_144, %c143_145] : memref<16x512xf32, #tpu.memory_space<vmem>>, vector<8x256xf32>
    %c-1_i32_146 = arith.constant -1 : i32
    %251 = vector.broadcast %c-1_i32_146 : i32 to vector<1x256xi32>
    %252 = arith.addi %160, %251 : vector<1x256xi32>
    %c0_i32_147 = arith.constant 0 : i32
    %253 = vector.broadcast %c0_i32_147 : i32 to vector<1x256xi32>
    %254 = arith.cmpi sge, %252, %253 : vector<1x256xi32>
    %c-1_i32_148 = arith.constant -1 : i32
    %255 = vector.broadcast %c-1_i32_148 : i32 to vector<1x256xi32>
    %256 = arith.addi %160, %255 : vector<1x256xi32>
    %c16_i32_149 = arith.constant 16 : i32
    %257 = vector.broadcast %c16_i32_149 : i32 to vector<1x256xi32>
    %258 = arith.cmpi slt, %256, %257 : vector<1x256xi32>
    %259 = arith.andi %254, %258 : vector<1x256xi1>
    %cst_150 = arith.constant 0.000000e+00 : f32
    %260 = vector.shape_cast %259 : vector<1x256xi1> to vector<1x256xi1>
    %261 = vector.broadcast %260 : vector<1x256xi1> to vector<8x256xi1>
    %262 = vector.broadcast %cst_150 : f32 to vector<8x256xf32>
    %263 = arith.select %261, %250, %262 : vector<8x256xi1>, vector<8x256xf32>
    %c6_151 = arith.constant 6 : index
    %c0_152 = arith.constant 0 : index
    %c0_153 = arith.constant 0 : index
    %264 = vector.load %arg6[%c6_151, %c0_152, %c0_153] : memref<9x16x8xbf16, #tpu.memory_space<vmem>>, vector<1x16x8xbf16>
    %265 = vector.shape_cast %264 : vector<1x16x8xbf16> to vector<16x8xbf16>
    %266 = arith.truncf %263 : vector<8x256xf32> to vector<8x256xbf16>
    %cst_154 = arith.constant dense<0.000000e+00> : vector<16x256xf32>
    %267 = tpu.matmul %265, %266, %cst_154 {dimension_numbers = #tpu.dot_dimension_numbers<[1], [0], [0], [1], [0, 0, 1, 1], [], []>} : vector<16x8xbf16>, vector<8x256xbf16>, vector<16x256xf32> -> vector<16x256xf32>
    %268 = arith.addf %249, %267 : vector<16x256xf32>
    %c0_155 = arith.constant 0 : index
    %c144_156 = arith.constant 144 : index
    %269 = vector.load %arg26[%c0_155, %c144_156] : memref<16x512xf32, #tpu.memory_space<vmem>>, vector<8x256xf32>
    %c7_157 = arith.constant 7 : index
    %c0_158 = arith.constant 0 : index
    %c0_159 = arith.constant 0 : index
    %270 = vector.load %arg6[%c7_157, %c0_158, %c0_159] : memref<9x16x8xbf16, #tpu.memory_space<vmem>>, vector<1x16x8xbf16>
    %271 = vector.shape_cast %270 : vector<1x16x8xbf16> to vector<16x8xbf16>
    %272 = arith.truncf %269 : vector<8x256xf32> to vector<8x256xbf16>
    %cst_160 = arith.constant dense<0.000000e+00> : vector<16x256xf32>
    %273 = tpu.matmul %271, %272, %cst_160 {dimension_numbers = #tpu.dot_dimension_numbers<[1], [0], [0], [1], [0, 0, 1, 1], [], []>} : vector<16x8xbf16>, vector<8x256xbf16>, vector<16x256xf32> -> vector<16x256xf32>
    %274 = arith.addf %268, %273 : vector<16x256xf32>
    %c0_161 = arith.constant 0 : index
    %c145_162 = arith.constant 145 : index
    %275 = vector.load %arg26[%c0_161, %c145_162] : memref<16x512xf32, #tpu.memory_space<vmem>>, vector<8x256xf32>
    %c1_i32_163 = arith.constant 1 : i32
    %276 = vector.broadcast %c1_i32_163 : i32 to vector<1x256xi32>
    %277 = arith.addi %160, %276 : vector<1x256xi32>
    %c0_i32_164 = arith.constant 0 : i32
    %278 = vector.broadcast %c0_i32_164 : i32 to vector<1x256xi32>
    %279 = arith.cmpi sge, %277, %278 : vector<1x256xi32>
    %c1_i32_165 = arith.constant 1 : i32
    %280 = vector.broadcast %c1_i32_165 : i32 to vector<1x256xi32>
    %281 = arith.addi %160, %280 : vector<1x256xi32>
    %c16_i32_166 = arith.constant 16 : i32
    %282 = vector.broadcast %c16_i32_166 : i32 to vector<1x256xi32>
    %283 = arith.cmpi slt, %281, %282 : vector<1x256xi32>
    %284 = arith.andi %279, %283 : vector<1x256xi1>
    %cst_167 = arith.constant 0.000000e+00 : f32
    %285 = vector.shape_cast %284 : vector<1x256xi1> to vector<1x256xi1>
    %286 = vector.broadcast %285 : vector<1x256xi1> to vector<8x256xi1>
    %287 = vector.broadcast %cst_167 : f32 to vector<8x256xf32>
    %288 = arith.select %286, %275, %287 : vector<8x256xi1>, vector<8x256xf32>
    %c8_168 = arith.constant 8 : index
    %c0_169 = arith.constant 0 : index
    %c0_170 = arith.constant 0 : index
    %289 = vector.load %arg6[%c8_168, %c0_169, %c0_170] : memref<9x16x8xbf16, #tpu.memory_space<vmem>>, vector<1x16x8xbf16>
    %290 = vector.shape_cast %289 : vector<1x16x8xbf16> to vector<16x8xbf16>
    %291 = arith.truncf %288 : vector<8x256xf32> to vector<8x256xbf16>
    %cst_171 = arith.constant dense<0.000000e+00> : vector<16x256xf32>
    %292 = tpu.matmul %290, %291, %cst_171 {dimension_numbers = #tpu.dot_dimension_numbers<[1], [0], [0], [1], [0, 0, 1, 1], [], []>} : vector<16x8xbf16>, vector<8x256xbf16>, vector<16x256xf32> -> vector<16x256xf32>
    %293 = arith.addf %274, %292 : vector<16x256xf32>
    %294 = tpu.iota {dimensions = array<i32: 1>} : vector<1x64xi32>
    %c3_i32 = arith.constant 3 : i32
    %295 = vector.broadcast %c3_i32 : i32 to vector<1x64xi32>
    %296 = arith.shrsi %294, %295 : vector<1x64xi32>
    %297 = tpu.iota {dimensions = array<i32: 1>} : vector<1x64xi32>
    %c7_i32 = arith.constant 7 : i32
    %298 = vector.broadcast %c7_i32 : i32 to vector<1x64xi32>
    %299 = arith.andi %297, %298 : vector<1x64xi32>
    %c32_i32 = arith.constant 32 : i32
    %300 = vector.broadcast %c32_i32 : i32 to vector<1x64xi32>
    %301 = arith.muli %300, %296 : vector<1x64xi32>
    %c2_i32 = arith.constant 2 : i32
    %302 = vector.broadcast %c2_i32 : i32 to vector<1x64xi32>
    %303 = arith.muli %302, %299 : vector<1x64xi32>
    %304 = arith.addi %301, %303 : vector<1x64xi32>
    %305 = tpu.iota {dimensions = array<i32: 0>} : vector<256x64xi32>
    %306 = vector.broadcast %304 : vector<1x64xi32> to vector<256x64xi32>
    %307 = arith.cmpi eq, %305, %306 : vector<256x64xi32>
    %cst_172 = arith.constant 1.000000e+00 : f32
    %cst_173 = arith.constant 0.000000e+00 : f32
    %308 = vector.broadcast %cst_172 : f32 to vector<256x64xf32>
    %309 = vector.broadcast %cst_173 : f32 to vector<256x64xf32>
    %310 = arith.select %307, %308, %309 : vector<256x64xi1>, vector<256x64xf32>
    %cst_174 = arith.constant dense<0.000000e+00> : vector<16x64xf32>
    %311 = tpu.matmul %293, %310, %cst_174 {dimension_numbers = #tpu.dot_dimension_numbers<[1], [0], [0], [1], [0, 0, 1, 1], [], []>} : vector<16x256xf32>, vector<256x64xf32>, vector<16x64xf32> -> vector<16x64xf32>
    %c0_175 = arith.constant 0 : index
    %c0_176 = arith.constant 0 : index
    %312 = vector.load %arg7[%c0_175, %c0_176] : memref<16x1xf32, #tpu.memory_space<vmem>>, vector<16x1xf32>
    %313 = vector.broadcast %312 : vector<16x1xf32> to vector<16x64xf32>
    %314 = arith.mulf %311, %313 : vector<16x64xf32>
    %c0_177 = arith.constant 0 : index
    %c0_178 = arith.constant 0 : index
    %315 = vector.load %arg8[%c0_177, %c0_178] : memref<16x1xf32, #tpu.memory_space<vmem>>, vector<16x1xf32>
    %316 = vector.broadcast %315 : vector<16x1xf32> to vector<16x64xf32>
    %317 = arith.addf %314, %316 : vector<16x64xf32>
    %cst_179 = arith.constant 0.000000e+00 : f32
    %318 = vector.broadcast %cst_179 : f32 to vector<16x64xf32>
    %319 = arith.cmpf ogt, %317, %318 : vector<16x64xf32>
    %cst_180 = arith.constant 1.000000e-01 : f32
    %320 = vector.broadcast %cst_180 : f32 to vector<16x64xf32>
    %321 = arith.mulf %320, %317 : vector<16x64xf32>
    %322 = arith.select %319, %317, %321 : vector<16x64xi1>, vector<16x64xf32>
    %c0_181 = arith.constant 0 : index
    %c0_182 = arith.constant 0 : index
    %c0_183 = arith.constant 0 : index
    %323 = vector.load %arg9[%c0_181, %c0_182, %c0_183] : memref<1x8x16xbf16, #tpu.memory_space<vmem>>, vector<1x8x16xbf16>
    %324 = vector.shape_cast %323 : vector<1x8x16xbf16> to vector<8x16xbf16>
    %325 = arith.truncf %322 : vector<16x64xf32> to vector<16x64xbf16>
    %cst_184 = arith.constant dense<0.000000e+00> : vector<8x64xf32>
    %326 = tpu.matmul %324, %325, %cst_184 {dimension_numbers = #tpu.dot_dimension_numbers<[1], [0], [0], [1], [0, 0, 1, 1], [], []>} : vector<8x16xbf16>, vector<16x64xbf16>, vector<8x64xf32> -> vector<8x64xf32>
    %c0_185 = arith.constant 0 : index
    %c0_186 = arith.constant 0 : index
    %327 = vector.load %arg10[%c0_185, %c0_186] : memref<8x1xf32, #tpu.memory_space<vmem>>, vector<8x1xf32>
    %328 = vector.broadcast %327 : vector<8x1xf32> to vector<8x64xf32>
    %329 = arith.mulf %326, %328 : vector<8x64xf32>
    %c0_187 = arith.constant 0 : index
    %c0_188 = arith.constant 0 : index
    %330 = vector.load %arg11[%c0_187, %c0_188] : memref<8x1xf32, #tpu.memory_space<vmem>>, vector<8x1xf32>
    %331 = vector.broadcast %330 : vector<8x1xf32> to vector<8x64xf32>
    %332 = arith.addf %329, %331 : vector<8x64xf32>
    %cst_189 = arith.constant 0.000000e+00 : f32
    %333 = vector.broadcast %cst_189 : f32 to vector<8x64xf32>
    %334 = arith.cmpf ogt, %332, %333 : vector<8x64xf32>
    %cst_190 = arith.constant 1.000000e-01 : f32
    %335 = vector.broadcast %cst_190 : f32 to vector<8x64xf32>
    %336 = arith.mulf %335, %332 : vector<8x64xf32>
    %337 = arith.select %334, %332, %336 : vector<8x64xi1>, vector<8x64xf32>
    %cst_191 = arith.constant 0.000000e+00 : f32
    %338 = vector.broadcast %cst_191 : f32 to vector<16x512xf32>
    %c0_192 = arith.constant 0 : index
    %c0_193 = arith.constant 0 : index
    %339 = vector.load %arg26[%c0_192, %c0_193] : memref<16x512xf32, #tpu.memory_space<vmem>>, vector<16x512xf32>
    tpu.vector_store %arg26[%c0_192, %c0_193], %338 {strides = array<i32>} : memref<16x512xf32, #tpu.memory_space<vmem>>, vector<16x512xf32>,
    %c0_194 = arith.constant 0 : index
    %c128_195 = arith.constant 128 : index
    %340 = vector.load %arg26[%c0_194, %c128_195] : memref<16x512xf32, #tpu.memory_space<vmem>>, vector<8x64xf32>
    tpu.vector_store %arg26[%c0_194, %c128_195], %337 {strides = array<i32>} : memref<16x512xf32, #tpu.memory_space<vmem>>, vector<8x64xf32>,
    %341 = tpu.iota {dimensions = array<i32: 1>} : vector<1x64xi32>
    %c7_i32_196 = arith.constant 7 : i32
    %342 = vector.broadcast %c7_i32_196 : i32 to vector<1x64xi32>
    %343 = arith.andi %341, %342 : vector<1x64xi32>
    %cst_197 = arith.constant 0.000000e+00 : f32
    %344 = vector.broadcast %cst_197 : f32 to vector<16x64xf32>
    %c0_198 = arith.constant 0 : index
    %c119 = arith.constant 119 : index
    %345 = vector.load %arg26[%c0_198, %c119] : memref<16x512xf32, #tpu.memory_space<vmem>>, vector<8x64xf32>
    %c-1_i32_199 = arith.constant -1 : i32
    %346 = vector.broadcast %c-1_i32_199 : i32 to vector<1x64xi32>
    %347 = arith.addi %343, %346 : vector<1x64xi32>
    %c0_i32_200 = arith.constant 0 : i32
    %348 = vector.broadcast %c0_i32_200 : i32 to vector<1x64xi32>
    %349 = arith.cmpi sge, %347, %348 : vector<1x64xi32>
    %c-1_i32_201 = arith.constant -1 : i32
    %350 = vector.broadcast %c-1_i32_201 : i32 to vector<1x64xi32>
    %351 = arith.addi %343, %350 : vector<1x64xi32>
    %c8_i32 = arith.constant 8 : i32
    %352 = vector.broadcast %c8_i32 : i32 to vector<1x64xi32>
    %353 = arith.cmpi slt, %351, %352 : vector<1x64xi32>
    %354 = arith.andi %349, %353 : vector<1x64xi1>
    %cst_202 = arith.constant 0.000000e+00 : f32
    %355 = vector.shape_cast %354 : vector<1x64xi1> to vector<1x64xi1>
    %356 = vector.broadcast %355 : vector<1x64xi1> to vector<8x64xi1>
    %357 = vector.broadcast %cst_202 : f32 to vector<8x64xf32>
    %358 = arith.select %356, %345, %357 : vector<8x64xi1>, vector<8x64xf32>
    %c0_203 = arith.constant 0 : index
    %c0_204 = arith.constant 0 : index
    %c0_205 = arith.constant 0 : index
    %359 = vector.load %arg12[%c0_203, %c0_204, %c0_205] : memref<9x16x8xbf16, #tpu.memory_space<vmem>>, vector<1x16x8xbf16>
    %360 = vector.shape_cast %359 : vector<1x16x8xbf16> to vector<16x8xbf16>
    %361 = arith.truncf %358 : vector<8x64xf32> to vector<8x64xbf16>
    %cst_206 = arith.constant dense<0.000000e+00> : vector<16x64xf32>
    %362 = tpu.matmul %360, %361, %cst_206 {dimension_numbers = #tpu.dot_dimension_numbers<[1], [0], [0], [1], [0, 0, 1, 1], [], []>} : vector<16x8xbf16>, vector<8x64xbf16>, vector<16x64xf32> -> vector<16x64xf32>
    %363 = arith.addf %344, %362 : vector<16x64xf32>
    %c0_207 = arith.constant 0 : index
    %c120 = arith.constant 120 : index
    %364 = vector.load %arg26[%c0_207, %c120] : memref<16x512xf32, #tpu.memory_space<vmem>>, vector<8x64xf32>
    %c1_208 = arith.constant 1 : index
    %c0_209 = arith.constant 0 : index
    %c0_210 = arith.constant 0 : index
    %365 = vector.load %arg12[%c1_208, %c0_209, %c0_210] : memref<9x16x8xbf16, #tpu.memory_space<vmem>>, vector<1x16x8xbf16>
    %366 = vector.shape_cast %365 : vector<1x16x8xbf16> to vector<16x8xbf16>
    %367 = arith.truncf %364 : vector<8x64xf32> to vector<8x64xbf16>
    %cst_211 = arith.constant dense<0.000000e+00> : vector<16x64xf32>
    %368 = tpu.matmul %366, %367, %cst_211 {dimension_numbers = #tpu.dot_dimension_numbers<[1], [0], [0], [1], [0, 0, 1, 1], [], []>} : vector<16x8xbf16>, vector<8x64xbf16>, vector<16x64xf32> -> vector<16x64xf32>
    %369 = arith.addf %363, %368 : vector<16x64xf32>
    %c0_212 = arith.constant 0 : index
    %c121 = arith.constant 121 : index
    %370 = vector.load %arg26[%c0_212, %c121] : memref<16x512xf32, #tpu.memory_space<vmem>>, vector<8x64xf32>
    %c1_i32_213 = arith.constant 1 : i32
    %371 = vector.broadcast %c1_i32_213 : i32 to vector<1x64xi32>
    %372 = arith.addi %343, %371 : vector<1x64xi32>
    %c0_i32_214 = arith.constant 0 : i32
    %373 = vector.broadcast %c0_i32_214 : i32 to vector<1x64xi32>
    %374 = arith.cmpi sge, %372, %373 : vector<1x64xi32>
    %c1_i32_215 = arith.constant 1 : i32
    %375 = vector.broadcast %c1_i32_215 : i32 to vector<1x64xi32>
    %376 = arith.addi %343, %375 : vector<1x64xi32>
    %c8_i32_216 = arith.constant 8 : i32
    %377 = vector.broadcast %c8_i32_216 : i32 to vector<1x64xi32>
    %378 = arith.cmpi slt, %376, %377 : vector<1x64xi32>
    %379 = arith.andi %374, %378 : vector<1x64xi1>
    %cst_217 = arith.constant 0.000000e+00 : f32
    %380 = vector.shape_cast %379 : vector<1x64xi1> to vector<1x64xi1>
    %381 = vector.broadcast %380 : vector<1x64xi1> to vector<8x64xi1>
    %382 = vector.broadcast %cst_217 : f32 to vector<8x64xf32>
    %383 = arith.select %381, %370, %382 : vector<8x64xi1>, vector<8x64xf32>
    %c2_218 = arith.constant 2 : index
    %c0_219 = arith.constant 0 : index
    %c0_220 = arith.constant 0 : index
    %384 = vector.load %arg12[%c2_218, %c0_219, %c0_220] : memref<9x16x8xbf16, #tpu.memory_space<vmem>>, vector<1x16x8xbf16>
    %385 = vector.shape_cast %384 : vector<1x16x8xbf16> to vector<16x8xbf16>
    %386 = arith.truncf %383 : vector<8x64xf32> to vector<8x64xbf16>
    %cst_221 = arith.constant dense<0.000000e+00> : vector<16x64xf32>
    %387 = tpu.matmul %385, %386, %cst_221 {dimension_numbers = #tpu.dot_dimension_numbers<[1], [0], [0], [1], [0, 0, 1, 1], [], []>} : vector<16x8xbf16>, vector<8x64xbf16>, vector<16x64xf32> -> vector<16x64xf32>
    %388 = arith.addf %369, %387 : vector<16x64xf32>
    %c0_222 = arith.constant 0 : index
    %c127_223 = arith.constant 127 : index
    %389 = vector.load %arg26[%c0_222, %c127_223] : memref<16x512xf32, #tpu.memory_space<vmem>>, vector<8x64xf32>
    %c-1_i32_224 = arith.constant -1 : i32
    %390 = vector.broadcast %c-1_i32_224 : i32 to vector<1x64xi32>
    %391 = arith.addi %343, %390 : vector<1x64xi32>
    %c0_i32_225 = arith.constant 0 : i32
    %392 = vector.broadcast %c0_i32_225 : i32 to vector<1x64xi32>
    %393 = arith.cmpi sge, %391, %392 : vector<1x64xi32>
    %c-1_i32_226 = arith.constant -1 : i32
    %394 = vector.broadcast %c-1_i32_226 : i32 to vector<1x64xi32>
    %395 = arith.addi %343, %394 : vector<1x64xi32>
    %c8_i32_227 = arith.constant 8 : i32
    %396 = vector.broadcast %c8_i32_227 : i32 to vector<1x64xi32>
    %397 = arith.cmpi slt, %395, %396 : vector<1x64xi32>
    %398 = arith.andi %393, %397 : vector<1x64xi1>
    %cst_228 = arith.constant 0.000000e+00 : f32
    %399 = vector.shape_cast %398 : vector<1x64xi1> to vector<1x64xi1>
    %400 = vector.broadcast %399 : vector<1x64xi1> to vector<8x64xi1>
    %401 = vector.broadcast %cst_228 : f32 to vector<8x64xf32>
    %402 = arith.select %400, %389, %401 : vector<8x64xi1>, vector<8x64xf32>
    %c3_229 = arith.constant 3 : index
    %c0_230 = arith.constant 0 : index
    %c0_231 = arith.constant 0 : index
    %403 = vector.load %arg12[%c3_229, %c0_230, %c0_231] : memref<9x16x8xbf16, #tpu.memory_space<vmem>>, vector<1x16x8xbf16>
    %404 = vector.shape_cast %403 : vector<1x16x8xbf16> to vector<16x8xbf16>
    %405 = arith.truncf %402 : vector<8x64xf32> to vector<8x64xbf16>
    %cst_232 = arith.constant dense<0.000000e+00> : vector<16x64xf32>
    %406 = tpu.matmul %404, %405, %cst_232 {dimension_numbers = #tpu.dot_dimension_numbers<[1], [0], [0], [1], [0, 0, 1, 1], [], []>} : vector<16x8xbf16>, vector<8x64xbf16>, vector<16x64xf32> -> vector<16x64xf32>
    %407 = arith.addf %388, %406 : vector<16x64xf32>
    %c0_233 = arith.constant 0 : index
    %c128_234 = arith.constant 128 : index
    %408 = vector.load %arg26[%c0_233, %c128_234] : memref<16x512xf32, #tpu.memory_space<vmem>>, vector<8x64xf32>
    %c4_235 = arith.constant 4 : index
    %c0_236 = arith.constant 0 : index
    %c0_237 = arith.constant 0 : index
    %409 = vector.load %arg12[%c4_235, %c0_236, %c0_237] : memref<9x16x8xbf16, #tpu.memory_space<vmem>>, vector<1x16x8xbf16>
    %410 = vector.shape_cast %409 : vector<1x16x8xbf16> to vector<16x8xbf16>
    %411 = arith.truncf %408 : vector<8x64xf32> to vector<8x64xbf16>
    %cst_238 = arith.constant dense<0.000000e+00> : vector<16x64xf32>
    %412 = tpu.matmul %410, %411, %cst_238 {dimension_numbers = #tpu.dot_dimension_numbers<[1], [0], [0], [1], [0, 0, 1, 1], [], []>} : vector<16x8xbf16>, vector<8x64xbf16>, vector<16x64xf32> -> vector<16x64xf32>
    %413 = arith.addf %407, %412 : vector<16x64xf32>
    %c0_239 = arith.constant 0 : index
    %c129_240 = arith.constant 129 : index
    %414 = vector.load %arg26[%c0_239, %c129_240] : memref<16x512xf32, #tpu.memory_space<vmem>>, vector<8x64xf32>
    %c1_i32_241 = arith.constant 1 : i32
    %415 = vector.broadcast %c1_i32_241 : i32 to vector<1x64xi32>
    %416 = arith.addi %343, %415 : vector<1x64xi32>
    %c0_i32_242 = arith.constant 0 : i32
    %417 = vector.broadcast %c0_i32_242 : i32 to vector<1x64xi32>
    %418 = arith.cmpi sge, %416, %417 : vector<1x64xi32>
    %c1_i32_243 = arith.constant 1 : i32
    %419 = vector.broadcast %c1_i32_243 : i32 to vector<1x64xi32>
    %420 = arith.addi %343, %419 : vector<1x64xi32>
    %c8_i32_244 = arith.constant 8 : i32
    %421 = vector.broadcast %c8_i32_244 : i32 to vector<1x64xi32>
    %422 = arith.cmpi slt, %420, %421 : vector<1x64xi32>
    %423 = arith.andi %418, %422 : vector<1x64xi1>
    %cst_245 = arith.constant 0.000000e+00 : f32
    %424 = vector.shape_cast %423 : vector<1x64xi1> to vector<1x64xi1>
    %425 = vector.broadcast %424 : vector<1x64xi1> to vector<8x64xi1>
    %426 = vector.broadcast %cst_245 : f32 to vector<8x64xf32>
    %427 = arith.select %425, %414, %426 : vector<8x64xi1>, vector<8x64xf32>
    %c5_246 = arith.constant 5 : index
    %c0_247 = arith.constant 0 : index
    %c0_248 = arith.constant 0 : index
    %428 = vector.load %arg12[%c5_246, %c0_247, %c0_248] : memref<9x16x8xbf16, #tpu.memory_space<vmem>>, vector<1x16x8xbf16>
    %429 = vector.shape_cast %428 : vector<1x16x8xbf16> to vector<16x8xbf16>
    %430 = arith.truncf %427 : vector<8x64xf32> to vector<8x64xbf16>
    %cst_249 = arith.constant dense<0.000000e+00> : vector<16x64xf32>
    %431 = tpu.matmul %429, %430, %cst_249 {dimension_numbers = #tpu.dot_dimension_numbers<[1], [0], [0], [1], [0, 0, 1, 1], [], []>} : vector<16x8xbf16>, vector<8x64xbf16>, vector<16x64xf32> -> vector<16x64xf32>
    %432 = arith.addf %413, %431 : vector<16x64xf32>
    %c0_250 = arith.constant 0 : index
    %c135 = arith.constant 135 : index
    %433 = vector.load %arg26[%c0_250, %c135] : memref<16x512xf32, #tpu.memory_space<vmem>>, vector<8x64xf32>
    %c-1_i32_251 = arith.constant -1 : i32
    %434 = vector.broadcast %c-1_i32_251 : i32 to vector<1x64xi32>
    %435 = arith.addi %343, %434 : vector<1x64xi32>
    %c0_i32_252 = arith.constant 0 : i32
    %436 = vector.broadcast %c0_i32_252 : i32 to vector<1x64xi32>
    %437 = arith.cmpi sge, %435, %436 : vector<1x64xi32>
    %c-1_i32_253 = arith.constant -1 : i32
    %438 = vector.broadcast %c-1_i32_253 : i32 to vector<1x64xi32>
    %439 = arith.addi %343, %438 : vector<1x64xi32>
    %c8_i32_254 = arith.constant 8 : i32
    %440 = vector.broadcast %c8_i32_254 : i32 to vector<1x64xi32>
    %441 = arith.cmpi slt, %439, %440 : vector<1x64xi32>
    %442 = arith.andi %437, %441 : vector<1x64xi1>
    %cst_255 = arith.constant 0.000000e+00 : f32
    %443 = vector.shape_cast %442 : vector<1x64xi1> to vector<1x64xi1>
    %444 = vector.broadcast %443 : vector<1x64xi1> to vector<8x64xi1>
    %445 = vector.broadcast %cst_255 : f32 to vector<8x64xf32>
    %446 = arith.select %444, %433, %445 : vector<8x64xi1>, vector<8x64xf32>
    %c6_256 = arith.constant 6 : index
    %c0_257 = arith.constant 0 : index
    %c0_258 = arith.constant 0 : index
    %447 = vector.load %arg12[%c6_256, %c0_257, %c0_258] : memref<9x16x8xbf16, #tpu.memory_space<vmem>>, vector<1x16x8xbf16>
    %448 = vector.shape_cast %447 : vector<1x16x8xbf16> to vector<16x8xbf16>
    %449 = arith.truncf %446 : vector<8x64xf32> to vector<8x64xbf16>
    %cst_259 = arith.constant dense<0.000000e+00> : vector<16x64xf32>
    %450 = tpu.matmul %448, %449, %cst_259 {dimension_numbers = #tpu.dot_dimension_numbers<[1], [0], [0], [1], [0, 0, 1, 1], [], []>} : vector<16x8xbf16>, vector<8x64xbf16>, vector<16x64xf32> -> vector<16x64xf32>
    %451 = arith.addf %432, %450 : vector<16x64xf32>
    %c0_260 = arith.constant 0 : index
    %c136 = arith.constant 136 : index
    %452 = vector.load %arg26[%c0_260, %c136] : memref<16x512xf32, #tpu.memory_space<vmem>>, vector<8x64xf32>
    %c7_261 = arith.constant 7 : index
    %c0_262 = arith.constant 0 : index
    %c0_263 = arith.constant 0 : index
    %453 = vector.load %arg12[%c7_261, %c0_262, %c0_263] : memref<9x16x8xbf16, #tpu.memory_space<vmem>>, vector<1x16x8xbf16>
    %454 = vector.shape_cast %453 : vector<1x16x8xbf16> to vector<16x8xbf16>
    %455 = arith.truncf %452 : vector<8x64xf32> to vector<8x64xbf16>
    %cst_264 = arith.constant dense<0.000000e+00> : vector<16x64xf32>
    %456 = tpu.matmul %454, %455, %cst_264 {dimension_numbers = #tpu.dot_dimension_numbers<[1], [0], [0], [1], [0, 0, 1, 1], [], []>} : vector<16x8xbf16>, vector<8x64xbf16>, vector<16x64xf32> -> vector<16x64xf32>
    %457 = arith.addf %451, %456 : vector<16x64xf32>
    %c0_265 = arith.constant 0 : index
    %c137 = arith.constant 137 : index
    %458 = vector.load %arg26[%c0_265, %c137] : memref<16x512xf32, #tpu.memory_space<vmem>>, vector<8x64xf32>
    %c1_i32_266 = arith.constant 1 : i32
    %459 = vector.broadcast %c1_i32_266 : i32 to vector<1x64xi32>
    %460 = arith.addi %343, %459 : vector<1x64xi32>
    %c0_i32_267 = arith.constant 0 : i32
    %461 = vector.broadcast %c0_i32_267 : i32 to vector<1x64xi32>
    %462 = arith.cmpi sge, %460, %461 : vector<1x64xi32>
    %c1_i32_268 = arith.constant 1 : i32
    %463 = vector.broadcast %c1_i32_268 : i32 to vector<1x64xi32>
    %464 = arith.addi %343, %463 : vector<1x64xi32>
    %c8_i32_269 = arith.constant 8 : i32
    %465 = vector.broadcast %c8_i32_269 : i32 to vector<1x64xi32>
    %466 = arith.cmpi slt, %464, %465 : vector<1x64xi32>
    %467 = arith.andi %462, %466 : vector<1x64xi1>
    %cst_270 = arith.constant 0.000000e+00 : f32
    %468 = vector.shape_cast %467 : vector<1x64xi1> to vector<1x64xi1>
    %469 = vector.broadcast %468 : vector<1x64xi1> to vector<8x64xi1>
    %470 = vector.broadcast %cst_270 : f32 to vector<8x64xf32>
    %471 = arith.select %469, %458, %470 : vector<8x64xi1>, vector<8x64xf32>
    %c8_271 = arith.constant 8 : index
    %c0_272 = arith.constant 0 : index
    %c0_273 = arith.constant 0 : index
    %472 = vector.load %arg12[%c8_271, %c0_272, %c0_273] : memref<9x16x8xbf16, #tpu.memory_space<vmem>>, vector<1x16x8xbf16>
    %473 = vector.shape_cast %472 : vector<1x16x8xbf16> to vector<16x8xbf16>
    %474 = arith.truncf %471 : vector<8x64xf32> to vector<8x64xbf16>
    %cst_274 = arith.constant dense<0.000000e+00> : vector<16x64xf32>
    %475 = tpu.matmul %473, %474, %cst_274 {dimension_numbers = #tpu.dot_dimension_numbers<[1], [0], [0], [1], [0, 0, 1, 1], [], []>} : vector<16x8xbf16>, vector<8x64xbf16>, vector<16x64xf32> -> vector<16x64xf32>
    %476 = arith.addf %457, %475 : vector<16x64xf32>
    %c0_275 = arith.constant 0 : index
    %c0_276 = arith.constant 0 : index
    %477 = vector.load %arg13[%c0_275, %c0_276] : memref<16x1xf32, #tpu.memory_space<vmem>>, vector<16x1xf32>
    %478 = vector.broadcast %477 : vector<16x1xf32> to vector<16x64xf32>
    %479 = arith.mulf %476, %478 : vector<16x64xf32>
    %c0_277 = arith.constant 0 : index
    %c0_278 = arith.constant 0 : index
    %480 = vector.load %arg14[%c0_277, %c0_278] : memref<16x1xf32, #tpu.memory_space<vmem>>, vector<16x1xf32>
    %481 = vector.broadcast %480 : vector<16x1xf32> to vector<16x64xf32>
    %482 = arith.addf %479, %481 : vector<16x64xf32>
    %cst_279 = arith.constant 0.000000e+00 : f32
    %483 = vector.broadcast %cst_279 : f32 to vector<16x64xf32>
    %484 = arith.cmpf ogt, %482, %483 : vector<16x64xf32>
    %cst_280 = arith.constant 1.000000e-01 : f32
    %485 = vector.broadcast %cst_280 : f32 to vector<16x64xf32>
    %486 = arith.mulf %485, %482 : vector<16x64xf32>
    %487 = arith.select %484, %482, %486 : vector<16x64xi1>, vector<16x64xf32>
    %488 = arith.addf %487, %322 : vector<16x64xf32>
    %c0_281 = arith.constant 0 : index
    %c0_282 = arith.constant 0 : index
    %c0_283 = arith.constant 0 : index
    %489 = vector.load %arg15[%c0_281, %c0_282, %c0_283] : memref<1x21x16xbf16, #tpu.memory_space<vmem>>, vector<1x21x16xbf16>
    %490 = vector.shape_cast %489 : vector<1x21x16xbf16> to vector<21x16xbf16>
    %491 = arith.truncf %488 : vector<16x64xf32> to vector<16x64xbf16>
    %cst_284 = arith.constant dense<0.000000e+00> : vector<21x64xf32>
    %492 = tpu.matmul %490, %491, %cst_284 {dimension_numbers = #tpu.dot_dimension_numbers<[1], [0], [0], [1], [0, 0, 1, 1], [], []>} : vector<21x16xbf16>, vector<16x64xbf16>, vector<21x64xf32> -> vector<21x64xf32>
    %c0_285 = arith.constant 0 : index
    %c0_286 = arith.constant 0 : index
    %493 = vector.load %arg16[%c0_285, %c0_286] : memref<21x1xf32, #tpu.memory_space<vmem>>, vector<21x1xf32>
    %494 = vector.broadcast %493 : vector<21x1xf32> to vector<21x64xf32>
    %495 = arith.mulf %492, %494 : vector<21x64xf32>
    %c0_287 = arith.constant 0 : index
    %c0_288 = arith.constant 0 : index
    %496 = vector.load %arg17[%c0_287, %c0_288] : memref<21x1xf32, #tpu.memory_space<vmem>>, vector<21x1xf32>
    %497 = vector.broadcast %496 : vector<21x1xf32> to vector<21x64xf32>
    %498 = arith.addf %495, %497 : vector<21x64xf32>
    %c0_289 = arith.constant 0 : index
    %c0_290 = arith.constant 0 : index
    %c0_291 = arith.constant 0 : index
    %499 = vector.load %arg24[%c0_289, %c0_290, %c0_291] : memref<1x21x64xf32, #tpu.memory_space<vmem>>, vector<1x21x64xf32>
    %500 = vector.shape_cast %499 : vector<1x21x64xf32> to vector<21x64xf32>
    %501 = vector.shape_cast %498 : vector<21x64xf32> to vector<1x21x64xf32>
    tpu.vector_store %arg24[%c0_289, %c0_290, %c0_291], %501 {strides = array<i32>} : memref<1x21x64xf32, #tpu.memory_space<vmem>>, vector<1x21x64xf32>,
    %cst_292 = arith.constant 0.000000e+00 : f32
    %502 = vector.broadcast %cst_292 : f32 to vector<16x512xf32>
    %c0_293 = arith.constant 0 : index
    %c0_294 = arith.constant 0 : index
    %503 = vector.load %arg26[%c0_293, %c0_294] : memref<16x512xf32, #tpu.memory_space<vmem>>, vector<16x512xf32>
    tpu.vector_store %arg26[%c0_293, %c0_294], %502 {strides = array<i32>} : memref<16x512xf32, #tpu.memory_space<vmem>>, vector<16x512xf32>,
    %c0_295 = arith.constant 0 : index
    %c128_296 = arith.constant 128 : index
    %504 = vector.load %arg26[%c0_295, %c128_296] : memref<16x512xf32, #tpu.memory_space<vmem>>, vector<8x64xf32>
    tpu.vector_store %arg26[%c0_295, %c128_296], %337 {strides = array<i32>} : memref<16x512xf32, #tpu.memory_space<vmem>>, vector<8x64xf32>,
    %505 = tpu.iota {dimensions = array<i32: 1>} : vector<1x64xi32>
    %c7_i32_297 = arith.constant 7 : i32
    %506 = vector.broadcast %c7_i32_297 : i32 to vector<1x64xi32>
    %507 = arith.andi %505, %506 : vector<1x64xi32>
    %cst_298 = arith.constant 0.000000e+00 : f32
    %508 = vector.broadcast %cst_298 : f32 to vector<16x64xf32>
    %c0_299 = arith.constant 0 : index
    %c119_300 = arith.constant 119 : index
    %509 = vector.load %arg26[%c0_299, %c119_300] : memref<16x512xf32, #tpu.memory_space<vmem>>, vector<8x64xf32>
    %c-1_i32_301 = arith.constant -1 : i32
    %510 = vector.broadcast %c-1_i32_301 : i32 to vector<1x64xi32>
    %511 = arith.addi %507, %510 : vector<1x64xi32>
    %c0_i32_302 = arith.constant 0 : i32
    %512 = vector.broadcast %c0_i32_302 : i32 to vector<1x64xi32>
    %513 = arith.cmpi sge, %511, %512 : vector<1x64xi32>
    %c-1_i32_303 = arith.constant -1 : i32
    %514 = vector.broadcast %c-1_i32_303 : i32 to vector<1x64xi32>
    %515 = arith.addi %507, %514 : vector<1x64xi32>
    %c8_i32_304 = arith.constant 8 : i32
    %516 = vector.broadcast %c8_i32_304 : i32 to vector<1x64xi32>
    %517 = arith.cmpi slt, %515, %516 : vector<1x64xi32>
    %518 = arith.andi %513, %517 : vector<1x64xi1>
    %cst_305 = arith.constant 0.000000e+00 : f32
    %519 = vector.shape_cast %518 : vector<1x64xi1> to vector<1x64xi1>
    %520 = vector.broadcast %519 : vector<1x64xi1> to vector<8x64xi1>
    %521 = vector.broadcast %cst_305 : f32 to vector<8x64xf32>
    %522 = arith.select %520, %509, %521 : vector<8x64xi1>, vector<8x64xf32>
    %c0_306 = arith.constant 0 : index
    %c0_307 = arith.constant 0 : index
    %c0_308 = arith.constant 0 : index
    %523 = vector.load %arg18[%c0_306, %c0_307, %c0_308] : memref<9x16x8xbf16, #tpu.memory_space<vmem>>, vector<1x16x8xbf16>
    %524 = vector.shape_cast %523 : vector<1x16x8xbf16> to vector<16x8xbf16>
    %525 = arith.truncf %522 : vector<8x64xf32> to vector<8x64xbf16>
    %cst_309 = arith.constant dense<0.000000e+00> : vector<16x64xf32>
    %526 = tpu.matmul %524, %525, %cst_309 {dimension_numbers = #tpu.dot_dimension_numbers<[1], [0], [0], [1], [0, 0, 1, 1], [], []>} : vector<16x8xbf16>, vector<8x64xbf16>, vector<16x64xf32> -> vector<16x64xf32>
    %527 = arith.addf %508, %526 : vector<16x64xf32>
    %c0_310 = arith.constant 0 : index
    %c120_311 = arith.constant 120 : index
    %528 = vector.load %arg26[%c0_310, %c120_311] : memref<16x512xf32, #tpu.memory_space<vmem>>, vector<8x64xf32>
    %c1_312 = arith.constant 1 : index
    %c0_313 = arith.constant 0 : index
    %c0_314 = arith.constant 0 : index
    %529 = vector.load %arg18[%c1_312, %c0_313, %c0_314] : memref<9x16x8xbf16, #tpu.memory_space<vmem>>, vector<1x16x8xbf16>
    %530 = vector.shape_cast %529 : vector<1x16x8xbf16> to vector<16x8xbf16>
    %531 = arith.truncf %528 : vector<8x64xf32> to vector<8x64xbf16>
    %cst_315 = arith.constant dense<0.000000e+00> : vector<16x64xf32>
    %532 = tpu.matmul %530, %531, %cst_315 {dimension_numbers = #tpu.dot_dimension_numbers<[1], [0], [0], [1], [0, 0, 1, 1], [], []>} : vector<16x8xbf16>, vector<8x64xbf16>, vector<16x64xf32> -> vector<16x64xf32>
    %533 = arith.addf %527, %532 : vector<16x64xf32>
    %c0_316 = arith.constant 0 : index
    %c121_317 = arith.constant 121 : index
    %534 = vector.load %arg26[%c0_316, %c121_317] : memref<16x512xf32, #tpu.memory_space<vmem>>, vector<8x64xf32>
    %c1_i32_318 = arith.constant 1 : i32
    %535 = vector.broadcast %c1_i32_318 : i32 to vector<1x64xi32>
    %536 = arith.addi %507, %535 : vector<1x64xi32>
    %c0_i32_319 = arith.constant 0 : i32
    %537 = vector.broadcast %c0_i32_319 : i32 to vector<1x64xi32>
    %538 = arith.cmpi sge, %536, %537 : vector<1x64xi32>
    %c1_i32_320 = arith.constant 1 : i32
    %539 = vector.broadcast %c1_i32_320 : i32 to vector<1x64xi32>
    %540 = arith.addi %507, %539 : vector<1x64xi32>
    %c8_i32_321 = arith.constant 8 : i32
    %541 = vector.broadcast %c8_i32_321 : i32 to vector<1x64xi32>
    %542 = arith.cmpi slt, %540, %541 : vector<1x64xi32>
    %543 = arith.andi %538, %542 : vector<1x64xi1>
    %cst_322 = arith.constant 0.000000e+00 : f32
    %544 = vector.shape_cast %543 : vector<1x64xi1> to vector<1x64xi1>
    %545 = vector.broadcast %544 : vector<1x64xi1> to vector<8x64xi1>
    %546 = vector.broadcast %cst_322 : f32 to vector<8x64xf32>
    %547 = arith.select %545, %534, %546 : vector<8x64xi1>, vector<8x64xf32>
    %c2_323 = arith.constant 2 : index
    %c0_324 = arith.constant 0 : index
    %c0_325 = arith.constant 0 : index
    %548 = vector.load %arg18[%c2_323, %c0_324, %c0_325] : memref<9x16x8xbf16, #tpu.memory_space<vmem>>, vector<1x16x8xbf16>
    %549 = vector.shape_cast %548 : vector<1x16x8xbf16> to vector<16x8xbf16>
    %550 = arith.truncf %547 : vector<8x64xf32> to vector<8x64xbf16>
    %cst_326 = arith.constant dense<0.000000e+00> : vector<16x64xf32>
    %551 = tpu.matmul %549, %550, %cst_326 {dimension_numbers = #tpu.dot_dimension_numbers<[1], [0], [0], [1], [0, 0, 1, 1], [], []>} : vector<16x8xbf16>, vector<8x64xbf16>, vector<16x64xf32> -> vector<16x64xf32>
    %552 = arith.addf %533, %551 : vector<16x64xf32>
    %c0_327 = arith.constant 0 : index
    %c127_328 = arith.constant 127 : index
    %553 = vector.load %arg26[%c0_327, %c127_328] : memref<16x512xf32, #tpu.memory_space<vmem>>, vector<8x64xf32>
    %c-1_i32_329 = arith.constant -1 : i32
    %554 = vector.broadcast %c-1_i32_329 : i32 to vector<1x64xi32>
    %555 = arith.addi %507, %554 : vector<1x64xi32>
    %c0_i32_330 = arith.constant 0 : i32
    %556 = vector.broadcast %c0_i32_330 : i32 to vector<1x64xi32>
    %557 = arith.cmpi sge, %555, %556 : vector<1x64xi32>
    %c-1_i32_331 = arith.constant -1 : i32
    %558 = vector.broadcast %c-1_i32_331 : i32 to vector<1x64xi32>
    %559 = arith.addi %507, %558 : vector<1x64xi32>
    %c8_i32_332 = arith.constant 8 : i32
    %560 = vector.broadcast %c8_i32_332 : i32 to vector<1x64xi32>
    %561 = arith.cmpi slt, %559, %560 : vector<1x64xi32>
    %562 = arith.andi %557, %561 : vector<1x64xi1>
    %cst_333 = arith.constant 0.000000e+00 : f32
    %563 = vector.shape_cast %562 : vector<1x64xi1> to vector<1x64xi1>
    %564 = vector.broadcast %563 : vector<1x64xi1> to vector<8x64xi1>
    %565 = vector.broadcast %cst_333 : f32 to vector<8x64xf32>
    %566 = arith.select %564, %553, %565 : vector<8x64xi1>, vector<8x64xf32>
    %c3_334 = arith.constant 3 : index
    %c0_335 = arith.constant 0 : index
    %c0_336 = arith.constant 0 : index
    %567 = vector.load %arg18[%c3_334, %c0_335, %c0_336] : memref<9x16x8xbf16, #tpu.memory_space<vmem>>, vector<1x16x8xbf16>
    %568 = vector.shape_cast %567 : vector<1x16x8xbf16> to vector<16x8xbf16>
    %569 = arith.truncf %566 : vector<8x64xf32> to vector<8x64xbf16>
    %cst_337 = arith.constant dense<0.000000e+00> : vector<16x64xf32>
    %570 = tpu.matmul %568, %569, %cst_337 {dimension_numbers = #tpu.dot_dimension_numbers<[1], [0], [0], [1], [0, 0, 1, 1], [], []>} : vector<16x8xbf16>, vector<8x64xbf16>, vector<16x64xf32> -> vector<16x64xf32>
    %571 = arith.addf %552, %570 : vector<16x64xf32>
    %c0_338 = arith.constant 0 : index
    %c128_339 = arith.constant 128 : index
    %572 = vector.load %arg26[%c0_338, %c128_339] : memref<16x512xf32, #tpu.memory_space<vmem>>, vector<8x64xf32>
    %c4_340 = arith.constant 4 : index
    %c0_341 = arith.constant 0 : index
    %c0_342 = arith.constant 0 : index
    %573 = vector.load %arg18[%c4_340, %c0_341, %c0_342] : memref<9x16x8xbf16, #tpu.memory_space<vmem>>, vector<1x16x8xbf16>
    %574 = vector.shape_cast %573 : vector<1x16x8xbf16> to vector<16x8xbf16>
    %575 = arith.truncf %572 : vector<8x64xf32> to vector<8x64xbf16>
    %cst_343 = arith.constant dense<0.000000e+00> : vector<16x64xf32>
    %576 = tpu.matmul %574, %575, %cst_343 {dimension_numbers = #tpu.dot_dimension_numbers<[1], [0], [0], [1], [0, 0, 1, 1], [], []>} : vector<16x8xbf16>, vector<8x64xbf16>, vector<16x64xf32> -> vector<16x64xf32>
    %577 = arith.addf %571, %576 : vector<16x64xf32>
    %c0_344 = arith.constant 0 : index
    %c129_345 = arith.constant 129 : index
    %578 = vector.load %arg26[%c0_344, %c129_345] : memref<16x512xf32, #tpu.memory_space<vmem>>, vector<8x64xf32>
    %c1_i32_346 = arith.constant 1 : i32
    %579 = vector.broadcast %c1_i32_346 : i32 to vector<1x64xi32>
    %580 = arith.addi %507, %579 : vector<1x64xi32>
    %c0_i32_347 = arith.constant 0 : i32
    %581 = vector.broadcast %c0_i32_347 : i32 to vector<1x64xi32>
    %582 = arith.cmpi sge, %580, %581 : vector<1x64xi32>
    %c1_i32_348 = arith.constant 1 : i32
    %583 = vector.broadcast %c1_i32_348 : i32 to vector<1x64xi32>
    %584 = arith.addi %507, %583 : vector<1x64xi32>
    %c8_i32_349 = arith.constant 8 : i32
    %585 = vector.broadcast %c8_i32_349 : i32 to vector<1x64xi32>
    %586 = arith.cmpi slt, %584, %585 : vector<1x64xi32>
    %587 = arith.andi %582, %586 : vector<1x64xi1>
    %cst_350 = arith.constant 0.000000e+00 : f32
    %588 = vector.shape_cast %587 : vector<1x64xi1> to vector<1x64xi1>
    %589 = vector.broadcast %588 : vector<1x64xi1> to vector<8x64xi1>
    %590 = vector.broadcast %cst_350 : f32 to vector<8x64xf32>
    %591 = arith.select %589, %578, %590 : vector<8x64xi1>, vector<8x64xf32>
    %c5_351 = arith.constant 5 : index
    %c0_352 = arith.constant 0 : index
    %c0_353 = arith.constant 0 : index
    %592 = vector.load %arg18[%c5_351, %c0_352, %c0_353] : memref<9x16x8xbf16, #tpu.memory_space<vmem>>, vector<1x16x8xbf16>
    %593 = vector.shape_cast %592 : vector<1x16x8xbf16> to vector<16x8xbf16>
    %594 = arith.truncf %591 : vector<8x64xf32> to vector<8x64xbf16>
    %cst_354 = arith.constant dense<0.000000e+00> : vector<16x64xf32>
    %595 = tpu.matmul %593, %594, %cst_354 {dimension_numbers = #tpu.dot_dimension_numbers<[1], [0], [0], [1], [0, 0, 1, 1], [], []>} : vector<16x8xbf16>, vector<8x64xbf16>, vector<16x64xf32> -> vector<16x64xf32>
    %596 = arith.addf %577, %595 : vector<16x64xf32>
    %c0_355 = arith.constant 0 : index
    %c135_356 = arith.constant 135 : index
    %597 = vector.load %arg26[%c0_355, %c135_356] : memref<16x512xf32, #tpu.memory_space<vmem>>, vector<8x64xf32>
    %c-1_i32_357 = arith.constant -1 : i32
    %598 = vector.broadcast %c-1_i32_357 : i32 to vector<1x64xi32>
    %599 = arith.addi %507, %598 : vector<1x64xi32>
    %c0_i32_358 = arith.constant 0 : i32
    %600 = vector.broadcast %c0_i32_358 : i32 to vector<1x64xi32>
    %601 = arith.cmpi sge, %599, %600 : vector<1x64xi32>
    %c-1_i32_359 = arith.constant -1 : i32
    %602 = vector.broadcast %c-1_i32_359 : i32 to vector<1x64xi32>
    %603 = arith.addi %507, %602 : vector<1x64xi32>
    %c8_i32_360 = arith.constant 8 : i32
    %604 = vector.broadcast %c8_i32_360 : i32 to vector<1x64xi32>
    %605 = arith.cmpi slt, %603, %604 : vector<1x64xi32>
    %606 = arith.andi %601, %605 : vector<1x64xi1>
    %cst_361 = arith.constant 0.000000e+00 : f32
    %607 = vector.shape_cast %606 : vector<1x64xi1> to vector<1x64xi1>
    %608 = vector.broadcast %607 : vector<1x64xi1> to vector<8x64xi1>
    %609 = vector.broadcast %cst_361 : f32 to vector<8x64xf32>
    %610 = arith.select %608, %597, %609 : vector<8x64xi1>, vector<8x64xf32>
    %c6_362 = arith.constant 6 : index
    %c0_363 = arith.constant 0 : index
    %c0_364 = arith.constant 0 : index
    %611 = vector.load %arg18[%c6_362, %c0_363, %c0_364] : memref<9x16x8xbf16, #tpu.memory_space<vmem>>, vector<1x16x8xbf16>
    %612 = vector.shape_cast %611 : vector<1x16x8xbf16> to vector<16x8xbf16>
    %613 = arith.truncf %610 : vector<8x64xf32> to vector<8x64xbf16>
    %cst_365 = arith.constant dense<0.000000e+00> : vector<16x64xf32>
    %614 = tpu.matmul %612, %613, %cst_365 {dimension_numbers = #tpu.dot_dimension_numbers<[1], [0], [0], [1], [0, 0, 1, 1], [], []>} : vector<16x8xbf16>, vector<8x64xbf16>, vector<16x64xf32> -> vector<16x64xf32>
    %615 = arith.addf %596, %614 : vector<16x64xf32>
    %c0_366 = arith.constant 0 : index
    %c136_367 = arith.constant 136 : index
    %616 = vector.load %arg26[%c0_366, %c136_367] : memref<16x512xf32, #tpu.memory_space<vmem>>, vector<8x64xf32>
    %c7_368 = arith.constant 7 : index
    %c0_369 = arith.constant 0 : index
    %c0_370 = arith.constant 0 : index
    %617 = vector.load %arg18[%c7_368, %c0_369, %c0_370] : memref<9x16x8xbf16, #tpu.memory_space<vmem>>, vector<1x16x8xbf16>
    %618 = vector.shape_cast %617 : vector<1x16x8xbf16> to vector<16x8xbf16>
    %619 = arith.truncf %616 : vector<8x64xf32> to vector<8x64xbf16>
    %cst_371 = arith.constant dense<0.000000e+00> : vector<16x64xf32>
    %620 = tpu.matmul %618, %619, %cst_371 {dimension_numbers = #tpu.dot_dimension_numbers<[1], [0], [0], [1], [0, 0, 1, 1], [], []>} : vector<16x8xbf16>, vector<8x64xbf16>, vector<16x64xf32> -> vector<16x64xf32>
    %621 = arith.addf %615, %620 : vector<16x64xf32>
    %c0_372 = arith.constant 0 : index
    %c137_373 = arith.constant 137 : index
    %622 = vector.load %arg26[%c0_372, %c137_373] : memref<16x512xf32, #tpu.memory_space<vmem>>, vector<8x64xf32>
    %c1_i32_374 = arith.constant 1 : i32
    %623 = vector.broadcast %c1_i32_374 : i32 to vector<1x64xi32>
    %624 = arith.addi %507, %623 : vector<1x64xi32>
    %c0_i32_375 = arith.constant 0 : i32
    %625 = vector.broadcast %c0_i32_375 : i32 to vector<1x64xi32>
    %626 = arith.cmpi sge, %624, %625 : vector<1x64xi32>
    %c1_i32_376 = arith.constant 1 : i32
    %627 = vector.broadcast %c1_i32_376 : i32 to vector<1x64xi32>
    %628 = arith.addi %507, %627 : vector<1x64xi32>
    %c8_i32_377 = arith.constant 8 : i32
    %629 = vector.broadcast %c8_i32_377 : i32 to vector<1x64xi32>
    %630 = arith.cmpi slt, %628, %629 : vector<1x64xi32>
    %631 = arith.andi %626, %630 : vector<1x64xi1>
    %cst_378 = arith.constant 0.000000e+00 : f32
    %632 = vector.shape_cast %631 : vector<1x64xi1> to vector<1x64xi1>
    %633 = vector.broadcast %632 : vector<1x64xi1> to vector<8x64xi1>
    %634 = vector.broadcast %cst_378 : f32 to vector<8x64xf32>
    %635 = arith.select %633, %622, %634 : vector<8x64xi1>, vector<8x64xf32>
    %c8_379 = arith.constant 8 : index
    %c0_380 = arith.constant 0 : index
    %c0_381 = arith.constant 0 : index
    %636 = vector.load %arg18[%c8_379, %c0_380, %c0_381] : memref<9x16x8xbf16, #tpu.memory_space<vmem>>, vector<1x16x8xbf16>
    %637 = vector.shape_cast %636 : vector<1x16x8xbf16> to vector<16x8xbf16>
    %638 = arith.truncf %635 : vector<8x64xf32> to vector<8x64xbf16>
    %cst_382 = arith.constant dense<0.000000e+00> : vector<16x64xf32>
    %639 = tpu.matmul %637, %638, %cst_382 {dimension_numbers = #tpu.dot_dimension_numbers<[1], [0], [0], [1], [0, 0, 1, 1], [], []>} : vector<16x8xbf16>, vector<8x64xbf16>, vector<16x64xf32> -> vector<16x64xf32>
    %640 = arith.addf %621, %639 : vector<16x64xf32>
    %641 = tpu.iota {dimensions = array<i32: 1>} : vector<1x16xi32>
    %c2_i32_383 = arith.constant 2 : i32
    %642 = vector.broadcast %c2_i32_383 : i32 to vector<1x16xi32>
    %643 = arith.shrsi %641, %642 : vector<1x16xi32>
    %644 = tpu.iota {dimensions = array<i32: 1>} : vector<1x16xi32>
    %c3_i32_384 = arith.constant 3 : i32
    %645 = vector.broadcast %c3_i32_384 : i32 to vector<1x16xi32>
    %646 = arith.andi %644, %645 : vector<1x16xi32>
    %c16_i32_385 = arith.constant 16 : i32
    %647 = vector.broadcast %c16_i32_385 : i32 to vector<1x16xi32>
    %648 = arith.muli %647, %643 : vector<1x16xi32>
    %c2_i32_386 = arith.constant 2 : i32
    %649 = vector.broadcast %c2_i32_386 : i32 to vector<1x16xi32>
    %650 = arith.muli %649, %646 : vector<1x16xi32>
    %651 = arith.addi %648, %650 : vector<1x16xi32>
    %652 = tpu.iota {dimensions = array<i32: 0>} : vector<64x16xi32>
    %653 = vector.broadcast %651 : vector<1x16xi32> to vector<64x16xi32>
    %654 = arith.cmpi eq, %652, %653 : vector<64x16xi32>
    %cst_387 = arith.constant 1.000000e+00 : f32
    %cst_388 = arith.constant 0.000000e+00 : f32
    %655 = vector.broadcast %cst_387 : f32 to vector<64x16xf32>
    %656 = vector.broadcast %cst_388 : f32 to vector<64x16xf32>
    %657 = arith.select %654, %655, %656 : vector<64x16xi1>, vector<64x16xf32>
    %cst_389 = arith.constant dense<0.000000e+00> : vector<16x16xf32>
    %658 = tpu.matmul %640, %657, %cst_389 {dimension_numbers = #tpu.dot_dimension_numbers<[1], [0], [0], [1], [0, 0, 1, 1], [], []>} : vector<16x64xf32>, vector<64x16xf32>, vector<16x16xf32> -> vector<16x16xf32>
    %c0_390 = arith.constant 0 : index
    %c0_391 = arith.constant 0 : index
    %659 = vector.load %arg19[%c0_390, %c0_391] : memref<16x1xf32, #tpu.memory_space<vmem>>, vector<16x1xf32>
    %660 = vector.broadcast %659 : vector<16x1xf32> to vector<16x16xf32>
    %661 = arith.mulf %658, %660 : vector<16x16xf32>
    %c0_392 = arith.constant 0 : index
    %c0_393 = arith.constant 0 : index
    %662 = vector.load %arg20[%c0_392, %c0_393] : memref<16x1xf32, #tpu.memory_space<vmem>>, vector<16x1xf32>
    %663 = vector.broadcast %662 : vector<16x1xf32> to vector<16x16xf32>
    %664 = arith.addf %661, %663 : vector<16x16xf32>
    %cst_394 = arith.constant 0.000000e+00 : f32
    %665 = vector.broadcast %cst_394 : f32 to vector<16x16xf32>
    %666 = arith.cmpf ogt, %664, %665 : vector<16x16xf32>
    %cst_395 = arith.constant 1.000000e-01 : f32
    %667 = vector.broadcast %cst_395 : f32 to vector<16x16xf32>
    %668 = arith.mulf %667, %664 : vector<16x16xf32>
    %669 = arith.select %666, %664, %668 : vector<16x16xi1>, vector<16x16xf32>
    %c0_396 = arith.constant 0 : index
    %c0_397 = arith.constant 0 : index
    %c0_398 = arith.constant 0 : index
    %670 = vector.load %arg21[%c0_396, %c0_397, %c0_398] : memref<1x21x16xbf16, #tpu.memory_space<vmem>>, vector<1x21x16xbf16>
    %671 = vector.shape_cast %670 : vector<1x21x16xbf16> to vector<21x16xbf16>
    %672 = arith.truncf %669 : vector<16x16xf32> to vector<16x16xbf16>
    %cst_399 = arith.constant dense<0.000000e+00> : vector<21x16xf32>
    %673 = tpu.matmul %671, %672, %cst_399 {dimension_numbers = #tpu.dot_dimension_numbers<[1], [0], [0], [1], [0, 0, 1, 1], [], []>} : vector<21x16xbf16>, vector<16x16xbf16>, vector<21x16xf32> -> vector<21x16xf32>
    %c0_400 = arith.constant 0 : index
    %c0_401 = arith.constant 0 : index
    %674 = vector.load %arg22[%c0_400, %c0_401] : memref<21x1xf32, #tpu.memory_space<vmem>>, vector<21x1xf32>
    %675 = vector.broadcast %674 : vector<21x1xf32> to vector<21x16xf32>
    %676 = arith.mulf %673, %675 : vector<21x16xf32>
    %c0_402 = arith.constant 0 : index
    %c0_403 = arith.constant 0 : index
    %677 = vector.load %arg23[%c0_402, %c0_403] : memref<21x1xf32, #tpu.memory_space<vmem>>, vector<21x1xf32>
    %678 = vector.broadcast %677 : vector<21x1xf32> to vector<21x16xf32>
    %679 = arith.addf %676, %678 : vector<21x16xf32>
    %c0_404 = arith.constant 0 : index
    %c0_405 = arith.constant 0 : index
    %c0_406 = arith.constant 0 : index
    %680 = vector.load %arg25[%c0_404, %c0_405, %c0_406] : memref<1x21x16xf32, #tpu.memory_space<vmem>>, vector<1x21x16xf32>
    %681 = vector.shape_cast %680 : vector<1x21x16xf32> to vector<21x16xf32>
    %682 = vector.shape_cast %679 : vector<21x16xf32> to vector<1x21x16xf32>
    tpu.vector_store %arg25[%c0_404, %c0_405, %c0_406], %682 {strides = array<i32>} : memref<1x21x16xf32, #tpu.memory_space<vmem>>, vector<1x21x16xf32>,
    return
  }
  func.func @transform_0(%arg0: i32) -> (i32, i32, i32) {
    %c0_i32 = arith.constant 0 : i32
    %c0_i32_0 = arith.constant 0 : i32
    %c0_i32_1 = arith.constant 0 : i32
    return %arg0, %c0_i32, %c0_i32_0 : i32, i32, i32
  }
  func.func @transform_1(%arg0: i32) -> (i32, i32, i32) {
    %c0_i32 = arith.constant 0 : i32
    %c0_i32_0 = arith.constant 0 : i32
    %c0_i32_1 = arith.constant 0 : i32
    return %arg0, %c0_i32, %c0_i32_0 : i32, i32, i32
  }
  func.func @transform_2(%arg0: i32) -> (i32, i32, i32) {
    %c0_i32 = arith.constant 0 : i32
    %c0_i32_0 = arith.constant 0 : i32
    %c0_i32_1 = arith.constant 0 : i32
    %c0_i32_2 = arith.constant 0 : i32
    return %c0_i32, %c0_i32_0, %c0_i32_1 : i32, i32, i32
  }
  func.func @transform_3(%arg0: i32) -> (i32, i32) {
    %c0_i32 = arith.constant 0 : i32
    %c0_i32_0 = arith.constant 0 : i32
    %c0_i32_1 = arith.constant 0 : i32
    return %c0_i32, %c0_i32_0 : i32, i32
  }
  func.func @transform_4(%arg0: i32) -> (i32, i32) {
    %c0_i32 = arith.constant 0 : i32
    %c0_i32_0 = arith.constant 0 : i32
    %c0_i32_1 = arith.constant 0 : i32
    return %c0_i32, %c0_i32_0 : i32, i32
  }
  func.func @transform_5(%arg0: i32) -> (i32, i32, i32) {
    %c0_i32 = arith.constant 0 : i32
    %c0_i32_0 = arith.constant 0 : i32
    %c0_i32_1 = arith.constant 0 : i32
    %c0_i32_2 = arith.constant 0 : i32
    return %c0_i32, %c0_i32_0, %c0_i32_1 : i32, i32, i32
  }
  func.func @transform_6(%arg0: i32) -> (i32, i32) {
    %c0_i32 = arith.constant 0 : i32
    %c0_i32_0 = arith.constant 0 : i32
    %c0_i32_1 = arith.constant 0 : i32
    return %c0_i32, %c0_i32_0 : i32, i32
  }
  func.func @transform_7(%arg0: i32) -> (i32, i32) {
    %c0_i32 = arith.constant 0 : i32
    %c0_i32_0 = arith.constant 0 : i32
    %c0_i32_1 = arith.constant 0 : i32
    return %c0_i32, %c0_i32_0 : i32, i32
  }
  func.func @transform_8(%arg0: i32) -> (i32, i32, i32) {
    %c0_i32 = arith.constant 0 : i32
    %c0_i32_0 = arith.constant 0 : i32
    %c0_i32_1 = arith.constant 0 : i32
    %c0_i32_2 = arith.constant 0 : i32
    return %c0_i32, %c0_i32_0, %c0_i32_1 : i32, i32, i32
  }
  func.func @transform_9(%arg0: i32) -> (i32, i32) {
    %c0_i32 = arith.constant 0 : i32
    %c0_i32_0 = arith.constant 0 : i32
    %c0_i32_1 = arith.constant 0 : i32
    return %c0_i32, %c0_i32_0 : i32, i32
  }
  func.func @transform_10(%arg0: i32) -> (i32, i32) {
    %c0_i32 = arith.constant 0 : i32
    %c0_i32_0 = arith.constant 0 : i32
    %c0_i32_1 = arith.constant 0 : i32
    return %c0_i32, %c0_i32_0 : i32, i32
  }
  func.func @transform_11(%arg0: i32) -> (i32, i32, i32) {
    %c0_i32 = arith.constant 0 : i32
    %c0_i32_0 = arith.constant 0 : i32
    %c0_i32_1 = arith.constant 0 : i32
    %c0_i32_2 = arith.constant 0 : i32
    return %c0_i32, %c0_i32_0, %c0_i32_1 : i32, i32, i32
  }
  func.func @transform_12(%arg0: i32) -> (i32, i32) {
    %c0_i32 = arith.constant 0 : i32
    %c0_i32_0 = arith.constant 0 : i32
    %c0_i32_1 = arith.constant 0 : i32
    return %c0_i32, %c0_i32_0 : i32, i32
  }
  func.func @transform_13(%arg0: i32) -> (i32, i32) {
    %c0_i32 = arith.constant 0 : i32
    %c0_i32_0 = arith.constant 0 : i32
    %c0_i32_1 = arith.constant 0 : i32
    return %c0_i32, %c0_i32_0 : i32, i32
  }
  func.func @transform_14(%arg0: i32) -> (i32, i32, i32) {
    %c0_i32 = arith.constant 0 : i32
    %c0_i32_0 = arith.constant 0 : i32
    %c0_i32_1 = arith.constant 0 : i32
    %c0_i32_2 = arith.constant 0 : i32
    return %c0_i32, %c0_i32_0, %c0_i32_1 : i32, i32, i32
  }
  func.func @transform_15(%arg0: i32) -> (i32, i32) {
    %c0_i32 = arith.constant 0 : i32
    %c0_i32_0 = arith.constant 0 : i32
    %c0_i32_1 = arith.constant 0 : i32
    return %c0_i32, %c0_i32_0 : i32, i32
  }
  func.func @transform_16(%arg0: i32) -> (i32, i32) {
    %c0_i32 = arith.constant 0 : i32
    %c0_i32_0 = arith.constant 0 : i32
    %c0_i32_1 = arith.constant 0 : i32
    return %c0_i32, %c0_i32_0 : i32, i32
  }
  func.func @transform_17(%arg0: i32) -> (i32, i32, i32) {
    %c0_i32 = arith.constant 0 : i32
    %c0_i32_0 = arith.constant 0 : i32
    %c0_i32_1 = arith.constant 0 : i32
    %c0_i32_2 = arith.constant 0 : i32
    return %c0_i32, %c0_i32_0, %c0_i32_1 : i32, i32, i32
  }
  func.func @transform_18(%arg0: i32) -> (i32, i32) {
    %c0_i32 = arith.constant 0 : i32
    %c0_i32_0 = arith.constant 0 : i32
    %c0_i32_1 = arith.constant 0 : i32
    return %c0_i32, %c0_i32_0 : i32, i32
  }
  func.func @transform_19(%arg0: i32) -> (i32, i32) {
    %c0_i32 = arith.constant 0 : i32
    %c0_i32_0 = arith.constant 0 : i32
    %c0_i32_1 = arith.constant 0 : i32
    return %c0_i32, %c0_i32_0 : i32, i32
  }
  func.func @transform_20(%arg0: i32) -> (i32, i32, i32) {
    %c0_i32 = arith.constant 0 : i32
    %c0_i32_0 = arith.constant 0 : i32
    %c0_i32_1 = arith.constant 0 : i32
    %c0_i32_2 = arith.constant 0 : i32
    return %c0_i32, %c0_i32_0, %c0_i32_1 : i32, i32, i32
  }
  func.func @transform_21(%arg0: i32) -> (i32, i32) {
    %c0_i32 = arith.constant 0 : i32
    %c0_i32_0 = arith.constant 0 : i32
    %c0_i32_1 = arith.constant 0 : i32
    return %c0_i32, %c0_i32_0 : i32, i32
  }
  func.func @transform_22(%arg0: i32) -> (i32, i32) {
    %c0_i32 = arith.constant 0 : i32
    %c0_i32_0 = arith.constant 0 : i32
    %c0_i32_1 = arith.constant 0 : i32
    return %c0_i32, %c0_i32_0 : i32, i32
  }
  func.func @transform_23(%arg0: i32) -> (i32, i32, i32) {
    %c0_i32 = arith.constant 0 : i32
    %c0_i32_0 = arith.constant 0 : i32
    %c0_i32_1 = arith.constant 0 : i32
    return %arg0, %c0_i32, %c0_i32_0 : i32, i32, i32
  }
  func.func @transform_24(%arg0: i32) -> (i32, i32, i32) {
    %c0_i32 = arith.constant 0 : i32
    %c0_i32_0 = arith.constant 0 : i32
    %c0_i32_1 = arith.constant 0 : i32
    return %arg0, %c0_i32, %c0_i32_0 : i32, i32, i32
  }
}

</mosaic_0001>

<bundles_post_ra>
// kernel: detection_model_forward.1
= control target key start
LH: loop header
LB: loop body
LE: loop exit
PB: predicated region body
PF: predicated region fallthrough
CT: control target
= control target key end

     0   :  { %s4559_s0 = inlined_call_operand.vmem [shape: f32[2,3,256], index: 0, kind: input, shape index: {}]   ;;  %s4560_s1 = inlined_call_operand.vmem [shape: f32[2,1,256], index: 1, kind: input, shape index: {}]   ;;  %s4561_s2 = inlined_call_operand.vmem [shape: bf16[9,8,4], index: 2, kind: input, shape index: {}]   ;;  %s4562_s3 = inlined_call_operand.vmem [shape: f32[8,1], index: 3, kind: input, shape index: {}]   ;;  %s4563_s4 = inlined_call_operand.vmem [shape: f32[8,1], index: 4, kind: input, shape index: {}]   ;;  %s4564_s5 = inlined_call_operand.vmem [shape: bf16[9,16,8], index: 5, kind: input, shape index: {}]   ;;  %s4565_s6 = inlined_call_operand.vmem [shape: f32[16,1], index: 6, kind: input, shape index: {}]   ;;  %s4566_s7 = inlined_call_operand.vmem [shape: f32[16,1], index: 7, kind: input, shape index: {}]   ;;  %s4567_s8 = inlined_call_operand.vmem [shape: bf16[1,8,16], index: 8, kind: input, shape index: {}]   ;;  %s4568_s9 = inlined_call_operand.vmem [shape: f32[8,1], index: 9, kind: input, shape index: {}]   ;;  %s4569_s10 = inlined_call_operand.vmem [shape: f32[8,1], index: 10, kind: input, shape index: {}]   ;;  %s4570_s11 = inlined_call_operand.vmem [shape: bf16[9,16,8], index: 11, kind: input, shape index: {}]   ;;  %s4571_s12 = inlined_call_operand.vmem [shape: f32[16,1], index: 12, kind: input, shape index: {}]   ;;  %s4572_s13 = inlined_call_operand.vmem [shape: f32[16,1], index: 13, kind: input, shape index: {}]   ;;  %s4573_s14 = inlined_call_operand.vmem [shape: bf16[1,21,16], index: 14, kind: input, shape index: {}]   ;;  %s4574_s15 = inlined_call_operand.vmem [shape: f32[21,1], index: 15, kind: input, shape index: {}]   ;;  %s4575_s16 = inlined_call_operand.vmem [shape: f32[21,1], index: 16, kind: input, shape index: {}]   ;;  %s4576_s17 = inlined_call_operand.vmem [shape: bf16[9,16,8], index: 17, kind: input, shape index: {}]   ;;  %s4577_s18 = inlined_call_operand.vmem [shape: f32[16,1], index: 18, kind: input, shape index: {}]   ;;  %s4578_s19 = inlined_call_operand.vmem [shape: f32[16,1], index: 19, kind: input, shape index: {}]   ;;  %s4579_s20 = inlined_call_operand.vmem [shape: bf16[1,21,16], index: 20, kind: input, shape index: {}]   ;;  %s4580_s21 = inlined_call_operand.vmem [shape: f32[21,1], index: 21, kind: input, shape index: {}]   ;;  %s4581_s22 = inlined_call_operand.vmem [shape: f32[21,1], index: 22, kind: input, shape index: {}]   ;;  %s4582_s23 = inlined_call_operand.vmem [shape: f32[2,21,64], index: 23, kind: output, shape index: {0}]   ;;  %s4583_s24 = inlined_call_operand.vmem [shape: f32[2,21,16], index: 24, kind: output, shape index: {1}]  }
   0x1   :  { %4602 = sst [smem:[#allocation3_spill]] %s4559_s0 }
   0x2   :  { %4603 = sst [smem:[#allocation4_spill]] %s4560_s1 }
   0x3   :  { %4604 = sst [smem:[#allocation5_spill]] %s4561_s2 }
   0x4   :  { %4605 = sst [smem:[#allocation6_spill]] %s4562_s3 }
   0x5   :  { %4606 = sst [smem:[#allocation7_spill]] %s4563_s4 }
   0x6   :  { %4607 = sst [smem:[#allocation8_spill]] %s4564_s5  ;;  %s3753_s5 = smov 0  }
   0x7   :  { %4608 = sst [smem:[#allocation9_spill]] %s4565_s6 }
   0x8   :  { %4609 = sst [smem:[#allocation10_spill]] %s4566_s7 }
   0x9   :  { %4610 = sst [smem:[#allocation11_spill]] %s4567_s8 }
   0xa   :  { %4611 = sst [smem:[#allocation12_spill]] %s4568_s9 }
   0xb   :  { %4612 = sst [smem:[#allocation13_spill]] %s4569_s10 }
   0xc LB: > { %s3167_s26 = sadd.s32 4294967295, %s3608_s5   ;;  %p3171_p0 = scmp.ge.s32.totalorder %s3608_s5, 1  ;;  %s3608_s5 = sphi %s3753_s5, %s35_s5  }
   0xd   : > { %p674_p1 = scmp.lt.s32.totalorder %s3608_s5, 3 }
   0xf   : > { %p675_p2 = pnand %p3171_p0, %p674_p1 }
  0x10   : > { %p749_p3 = scmp.lt.s32.totalorder (!%p675_p2), %s3167_s26, 1  ;;  %s4613_s29 = sld [smem:[#allocation3_spill]] (!%p675_p2) }
  0x11   : > { %678 = sbr.rel (%p675_p2) target bundleno = 1774 (0x6ee), region = 112  ;;  %s4614_s3 = sld [smem:[#allocation4_spill]] (!%p675_p2) }
  0x12   : > { %s3611_s8 = smov (!%p675_p2), 17   ;;  %s3612_s4 = smov (!%p675_p2), 16  }
  0x13   : > { %s3613_s1 = smov (!%p675_p2), 15   ;;  %s4592_s6 = smov (!%p675_p2), 127  }
  0x14   : > { %s4590_s2 = smov (!%p675_p2), 112   ;;  %s4615_s30 = sld [smem:[#allocation5_spill]] (!%p675_p2) }
  0x15   : > { %s4624_s9 = sld [smem:[#allocation12_spill]] (!%p675_p2)  ;;  %s4598_s7 = smov (!%p675_p2), 8  }
  0x16   : > { %v3610_v0 = vmov 0.0   ;;  %v787_v1 = vlaneseq  ;;  %s4631_s26 = smov (!%p749_p3, %s3167_s26), 1  ;;  %vm940_vm1 = vcmask 121856   ;;  %vm823_vm3 = vcmask 138240   ;;  %s4626_s10 = sld [smem:[#allocation13_spill]] }
  0x17   : > { %771 = vst [vmem:[#allocation2] sm:$0xff] %v3610_v0  ;;  %s3452_s27 = sshll.u32 %s4631_s26, 3  ;;  %s3174_s28 = sshll.u32 %s4631_s26, 1  ;;  %vm854_vm6 = vcmask 1041408   ;;  %vm847_vm7 = vcmask 130048   ;;  %vm850_vm8 = vcmask 31744  }
  0x18   : > { %772 = vst [vmem:[#allocation2 + $0x8] sm:$0xff] %v3610_v0  ;;  %s753_s0 = scalar_lea.vmem %s4613_s29, %s3452_s27  ;;  %s757_s25 = scalar_lea.vmem %s4614_s3, %s3174_s28  ;;  %vm789_vm0 = vcmp.lt.s32.totalorder %v787_v1, 256  ;;  %v3806_v21 = vand.u32 127, %v787_v1  ;;  %vm994_vm10 = vcmask 7168   ;;  %vm1147_vm11 = vcmask 924672  }
  0x19   : > { %773 = vst [vmem:[#allocation2 + $0x10] sm:$0xff] %v3610_v0  ;;  %v769_v2 = vld [vmem:[%s753_s0] sm:$0x77]  ;;  %s4594_s27 = smov 1   ;;  %s3615_s28 = smov 113   ;;  %vm1093_vm12 = vcmask 1039360  }
  0x1a   : > { %2577 = vst [vmem:[#allocation2 + $0x20] sm:$0xff] %v3610_v0  ;;  %v770_v3 = vld [vmem:[%s757_s25] sm:$0x3]  ;;  %s4588_s29 = smov 111   ;;  %v796_v22 = vadd.s32 128, %v3806_v21  ;;  %v797_v24 = vand.u32 15, %v3806_v21 }
  0x1b   : > { %780 = vst [vmem:[#allocation1] ss:$2 sm:$0xff] %v769_v2  ;;  %v830_v50 = vld [vmem:[%s4615_s30] sm:$0xf]  ;;  %v3177_v55 = vld [vmem:[%s4615_s30 + $0x4] sm:$0xf] }
  0x1c   : > { %792 = vst.msk [vmem:[#allocation2 + $0xb] ss:$8 sm:$0x3] %vm789_vm0, %v770_v3  ;;  %v798_v25 = vand.u32 15, %v796_v22  ;;  %v3810_v28 = vadd.s32 1, %v797_v24  ;;  %v3812_v29 = vadd.s32 4294967295, %v797_v24 }
  0x1d   : > { %774 = vst [vmem:[#allocation2 + $0x18] sm:$0xff] %v3610_v0  ;;  %vm1209_vm13 = vcmask 916480   ;;  %vm1255_vm14 = vcmask 908288   ;;  %s4616_s3 = sld [smem:[#allocation6_spill]] }
  0x1e   : > { %v799_v4 = vld [vmem:[#allocation2] sm:$0xf]  ;;  %v3814_v30 = vadd.s32 4294967295, %v798_v25  ;;  %vm926_vm2 = vcmp.lt.s32.totalorder %v3810_v28, 16  ;;  %vm804_vm4 = vcmp.ge.s32.totalorder %v3812_v29, 0  ;;  %v3841_v56 = vadd.s32 1, %v798_v25 }
  0x1f   : > { %2573 = vst [vmem:[#allocation2] sm:$0xff] %v3610_v0  ;;  %v835_v14 = vpack.c.bf16 %v799_v4, %v799_v4  ;;  %v3182_v25 = vld [vmem:[%s4615_s30 + $0x8] sm:$0xf]  ;;  %s4622_s25 = sld [smem:[#allocation9_spill]] }
  0x20   : > { %vm805_vm5 = vcmp.ge.s32.totalorder %v3814_v30, 0  ;;  %vm927_vm9 = vcmp.lt.s32.totalorder %v3841_v56, 16  ;;  %s4627_s0 = sld [smem:[#allocation11_spill]] }
  0x22   : > { %v781_v5 = vld.sshfl [vmem:[#allocation1] sm:$0xff pattern:$0x75316420]  ;;  %v782_v6 = vld.sshfl [vmem:[#allocation1 + $0x8] sm:$0xff pattern:$0x75316420] }
  0x23   : > { %785 = vst [vmem:[#allocation2 + $0x8] sm:$0x7] %v781_v5 }
  0x24   : > { %786 = vst [vmem:[#allocation2 + $0x10] sm:$0x7] %v782_v6  ;;  %v1083_v7 = vld [vmem:[#allocation2 + $0x18] sm:$0xf] }
  0x25   : > { %2576 = vst [vmem:[#allocation2 + $0x18] sm:$0xff] %v3610_v0  ;;  %v1199_v19 = vpack.c.bf16 %v1083_v7, %v1083_v7 }
  0x2a   : > { %v800_v8 = vld [vmem:[#allocation2 + $0x8] sm:$0xf] }
  0x2b   : > { %v1081_v9 = vld [vmem:[#allocation2 + $0x8] sm:$0xf]  ;;  %v3508_v10 = vpack.i.bf16 %v800_v8, %v799_v4  ;;  %v3779_v11 = vpack.c.bf16 %v800_v8, %v800_v8  ;;  %v801_v12 = vld [vmem:[#allocation2 + $0x10] sm:$0xf] }
  0x2c   : > { %v1082_v13 = vld [vmem:[#allocation2 + $0x10] sm:$0xf]  ;;  %2112 = vst [vmem:[#allocation2 + $0x8] sm:$0xff] %v3610_v0  ;;  %821 = vrot.lane.b32.xlu2 %v801_v12, %s3611_s8  ;;  %v3787_v15 = vpack.c.bf16 %v801_v12, %v801_v12  ;;  %v1197_v18 = vpack.c.bf16 %v1081_v9, %v1081_v9 }
  0x2d   : > { %2575 = vst [vmem:[#allocation2 + $0x10] sm:$0xff] %v3610_v0  ;;  %3509 = vrot.lane.b32.xlu0 %v3508_v10, %s3611_s8  ;;  %843 = vrot.lane.b32.xlu1 %v3779_v11, %s3612_s4  ;;  %v3528_v16 = vpack.i.bf16 %v1082_v13, %v1081_v9  ;;  %v1198_v17 = vpack.c.bf16 %v1082_v13, %v1082_v13  ;;  %v1048_v57 = vsel %vm854_vm6, %v3779_v11, 0 }
  0x34   : > { %3514 = vrot.lane.b32.xlu2 %v3508_v10, %s3613_s1 }
  0x35   : > { %841 = vrot.lane.b32.xlu0 %v835_v14, %s3612_s4  ;;  %845 = vrot.lane.b32.xlu1 %v3787_v15, %s3612_s4 }
  0x3c   : > { %992 = vrot.lane.b32.xlu2 %v801_v12, %s4594_s27 }
  0x3d   : > { %3519 = vrot.lane.b32.xlu1 %v3508_v10, %s4594_s27  ;;  %938 = vrot.lane.b32.xlu0 %v801_v12, %s3613_s1  ;;  %v1051_v10 = vsel %vm854_vm6, %v3787_v15, 0  ;;  %s4618_s27 = smov 1  }
  0x44   : > { %3529 = vrot.lane.b32.xlu2 %v3528_v16, %s3615_s28 }
  0x45   : > { %3524 = vrot.lane.b32.xlu0 %v3528_v16, %s4592_s6  ;;  %1091 = vrot.lane.b32.xlu1 %v1083_v7, %s4592_s6  ;;  %s4619_s6 = smov 127  }
  0x4c   : > { %1205 = vrot.lane.b32.xlu2 %v1198_v17, %s4590_s2 }
  0x4d   : > { %1145 = vrot.lane.b32.xlu0 %v1083_v7, %s3615_s28  ;;  %1203 = vrot.lane.b32.xlu1 %v1197_v18, %s4590_s2  ;;  %v3185_v18 = vld [vmem:[%s4615_s30 + $0xc] sm:$0xf] }
  0x54   : > { %1253 = vrot.lane.b32.xlu2 %v1083_v7, %s4588_s29 }
  0x55   : > { %1207 = vrot.lane.b32.xlu0 %v1199_v19, %s4590_s2  ;;  %3534 = vrot.lane.b32.xlu1 %v3528_v16, %s4588_s29  ;;  %s4617_s2 = sld [smem:[#allocation7_spill]] }
  0x56   : > { %s4625_s29 = sld [smem:[#allocation8_spill]] }
  0x5c   : > { %v3457_v30 = vld [vmem:[%s4625_s29 + $0x20] sm:$0xff]  ;;  %v3458_v28 = vld [vmem:[%s4625_s29 + $0x28] sm:$0xff] }
  0x86   : > { %v822_v20 = vpop.permute.xlu2 %821 }
  0x8e   : > { %v3515_v23 = vpop.permute.xlu2 %3514 }
  0x8f   : > { %v3517_v26 = vunpack.i.h.bf16 %v3515_v23  ;;  %v3516_v27 = vunpack.i.l.bf16 %v3515_v23 }
  0x91   : > { %v941_v31 = vsel %vm940_vm1, %v3516_v27, %v3517_v26 }
  0x92   : > { %v945_v36 = vsel %vm926_vm2, %v941_v31, 0.0 }
  0x93   : > { %v949_v43 = vpack.c.bf16 %v945_v36, %v945_v36 }
  0x95   : > { %v955_v51 = vsel %vm854_vm6, %v949_v43, 0 }
  0x96   : > { %v993_v52 = vpop.permute.xlu2 %992 }
  0x9e   : > { %v3530_v63 = vpop.permute.xlu2 %3529 }
  0x9f   : > { %v3510_v32 = vpop.permute.xlu0 %3509  ;;  %v844_v33 = vpop.permute.xlu1 %843  ;;  %v3532_v3 = vunpack.i.h.bf16 %v3530_v63  ;;  %v3531_v7 = vunpack.i.l.bf16 %v3530_v63  ;;  %v1303_v63 = vld [vmem:[%s4616_s3] sm:$0xff]  ;;  %s3624_s3 = smov 9  }
  0xa0   : > { %v3512_v34 = vunpack.i.h.bf16 %v3510_v32  ;;  %v3511_v35 = vunpack.i.l.bf16 %v3510_v32 }
  0xa1   : > { %v1148_v17 = vsel %vm1147_vm11, %v3531_v7, %v3532_v3  ;;  %v3194_v7 = vld [vmem:[%s4615_s30 + $0x18] sm:$0xf] }
  0xa2   : > { %v825_v37 = vsel %vm823_vm3, %v3512_v34, %v822_v20  ;;  %v824_v38 = vsel %vm823_vm3, %v3511_v35, %v3512_v34  ;;  %v1152_v20 = vsel %vm804_vm4, %v1148_v17, 0.0 }
  0xa3   : > { %v828_v39 = vsel %vm804_vm4, %v824_v38, 0.0  ;;  %v829_v40 = vsel %vm805_vm5, %v825_v37, 0.0  ;;  %v1156_v24 = vpack.c.bf16 %v1152_v20, %v1152_v20 }
  0xa4   : > { %v831_v41 = vpack.c.bf16 %v828_v39, %v828_v39  ;;  %v832_v42 = vpack.c.bf16 %v829_v40, %v829_v40 }
  0xa6   : > { %v891_v44 = vsel %vm854_vm6, %v831_v41, 0  ;;  %v894_v45 = vsel %vm854_vm6, %v832_v42, 0  ;;  %v1206_v36 = vpop.permute.xlu2 %1205 }
  0xa7   : > { %v842_v46 = vpop.permute.xlu0 %841  ;;  %903 = vmatpush.bf16.msra.mxu3 %v891_v44  ;;  %v846_v47 = vpop.permute.xlu1 %845 }
  0xa8   : > { %v848_v48 = vsel %vm847_vm7, %v842_v46, %v844_v33  ;;  %v849_v49 = vsel %vm847_vm7, %v844_v33, %v846_v47  ;;  %v1162_v33 = vsel %vm854_vm6, %v1156_v24, 0 }
  0xa9   : > { %v856_v53 = vsel %vm854_vm6, %v848_v48, 0  ;;  %v859_v54 = vsel %vm854_vm6, %v849_v49, 0  ;;  %v3191_v48 = vld [vmem:[%s4615_s30 + $0x14] sm:$0xf] }
  0xaa   : > { %868 = vmatpush.bf16.msra.mxu0 %v856_v53  ;;  %881 = vmatpush.bf16.msra.mxu1 %v859_v54 }
  0xab   : > { %916 = vmatpush.bf16.msrb.mxu3 %v894_v45 }
  0xac   : > { %3180 = vmatmul.msk.bf16.vlgmr.msra.gmra.mxu3 %vm850_vm8, %v830_v50 }
  0xad   : > { %3178 = vmatmul.msk.bf16.vlgmr.msra.gmra.mxu0 %vm850_vm8, %v3177_v55  ;;  %3179 = vmatmul.msk.bf16.vlgmr.msra.gmra.mxu1 %vm850_vm8, %v3177_v55  ;;  %v3188_v55 = vld [vmem:[%s4615_s30 + $0x10] sm:$0xf] }
  0xae   : > { %967 = vmatpush.bf16.msrb.mxu0 %v955_v51  ;;  %v1254_v47 = vpop.permute.xlu2 %1253 }
  0xaf   : > { %v3520_v58 = vpop.permute.xlu1 %3519  ;;  %v939_v59 = vpop.permute.xlu0 %938 }
  0xb0   : > { %v3522_v60 = vunpack.i.h.bf16 %v3520_v58  ;;  %v3521_v61 = vunpack.i.l.bf16 %v3520_v58  ;;  %v942_v62 = vsel %vm940_vm1, %v3517_v26, %v939_v59 }
  0xb1   : > { %v946_v2 = vsel %vm927_vm9, %v942_v62, 0.0 }
  0xb2   : > { %1060 = vmatpush.bf16.msra.mxu0 %v1048_v57  ;;  %v995_v4 = vsel %vm994_vm10, %v3521_v61, %v3522_v60  ;;  %v950_v5 = vpack.c.bf16 %v946_v2, %v946_v2  ;;  %v996_v6 = vsel %vm994_vm10, %v3522_v60, %v993_v52  ;;  %v1311_v2 = vld [vmem:[%s4617_s2] sm:$0xff]  ;;  %s4623_s2 = sld [smem:[#allocation10_spill]] }
  0xb3   : > { %v999_v8 = vsel %vm804_vm4, %v995_v4, 0.0  ;;  %v1000_v9 = vsel %vm805_vm5, %v996_v6, 0.0  ;;  %v3197_v6 = vld [vmem:[%s4615_s30 + $0x1c] sm:$0xf] }
  0xb4   : > { %v1003_v11 = vpack.c.bf16 %v999_v8, %v999_v8  ;;  %v958_v12 = vsel %vm854_vm6, %v950_v5, 0  ;;  %v1004_v13 = vpack.c.bf16 %v1000_v9, %v1000_v9  ;;  %v3619_v5 = vmov 0   ;;  %v3200_v8 = vld [vmem:[%s4615_s30 + $0x20] sm:$0xf] }
  0xb5   : > { %980 = vmatpush.bf16.msrb.mxu1 %v958_v12  ;;  %3538 = vset.pattern.permute.xlu0 %v3619_v5 }
  0xb6   : > { %v1009_v14 = vsel %vm854_vm6, %v1003_v11, 0  ;;  %v1012_v16 = vsel %vm854_vm6, %v1004_v13, 0  ;;  %3539 = vset.pattern.permute.xlu1 %v3619_v5  ;;  %1306 = vperm.xlu0 %3538, %v1303_v63  }
  0xb7   : > { %1021 = vmatpush.bf16.msra.mxu2 %v1009_v14  ;;  %v3525_v19 = vpop.permute.xlu0 %3524  ;;  %1034 = vmatpush.bf16.msra.mxu3 %v1012_v16  ;;  %v1092_v15 = vpop.permute.xlu1 %1091 }
  0xb8   : > { %v3527_v22 = vunpack.i.h.bf16 %v3525_v19  ;;  %v3526_v23 = vunpack.i.l.bf16 %v3525_v19  ;;  %1314 = vperm.xlu1 %3539, %v1311_v2   ;;  %3570 = vset.pattern.permute.xlu2 %v3619_v5 }
  0xb9   : > { %1073 = vmatpush.bf16.msra.mxu1 %v1051_v10 }
  0xba   : > { %3186 = vmatmul.msk.bf16.vlgmr.msra.gmra.mxu2 %vm850_vm8, %v3185_v18  ;;  %v1094_v26 = vsel %vm1093_vm12, %v3526_v23, %v3527_v22  ;;  %v1095_v27 = vsel %vm1093_vm12, %v3527_v22, %v1092_v15 }
  0xbb   : > { %v1098_v31 = vsel %vm926_vm2, %v1094_v26, 0.0  ;;  %v1099_v32 = vsel %vm927_vm9, %v1095_v27, 0.0 }
  0xbc   : > { %3181 = vmatmul.msk.bf16.vlgmr.msrb.gmra.mxu3 %vm850_vm8, %v830_v50  ;;  %v1102_v34 = vpack.c.bf16 %v1098_v31, %v1098_v31  ;;  %v1103_v35 = vpack.c.bf16 %v1099_v32, %v1099_v32 }
  0xbd   : > { %3183 = vmatmul.msk.bf16.vlgmr.msrb.gmra.mxu0 %vm850_vm8, %v3182_v25  ;;  %3184 = vmatmul.msk.bf16.vlgmr.msrb.gmra.mxu1 %vm850_vm8, %v3182_v25 }
  0xbe   : > { %v1108_v37 = vsel %vm854_vm6, %v1102_v34, 0  ;;  %v1111_v38 = vsel %vm854_vm6, %v1103_v35, 0  ;;  %1174 = vmatpush.bf16.msrb.mxu0 %v1162_v33  ;;  %v3620_v33 = vmov 0.0|0.0  }
  0xbf   : > { %1120 = vmatpush.bf16.msrb.mxu2 %v1108_v37  ;;  %1133 = vmatpush.bf16.msrb.mxu3 %v1111_v38  ;;  %v1146_v39 = vpop.permute.xlu0 %1145  ;;  %v1204_v40 = vpop.permute.xlu1 %1203 }
  0xc0   : > { %v1149_v41 = vsel %vm1147_vm11, %v3532_v3, %v1146_v39  ;;  %v1210_v42 = vsel %vm1209_vm13, %v1204_v40, %v1206_v36  ;;  %1371 = vrot.lane.b32.xlu2 %v3620_v33, %s3612_s4 }
  0xc1   : > { %v1153_v43 = vsel %vm805_vm5, %v1149_v41, 0.0  ;;  %v1216_v44 = vsel %vm854_vm6, %v1210_v42, 0 }
  0xc2   : > { %v1157_v45 = vpack.c.bf16 %v1153_v43, %v1153_v43 }
  0xc3   : > { %1228 = vmatpush.bf16.msra.mxu2 %v1216_v44 }
  0xc4   : > { %v1165_v46 = vsel %vm854_vm6, %v1157_v45, 0 }
  0xc5   : > { %1187 = vmatpush.bf16.msrb.mxu1 %v1165_v46 }
  0xc7   : > { %v1208_v49 = vpop.permute.xlu0 %1207  ;;  %v3535_v50 = vpop.permute.xlu1 %3534 }
  0xc8   : > { %v1211_v51 = vsel %vm1209_vm13, %v1206_v36, %v1208_v49  ;;  %v3537_v52 = vunpack.i.h.bf16 %v3535_v50  ;;  %v3536_v53 = vunpack.i.l.bf16 %v3535_v50 }
  0xc9   : > { %v1219_v54 = vsel %vm854_vm6, %v1211_v51, 0 }
  0xca   : > { %3192 = vmatmul.msk.bf16.vlgmr.msrb.gmra.mxu2 %vm850_vm8, %v3191_v48  ;;  %v1257_v57 = vsel %vm1255_vm14, %v3537_v52, %v1254_v47  ;;  %v1256_v58 = vsel %vm1255_vm14, %v3536_v53, %v3537_v52 }
  0xcb   : > { %v1261_v59 = vsel %vm927_vm9, %v1257_v57, 0.0  ;;  %v1260_v60 = vsel %vm926_vm2, %v1256_v58, 0.0 }
  0xcc   : > { %3187 = vmatmul.msk.bf16.vlgmr.msra.gmra.mxu3 %vm850_vm8, %v3185_v18  ;;  %v1265_v61 = vpack.c.bf16 %v1261_v59, %v1261_v59  ;;  %v1264_v62 = vpack.c.bf16 %v1260_v60, %v1260_v60 }
  0xcd   : > { %1241 = vmatpush.bf16.msra.mxu3 %v1219_v54  ;;  %3189 = vmatmul.msk.bf16.vlgmr.msra.gmra.mxu0 %vm850_vm8, %v3188_v55 }
  0xce   : > { %3190 = vmatmul.msk.bf16.vlgmr.msra.gmra.mxu1 %vm850_vm8, %v3188_v55  ;;  %v1270_v3 = vsel %vm854_vm6, %v1264_v62, 0  ;;  %v1273_v4 = vsel %vm854_vm6, %v1265_v61, 0  ;;  %vm1383_vm6 = vcmask 1043456  }
  0xcf   : > { %1282 = vmatpush.bf16.msra.mxu0 %v1270_v3  ;;  %1295 = vmatpush.bf16.msra.mxu1 %v1273_v4 }
  0xda   : > { %3198 = vmatmul.msk.bf16.vlgmr.msra.gmra.mxu2 %vm850_vm8, %v3197_v6 }
  0xdc   : > { %3193 = vmatmul.msk.bf16.vlgmr.msrb.gmra.mxu3 %vm850_vm8, %v3191_v48 }
  0xdd   : > { %3195 = vmatmul.msk.bf16.vlgmr.msrb.gmra.mxu0 %vm850_vm8, %v3194_v7 }
  0xde   : > { %3196 = vmatmul.msk.bf16.vlgmr.msrb.gmra.mxu1 %vm850_vm8, %v3194_v7 }
  0xec   : > { %3199 = vmatmul.msk.bf16.vlgmr.msra.gmra.mxu3 %vm850_vm8, %v3197_v6 }
  0xed   : > { %3201 = vmatmul.msk.bf16.vlgmr.msra.gmra.mxu0 %vm850_vm8, %v3200_v8 }
  0xee   : > { %3202 = vmatmul.msk.bf16.vlgmr.msra.gmra.mxu1 %vm850_vm8, %v3200_v8  ;;  %vm1379_vm8 = vcmask 64512  }
 0x128   : > { %v1307_v57 = vpop.permute.xlu0 %1306 }
 0x12a   : > { %v870_v9 = vpop.f32.mrf.mxu0  ;;  %v883_v10 = vpop.f32.mrf.mxu1 }
 0x12b   : > { %v1315_v61 = vpop.permute.xlu1 %1314 }
 0x12f   : > { %v905_v11 = vpop.f32.mrf.mxu3 }
 0x130   : > { %v906_v36 = vadd.f32 %v905_v11, %v870_v9 }
 0x132   : > { %v872_v12 = vpop.f32.mrf.mxu0  ;;  %v885_v13 = vpop.f32.mrf.mxu1 }
 0x137   : > { %v907_v14 = vpop.f32.mrf.mxu3 }
 0x13a   : > { %v969_v16 = vpop.f32.mrf.mxu0  ;;  %v982_v17 = vpop.f32.mrf.mxu1 }
 0x13b   : > { %v986_v37 = vadd.f32 %v969_v16, %v906_v36  ;;  %v3453_v36 = vld [vmem:[%s4625_s29] sm:$0xff] }
 0x13d   : > { %v1023_v18 = vpop.f32.mrf.mxu2 }
 0x13e   : > { %v1040_v41 = vadd.f32 %v1023_v18, %v986_v37 }
 0x13f   : > { %v918_v19 = vpop.f32.mrf.mxu3 }
 0x140   : > { %v919_v40 = vadd.f32 %v918_v19, %v883_v10 }
 0x142   : > { %v971_v15 = vpop.f32.mrf.mxu0  ;;  %v984_v20 = vpop.f32.mrf.mxu1  ;;  %v987_v45 = vadd.f32 %v982_v17, %v919_v40 }
 0x143   : > { %v2041_v15 = vld [vmem:[%s4622_s25] sm:$0xff]  ;;  %v2056_v20 = vld [vmem:[%s4623_s2 + $0x8] sm:$0xff] }
 0x145   : > { %v1025_v22 = vpop.f32.mrf.mxu2 }
 0x146   : > { %v2042_v22 = vld [vmem:[%s4622_s25 + $0x8] sm:$0xff] }
 0x147   : > { %v920_v23 = vpop.f32.mrf.mxu3 }
 0x148   : > { %v1372_v23 = vpop.permute.xlu2 %1371 }
 0x14a   : > { %v1062_v24 = vpop.f32.mrf.mxu0 }
 0x14b   : > { %v1075_v25 = vpop.f32.mrf.mxu1  ;;  %v1079_v44 = vadd.f32 %v1062_v24, %v1040_v41 }
 0x14d   : > { %v1122_v26 = vpop.f32.mrf.mxu2 }
 0x14e   : > { %v1139_v49 = vadd.f32 %v1122_v26, %v1079_v44 }
 0x14f   : > { %v1036_v27 = vpop.f32.mrf.mxu3 }
 0x150   : > { %v1041_v48 = vadd.f32 %v1036_v27, %v987_v45 }
 0x152   : > { %v1064_v31 = vpop.f32.mrf.mxu0  ;;  %v1080_v53 = vadd.f32 %v1075_v25, %v1041_v48 }
 0x153   : > { %v1077_v32 = vpop.f32.mrf.mxu1 }
 0x155   : > { %v1124_v34 = vpop.f32.mrf.mxu2 }
 0x157   : > { %v1038_v35 = vpop.f32.mrf.mxu3 }
 0x15a   : > { %v1176_v38 = vpop.f32.mrf.mxu0 }
 0x15b   : > { %v1189_v39 = vpop.f32.mrf.mxu1  ;;  %v1193_v50 = vadd.f32 %v1176_v38, %v1139_v49 }
 0x15d   : > { %v1230_v42 = vpop.f32.mrf.mxu2 }
 0x15e   : > { %v1247_v55 = vadd.f32 %v1230_v42, %v1193_v50 }
 0x15f   : > { %v1135_v43 = vpop.f32.mrf.mxu3 }
 0x160   : > { %v1140_v54 = vadd.f32 %v1135_v43, %v1080_v53 }
 0x162   : > { %v1178_v46 = vpop.f32.mrf.mxu0  ;;  %v1194_v62 = vadd.f32 %v1189_v39, %v1140_v54 }
 0x163   : > { %v1191_v47 = vpop.f32.mrf.mxu1  ;;  %v3454_v46 = vld [vmem:[%s4625_s29 + $0x8] sm:$0xff] }
 0x165   : > { %v1232_v51 = vpop.f32.mrf.mxu2 }
 0x167   : > { %v1137_v52 = vpop.f32.mrf.mxu3 }
 0x16a   : > { %v1284_v58 = vpop.f32.mrf.mxu0 }
 0x16b   : > { %v1297_v59 = vpop.f32.mrf.mxu1  ;;  %v1301_v60 = vadd.f32 %v1284_v58, %v1247_v55 }
 0x16d   : > { %v1309_v63 = vmul.f32 %v1307_v57, %v1301_v60 }
 0x16f   : > { %v1243_v2 = vpop.f32.mrf.mxu3  ;;  %v1317_v4 = vadd.f32 %v1315_v61, %v1309_v63 }
 0x170   : > { %v1248_v3 = vadd.f32 %v1243_v2, %v1194_v62 }
 0x171   : > { %vm1319_vm15 = vcmp.gt.f32.partialorder %v1317_v4, 0.0  ;;  %v1321_v5 = vmul.f32 0.1, %v1317_v4 }
 0x172   : > { %v1302_v6 = vadd.f32 %v1297_v59, %v1248_v3  ;;  %v1286_v7 = vpop.f32.mrf.mxu0 }
 0x173   : > { %v1299_v8 = vpop.f32.mrf.mxu1  ;;  %v1323_v9 = vsel %vm1319_vm15, %v1317_v4, %v1321_v5 }
 0x174   : > { %v1310_v10 = vmul.f32 %v1307_v57, %v1302_v6  ;;  %v3540_v11 = vpack.i.bf16 %v1323_v9, %v3610_v0  ;;  %v3936_v12 = vpack.c.bf16 %v1323_v9, %v1323_v9 }
 0x176   : > { %v1318_v13 = vadd.f32 %v1315_v61, %v1310_v10  ;;  %3541 = vrot.lane.b32.xlu0 %v3540_v11, %s3613_s1  ;;  %1373 = vrot.lane.b32.xlu1 %v3936_v12, %s3612_s4  ;;  %v1598_v54 = vsel %vm1383_vm6, %v3936_v12, 0 }
 0x177   : > { %v1245_v14 = vpop.f32.mrf.mxu3 }
 0x178   : > { %vm1320_vm0 = vcmp.gt.f32.partialorder %v1318_v13, 0.0  ;;  %v1322_v16 = vmul.f32 0.1, %v1318_v13 }
 0x17a   : > { %v1324_v17 = vsel %vm1320_vm0, %v1318_v13, %v1322_v16  ;;  %v3455_v13 = vld [vmem:[%s4625_s29 + $0x10] sm:$0xff] }
 0x17b   : > { %v3941_v18 = vpack.c.bf16 %v1324_v17, %v1324_v17  ;;  %v3555_v19 = vpack.i.bf16 %v1324_v17, %v1323_v9 }
 0x17d   : > { %1375 = vrot.lane.b32.xlu2 %v3941_v18, %s3612_s4  ;;  %s4620_s4 = smov 112   ;;  %v1601_v5 = vsel %vm1383_vm6, %v3941_v18, 0 }
 0x17e   : > { %1345 = vrot.lane.b32.xlu0 %v1324_v17, %s3611_s8  ;;  %1464 = vrot.lane.b32.xlu1 %v1324_v17, %s3613_s1  ;;  %s4621_s1 = smov 111  }
 0x185   : > { %3546 = vrot.lane.b32.xlu2 %v3540_v11, %s3611_s8  ;;  %s4596_s8 = smov 7  }
 0x186   : > { %3556 = vrot.lane.b32.xlu0 %v3555_v19, %s3615_s28  ;;  %3551 = vrot.lane.b32.xlu1 %v3540_v11, %s4618_s27 }
 0x18d   : > { %1527 = vrot.lane.b32.xlu2 %v1324_v17, %s4618_s27 }
 0x18e   : > { %1645 = vrot.lane.b32.xlu0 %v3610_v0, %s4619_s6  ;;  %1708 = vrot.lane.b32.xlu1 %v3610_v0, %s3615_s28 }
 0x195   : > { %3561 = vrot.lane.b32.xlu2 %v3555_v19, %s4619_s6 }
 0x196   : > { %1781 = vrot.lane.b32.xlu0 %v3936_v12, %s4620_s4  ;;  %3566 = vrot.lane.b32.xlu1 %v3555_v19, %s4621_s1 }
 0x19d   : > { %1834 = vrot.lane.b32.xlu2 %v3610_v0, %s4621_s1  ;;  %v2094_v0 = vld [vmem:[%s4624_s9] sm:$0xff]  ;;  %s4628_s1 = smov 8   ;;  %s4629_s9 = smov 7  }
 0x19e   : > { %2045 = vperm.xlu0 %3538, %v2041_v15   ;;  %1783 = vrot.lane.b32.xlu1 %v3941_v18, %s4620_s4 }
 0x1a5   : > { %1785 = vrot.lane.b32.xlu2 %v3620_v33, %s4620_s4  ;;  %s3625_s4 = smov 121  }
 0x1a6   : > { %2064 = vperm.xlu0 %3538, %v2056_v20   ;;  %2050 = vperm.xlu1 %3539, %v2042_v22  }
 0x1ae   : > { %2097 = vperm.xlu1 %3539, %v2094_v0   ;;  %2154 = vrot.lane.b32.xlu0 %v3620_v33, %s4598_s7 }
 0x1d7   : > { %v1376_v24 = vpop.permute.xlu2 %1375 }
 0x1df   : > { %v3547_v25 = vpop.permute.xlu2 %3546 }
 0x1e0   : > { %v3549_v26 = vunpack.i.h.bf16 %v3547_v25  ;;  %v3548_v27 = vunpack.i.l.bf16 %v3547_v25 }
 0x1e2   : > { %v1347_v31 = vsel %vm823_vm3, %v3548_v27, %v3549_v26  ;;  %v3456_v27 = vld [vmem:[%s4625_s29 + $0x18] sm:$0xff] }
 0x1e3   : > { %v1351_v32 = vsel %vm804_vm4, %v1347_v31, 0.0 }
 0x1e4   : > { %v1355_v34 = vpack.c.bf16 %v1351_v32, %v1351_v32 }
 0x1e6   : > { %v1427_v35 = vsel %vm1383_vm6, %v1355_v34, 0 }
 0x1e7   : > { %v1528_v37 = vpop.permute.xlu2 %1527  ;;  %1439 = vmatpush.bf16.msrb.mxu0 %v1427_v35 }
 0x1e8   : > { %v3542_v38 = vpop.permute.xlu0 %3541  ;;  %v1374_v39 = vpop.permute.xlu1 %1373 }
 0x1e9   : > { %v3544_v40 = vunpack.i.h.bf16 %v3542_v38  ;;  %v3543_v41 = vunpack.i.l.bf16 %v3542_v38  ;;  %v1377_v42 = vsel %vm847_vm7, %v1372_v23, %v1374_v39  ;;  %v1378_v43 = vsel %vm847_vm7, %v1374_v39, %v1376_v24 }
 0x1ea   : > { %3215 = vmatmul.msk.bf16.vlgmr.msrb.gmra.mxu0 %vm1379_vm8, %v3453_v36  ;;  %v1385_v44 = vsel %vm1383_vm6, %v1377_v42, 0  ;;  %v1388_v45 = vsel %vm1383_vm6, %v1378_v43, 0 }
 0x1eb   : > { %v1466_v47 = vsel %vm940_vm1, %v3543_v41, %v3544_v40  ;;  %1397 = vmatpush.bf16.msrb.mxu2 %v1385_v44  ;;  %1411 = vmatpush.bf16.msrb.mxu3 %v1388_v45 }
 0x1ec   : > { %v1470_v48 = vsel %vm926_vm2, %v1466_v47, 0.0 }
 0x1ed   : > { %v1475_v49 = vpack.c.bf16 %v1470_v48, %v1470_v48 }
 0x1ee   : > { %3209 = vmatmul.msk.bf16.vlgmr.msrb.gmra.mxu2 %vm1379_vm8, %v3454_v46  ;;  %3210 = vmatmul.msk.bf16.vlgmr.msrb.gmra.mxu3 %vm1379_vm8, %v3454_v46 }
 0x1ef   : > { %v3562_v50 = vpop.permute.xlu2 %3561  ;;  %v1486_v51 = vsel %vm1383_vm6, %v1475_v49, 0 }
 0x1f0   : > { %v1346_v52 = vpop.permute.xlu0 %1345  ;;  %1498 = vmatpush.bf16.msra.mxu2 %v1486_v51  ;;  %v1465_v53 = vpop.permute.xlu1 %1464  ;;  %v3564_v55 = vunpack.i.h.bf16 %v3562_v50  ;;  %v3563_v57 = vunpack.i.l.bf16 %v3562_v50 }
 0x1f1   : > { %v1348_v58 = vsel %vm823_vm3, %v3549_v26, %v1346_v52  ;;  %v1467_v59 = vsel %vm940_vm1, %v3544_v40, %v1465_v53 }
 0x1f2   : > { %v1352_v60 = vsel %vm805_vm5, %v1348_v58, 0.0  ;;  %v1471_v61 = vsel %vm927_vm9, %v1467_v59, 0.0  ;;  %v1647_v2 = vsel %vm1093_vm12, %v3563_v57, %v3564_v55 }
 0x1f3   : > { %v1356_v62 = vpack.c.bf16 %v1352_v60, %v1352_v60  ;;  %v1476_v63 = vpack.c.bf16 %v1471_v61, %v1471_v61  ;;  %v1651_v8 = vsel %vm926_vm2, %v1647_v2, 0.0  ;;  %v3459_v61 = vld [vmem:[%s4625_s29 + $0x30] sm:$0xff]  ;;  %v1893_v2 = vshra.s32 %v3806_v21, 3 }
 0x1f4   : > { %1610 = vmatpush.bf16.msrb.mxu2 %v1598_v54  ;;  %v1656_v20 = vpack.c.bf16 %v1651_v8, %v1651_v8 }
 0x1f5   : > { %v1430_v3 = vsel %vm1383_vm6, %v1356_v62, 0  ;;  %v1489_v4 = vsel %vm1383_vm6, %v1476_v63, 0  ;;  %v3460_v62 = vld [vmem:[%s4625_s29 + $0x38] sm:$0xff]  ;;  %v3461_v63 = vld [vmem:[%s4625_s29 + $0x40] sm:$0xff] }
 0x1f6   : > { %1453 = vmatpush.bf16.msrb.mxu1 %v1430_v3  ;;  %1512 = vmatpush.bf16.msra.mxu3 %v1489_v4  ;;  %v1667_v32 = vsel %vm1383_vm6, %v1656_v20, 0  ;;  %v4084_v3 = vand.u32 7, %v3806_v21  ;;  %v1895_v4 = vmul.u32 32, %v1893_v2 }
 0x1f7   : > { %v1835_v40 = vpop.permute.xlu2 %1834 }
 0x1f8   : > { %v3557_v6 = vpop.permute.xlu0 %3556  ;;  %v3552_v7 = vpop.permute.xlu1 %3551 }
 0x1f9   : > { %v3559_v9 = vunpack.i.h.bf16 %v3557_v6  ;;  %v3558_v10 = vunpack.i.l.bf16 %v3557_v6  ;;  %v3554_v11 = vunpack.i.h.bf16 %v3552_v7  ;;  %v3553_v12 = vunpack.i.l.bf16 %v3552_v7  ;;  %3216 = vmatmul.msk.bf16.vlgmr.msrb.gmra.mxu1 %vm1379_vm8, %v3453_v36 }
 0x1fa   : > { %1624 = vmatpush.bf16.msrb.mxu3 %v1601_v5  ;;  %v1896_v5 = vmul.u32 2, %v4084_v3  ;;  %v4088_v6 = vshrl.u32 %v787_v1, 7 }
 0x1fb   : > { %v1710_v14 = vsel %vm1147_vm11, %v3558_v10, %v3559_v9  ;;  %v1530_v16 = vsel %vm994_vm10, %v3554_v11, %v1528_v37  ;;  %v1529_v17 = vsel %vm994_vm10, %v3553_v12, %v3554_v11 }
 0x1fc   : > { %v1533_v18 = vsel %vm804_vm4, %v1529_v17, 0.0  ;;  %v1534_v19 = vsel %vm805_vm5, %v1530_v16, 0.0  ;;  %v1714_v15 = vsel %vm804_vm4, %v1710_v14, 0.0  ;;  %v4092_v8 = vadd.s32 %v1896_v5, %v1895_v4 }
 0x1fd   : > { %v1538_v22 = vpack.c.bf16 %v1533_v18, %v1533_v18  ;;  %v1539_v0 = vpack.c.bf16 %v1534_v19, %v1534_v19  ;;  %v1719_v23 = vpack.c.bf16 %v1714_v15, %v1714_v15  ;;  %v1914_v11 = vadd.s32 120, %v4088_v6 }
 0x1fe   : > { %3223 = vmatmul.msk.bf16.vlgmr.msra.gmra.mxu2 %vm1379_vm8, %v3455_v13  ;;  %3224 = vmatmul.msk.bf16.vlgmr.msra.gmra.mxu3 %vm1379_vm8, %v3455_v13  ;;  %v1930_v12 = vadd.s32 248, %v4088_v6  ;;  %v1913_v13 = vadd.s32 112, %v4088_v6  ;;  %v1929_v1 = vadd.s32 240, %v4088_v6  ;;  %v3621_v16 = vmov 1.0  }
 0x1ff   : > { %v1549_v24 = vsel %vm1383_vm6, %v1538_v22, 0  ;;  %v1552_v25 = vsel %vm1383_vm6, %v1539_v0, 0  ;;  %v1730_v26 = vsel %vm1383_vm6, %v1719_v23, 0  ;;  %v1786_v52 = vpop.permute.xlu2 %1785  ;;  %vm1946_vm1 = vcmp.eq.s32.totalorder %v1914_v11, %v4092_v8 }
 0x200   : > { %v1646_v29 = vpop.permute.xlu0 %1645  ;;  %v1709_v31 = vpop.permute.xlu1 %1708  ;;  %1561 = vmatpush.bf16.msra.mxu0 %v1549_v24  ;;  %1575 = vmatpush.bf16.msra.mxu1 %v1552_v25  ;;  %vm1945_vm3 = vcmp.eq.s32.totalorder %v1913_v13, %v4092_v8  ;;  %vm1961_vm4 = vcmp.eq.s32.totalorder %v1929_v1, %v4092_v8  ;;  %v1912_v17 = vadd.s32 104, %v4088_v6  ;;  %v1928_v18 = vadd.s32 232, %v4088_v6 }
 0x201   : > { %v1648_v34 = vsel %vm1093_vm12, %v3564_v55, %v1646_v29  ;;  %v1711_v35 = vsel %vm1147_vm11, %v3559_v9, %v1709_v31  ;;  %1742 = vmatpush.bf16.msra.mxu2 %v1730_v26  ;;  %v1911_v20 = vadd.s32 96, %v4088_v6  ;;  %v1927_v22 = vadd.s32 224, %v4088_v6 }
 0x202   : > { %v1652_v36 = vsel %vm927_vm9, %v1648_v34, 0.0  ;;  %v1715_v37 = vsel %vm805_vm5, %v1711_v35, 0.0  ;;  %vm1944_vm5 = vcmp.eq.s32.totalorder %v1912_v17, %v4092_v8  ;;  %v1910_v23 = vadd.s32 88, %v4088_v6 }
 0x203   : > { %v1657_v38 = vpack.c.bf16 %v1652_v36, %v1652_v36  ;;  %v1720_v39 = vpack.c.bf16 %v1715_v37, %v1715_v37  ;;  %3231 = vmatmul.msk.bf16.vlgmr.msra.gmra.mxu0 %vm1379_vm8, %v3456_v27  ;;  %vm1943_vm11 = vcmp.eq.s32.totalorder %v1911_v20, %v4092_v8  ;;  %vm1959_vm12 = vcmp.eq.s32.totalorder %v1927_v22, %v4092_v8 }
 0x204   : > { %1679 = vmatpush.bf16.msrb.mxu0 %v1667_v32  ;;  %v1926_v24 = vadd.s32 216, %v4088_v6  ;;  %v1909_v25 = vadd.s32 80, %v4088_v6  ;;  %v1925_v26 = vadd.s32 208, %v4088_v6  ;;  %v1908_v29 = vadd.s32 72, %v4088_v6 }
 0x205   : > { %v1670_v41 = vsel %vm1383_vm6, %v1657_v38, 0  ;;  %v1733_v42 = vsel %vm1383_vm6, %v1720_v39, 0  ;;  %v1924_v31 = vadd.s32 200, %v4088_v6  ;;  %v1907_v35 = vadd.s32 64, %v4088_v6 }
 0x206   : > { %1693 = vmatpush.bf16.msrb.mxu1 %v1670_v41  ;;  %1756 = vmatpush.bf16.msra.mxu3 %v1733_v42  ;;  %vm1941_vm15 = vcmp.eq.s32.totalorder %v1909_v25, %v4092_v8  ;;  %vm1957_vm0 = vcmp.eq.s32.totalorder %v1925_v26, %v4092_v8  ;;  %v1923_v36 = vadd.s32 192, %v4088_v6  ;;  %v4161_v38 = vadd.s32 56, %v4088_v6 }
 0x207   : > { %v1922_v39 = vadd.s32 184, %v4088_v6  ;;  %v1921_v41 = vadd.s32 176, %v4088_v6 }
 0x208   : > { %v3567_v43 = vpop.permute.xlu1 %3566  ;;  %v1782_v55 = vpop.permute.xlu0 %1781 }
 0x209   : > { %v3569_v44 = vunpack.i.h.bf16 %v3567_v43  ;;  %v3568_v45 = vunpack.i.l.bf16 %v3567_v43  ;;  %3232 = vmatmul.msk.bf16.vlgmr.msra.gmra.mxu1 %vm1379_vm8, %v3456_v27  ;;  %v4181_v43 = vadd.s32 40, %v4088_v6 }
 0x20b   : > { %v1837_v46 = vsel %vm1255_vm14, %v3569_v44, %v1835_v40  ;;  %v1836_v47 = vsel %vm1255_vm14, %v3568_v45, %v3569_v44  ;;  %vm1958_vm14 = vcmp.eq.s32.totalorder %v1926_v24, %v4092_v8  ;;  %v4170_v40 = vadd.s32 48, %v4088_v6 }
 0x20c   : > { %v1840_v48 = vsel %vm926_vm2, %v1836_v47, 0.0  ;;  %v1841_v49 = vsel %vm927_vm9, %v1837_v46, 0.0  ;;  %vm1962_vm2 = vcmp.eq.s32.totalorder %v1930_v12, %v4092_v8  ;;  %vm1960_vm9 = vcmp.eq.s32.totalorder %v1928_v18, %v4092_v8  ;;  %v2101_v12 = vld [vmem:[%s4626_s10] sm:$0xff] }
 0x20d   : > { %v1845_v50 = vpack.c.bf16 %v1840_v48, %v1840_v48  ;;  %v1846_v51 = vpack.c.bf16 %v1841_v49, %v1841_v49  ;;  %v1920_v44 = vadd.s32 168, %v4088_v6  ;;  %v4191_v46 = vadd.s32 32, %v4088_v6 }
 0x20e   : > { %3239 = vmatmul.msk.bf16.vlgmr.msrb.gmra.mxu2 %vm1379_vm8, %v3457_v30  ;;  %3240 = vmatmul.msk.bf16.vlgmr.msrb.gmra.mxu3 %vm1379_vm8, %v3457_v30  ;;  %v1919_v47 = vadd.s32 160, %v4088_v6  ;;  %v4201_v48 = vadd.s32 24, %v4088_v6  ;;  %v1918_v49 = vadd.s32 152, %v4088_v6 }
 0x20f   : > { %v1856_v53 = vsel %vm1383_vm6, %v1845_v50, 0  ;;  %v1859_v54 = vsel %vm1383_vm6, %v1846_v51, 0  ;;  %v4210_v51 = vadd.s32 16, %v4088_v6 }
 0x210   : > { %v1784_v57 = vpop.permute.xlu1 %1783  ;;  %1868 = vmatpush.bf16.msrb.mxu2 %v1856_v53  ;;  %1882 = vmatpush.bf16.msrb.mxu3 %v1859_v54  ;;  %v4219_v54 = vadd.s32 8, %v4088_v6 }
 0x211   : > { %v1787_v56 = vsel %vm1209_vm13, %v1782_v55, %v1784_v57  ;;  %v1788_v58 = vsel %vm1209_vm13, %v1784_v57, %v1786_v52  ;;  %vm1942_vm13 = vcmp.eq.s32.totalorder %v1910_v23, %v4092_v8  ;;  %v1917_v52 = vadd.s32 144, %v4088_v6 }
 0x212   : > { %v1793_v59 = vsel %vm1383_vm6, %v1787_v56, 0  ;;  %v1796_v60 = vsel %vm1383_vm6, %v1788_v58, 0  ;;  %v1916_v55 = vadd.s32 136, %v4088_v6  ;;  %v1915_v56 = vadd.s32 128, %v4088_v6 }
 0x213   : > { %1805 = vmatpush.bf16.msra.mxu0 %v1793_v59  ;;  %1819 = vmatpush.bf16.msra.mxu1 %v1796_v60 }
 0x214   : > { %3247 = vmatmul.msk.bf16.vlgmr.msrb.gmra.mxu0 %vm1379_vm8, %v3458_v28 }
 0x217   : > { %3273 = vmatpush.msk.msrb.mxu0 %vm1946_vm1, %v3621_v16  ;;  %vm1940_vm1 = vcmp.eq.s32.totalorder %v1908_v29, %v4092_v8 }
 0x219   : > { %3248 = vmatmul.msk.bf16.vlgmr.msrb.gmra.mxu1 %vm1379_vm8, %v3458_v28  ;;  %3274 = vmatpush.msk.msrb.mxu0 %vm1945_vm3, %v3621_v16  ;;  %vm1939_vm3 = vcmp.eq.s32.totalorder %v1907_v35, %v4092_v8 }
 0x21a   : > { %3289 = vmatpush.msk.msrb.mxu1 %vm1962_vm2, %v3621_v16  ;;  %vm1956_vm2 = vcmp.eq.s32.totalorder %v1924_v31, %v4092_v8 }
 0x21b   : > { %3275 = vmatpush.msk.msrb.mxu0 %vm1944_vm5, %v3621_v16  ;;  %vm1938_vm5 = vcmp.eq.s32.totalorder %v4161_v38, %v4092_v8 }
 0x21c   : > { %3290 = vmatpush.msk.msrb.mxu1 %vm1961_vm4, %v3621_v16  ;;  %vm1955_vm4 = vcmp.eq.s32.totalorder %v1923_v36, %v4092_v8 }
 0x21d   : > { %3276 = vmatpush.msk.msrb.mxu0 %vm1943_vm11, %v3621_v16  ;;  %vm1937_vm11 = vcmp.eq.s32.totalorder %v4170_v40, %v4092_v8 }
 0x21e   : > { %3255 = vmatmul.msk.bf16.vlgmr.msra.gmra.mxu2 %vm1379_vm8, %v3459_v61  ;;  %3256 = vmatmul.msk.bf16.vlgmr.msra.gmra.mxu3 %vm1379_vm8, %v3459_v61 }
 0x21f   : > { %3291 = vmatpush.msk.msrb.mxu1 %vm1960_vm9, %v3621_v16  ;;  %3277 = vmatpush.msk.msrb.mxu0 %vm1942_vm13, %v3621_v16  ;;  %vm1954_vm9 = vcmp.eq.s32.totalorder %v1922_v39, %v4092_v8  ;;  %vm1936_vm13 = vcmp.eq.s32.totalorder %v4181_v43, %v4092_v8 }
 0x221   : > { %3292 = vmatpush.msk.msrb.mxu1 %vm1959_vm12, %v3621_v16  ;;  %3278 = vmatpush.msk.msrb.mxu0 %vm1941_vm15, %v3621_v16  ;;  %vm1953_vm12 = vcmp.eq.s32.totalorder %v1921_v41, %v4092_v8  ;;  %vm1935_vm15 = vcmp.eq.s32.totalorder %v4191_v46, %v4092_v8 }
 0x223   : > { %3293 = vmatpush.msk.msrb.mxu1 %vm1958_vm14, %v3621_v16  ;;  %3279 = vmatpush.msk.msrb.mxu0 %vm1940_vm1, %v3621_v16  ;;  %vm1952_vm14 = vcmp.eq.s32.totalorder %v1920_v44, %v4092_v8  ;;  %vm1934_vm1 = vcmp.eq.s32.totalorder %v4201_v48, %v4092_v8 }
 0x224   : > { %3263 = vmatmul.msk.bf16.vlgmr.msra.gmra.mxu0 %vm1379_vm8, %v3460_v62 }
 0x225   : > { %3294 = vmatpush.msk.msrb.mxu1 %vm1957_vm0, %v3621_v16  ;;  %3280 = vmatpush.msk.msrb.mxu0 %vm1939_vm3, %v3621_v16  ;;  %vm1951_vm0 = vcmp.eq.s32.totalorder %v1919_v47, %v4092_v8  ;;  %vm1933_vm3 = vcmp.eq.s32.totalorder %v4210_v51, %v4092_v8 }
 0x227   : > { %3295 = vmatpush.msk.msrb.mxu1 %vm1956_vm2, %v3621_v16  ;;  %3281 = vmatpush.msk.msrb.mxu0 %vm1938_vm5, %v3621_v16  ;;  %vm1950_vm2 = vcmp.eq.s32.totalorder %v1918_v49, %v4092_v8  ;;  %vm1932_vm5 = vcmp.eq.s32.totalorder %v4219_v54, %v4092_v8 }
 0x229   : > { %3264 = vmatmul.msk.bf16.vlgmr.msra.gmra.mxu1 %vm1379_vm8, %v3460_v62  ;;  %3282 = vmatpush.msk.msrb.mxu0 %vm1937_vm11, %v3621_v16  ;;  %vm1931_vm11 = vcmp.eq.s32.totalorder %v4088_v6, %v4092_v8  ;;  %v2055_v62 = vld [vmem:[%s4623_s2] sm:$0xff]  ;;  %s3482_s2 = smul.u32 24, %s4631_s26 }
 0x22a   : > { %3296 = vmatpush.msk.msrb.mxu1 %vm1955_vm4, %v3621_v16  ;;  %vm1949_vm4 = vcmp.eq.s32.totalorder %v1917_v52, %v4092_v8  ;;  %2059 = vperm.xlu2 %3570, %v2055_v62  }
 0x22b   : > { %3283 = vmatpush.msk.msrb.mxu0 %vm1936_vm13, %v3621_v16 }
 0x22c   : > { %3297 = vmatpush.msk.msrb.mxu1 %vm1954_vm9, %v3621_v16  ;;  %vm1948_vm9 = vcmp.eq.s32.totalorder %v1916_v55, %v4092_v8 }
 0x22d   : > { %3284 = vmatpush.msk.msrb.mxu0 %vm1935_vm15, %v3621_v16 }
 0x22e   : > { %3271 = vmatmul.msk.bf16.vlgmr.msrb.gmra.mxu2 %vm1379_vm8, %v3461_v63  ;;  %3272 = vmatmul.msk.bf16.vlgmr.msrb.gmra.mxu3 %vm1379_vm8, %v3461_v63 }
 0x22f   : > { %3298 = vmatpush.msk.msrb.mxu1 %vm1953_vm12, %v3621_v16  ;;  %3285 = vmatpush.msk.msrb.mxu0 %vm1934_vm1, %v3621_v16  ;;  %vm1947_vm12 = vcmp.eq.s32.totalorder %v1915_v56, %v4092_v8  ;;  %vm2135_vm1 = vcmask 72704  }
 0x231   : > { %3299 = vmatpush.msk.msrb.mxu1 %vm1952_vm14, %v3621_v16  ;;  %3286 = vmatpush.msk.msrb.mxu0 %vm1933_vm3, %v3621_v16 }
 0x232   : > { %2104 = vperm.xlu2 %3570, %v2101_v12  }
 0x233   : > { %3300 = vmatpush.msk.msrb.mxu1 %vm1951_vm0, %v3621_v16  ;;  %3287 = vmatpush.msk.msrb.mxu0 %vm1932_vm5, %v3621_v16  ;;  %vm2119_vm0 = vcmask 523264  }
 0x235   : > { %3301 = vmatpush.msk.msrb.mxu1 %vm1950_vm2, %v3621_v16  ;;  %3288 = vmatpush.msk.msrb.mxu0 %vm1931_vm11, %v3621_v16 }
 0x237   : > { %3302 = vmatpush.msk.msrb.mxu1 %vm1949_vm4, %v3621_v16  ;;  %vm2215_vm4 = vcmask 56320  }
 0x239   : > { %3303 = vmatpush.msk.msrb.mxu1 %vm1948_vm9, %v3621_v16 }
 0x23b   : > { %3304 = vmatpush.msk.msrb.mxu1 %vm1947_vm12, %v3621_v16 }
 0x267   : > { %v4090_v7 = vpop.f32.mrf.mxu0 }
 0x26f   : > { %v4121_v0 = vpop.f32.mrf.mxu0 }
 0x271   : > { %v4094_v9 = vpop.f32.mrf.mxu2  ;;  %v4096_v10 = vpop.f32.mrf.mxu3 }
 0x272   : > { %v1442_v63 = vadd.f32 %v4090_v7, %v4094_v9 }
 0x276   : > { %v4104_v14 = vpop.f32.mrf.mxu1 }
 0x277   : > { %v1456_v13 = vadd.f32 %v4104_v14, %v4096_v10 }
 0x279   : > { %v4114_v19 = vpop.f32.mrf.mxu2  ;;  %v4116_v15 = vpop.f32.mrf.mxu3 }
 0x27a   : > { %v1444_v17 = vadd.f32 %v4121_v0, %v4114_v19 }
 0x27e   : > { %v4136_v27 = vpop.f32.mrf.mxu1 }
 0x27f   : > { %v1458_v10 = vadd.f32 %v4136_v27, %v4116_v15 }
 0x280   : > { %v4153_v37 = vpop.f32.mrf.mxu0 }
 0x281   : > { %v4145_v32 = vpop.f32.mrf.mxu2  ;;  %v4147_v34 = vpop.f32.mrf.mxu3 }
 0x282   : > { %v1519_v2 = vadd.f32 %v4145_v32, %v1442_v63  ;;  %v1520_v7 = vadd.f32 %v4147_v34, %v1456_v13 }
 0x284   : > { %v1582_v1 = vadd.f32 %v4153_v37, %v1519_v2  ;;  %v2060_v63 = vpop.permute.xlu2 %2059 }
 0x286   : > { %v4173_v42 = vpop.f32.mrf.mxu1 }
 0x287   : > { %v1583_v18 = vadd.f32 %v4173_v42, %v1520_v7 }
 0x288   : > { %v1565_v50 = vpop.f32.mrf.mxu0 }
 0x289   : > { %v1502_v45 = vpop.f32.mrf.mxu2  ;;  %v4185_v30 = vpop.f32.mrf.mxu3 }
 0x28a   : > { %v1521_v20 = vadd.f32 %v1502_v45, %v1444_v17  ;;  %v1522_v19 = vadd.f32 %v4185_v30, %v1458_v10 }
 0x28c   : > { %v1584_v14 = vadd.f32 %v1565_v50, %v1521_v20 }
 0x28e   : > { %v1579_v53 = vpop.f32.mrf.mxu1 }
 0x28f   : > { %v1585_v35 = vadd.f32 %v1579_v53, %v1522_v19  ;;  %v3601_v19 = vld [vmem:[#allocation2 + $0x20] sm:$0xff] }
 0x291   : > { %v1612_v57 = vpop.f32.mrf.mxu2  ;;  %v1626_v28 = vpop.f32.mrf.mxu3 }
 0x292   : > { %v1681_v58 = vpop.f32.mrf.mxu0  ;;  %v1631_v9 = vadd.f32 %v1612_v57, %v1582_v1  ;;  %v1632_v24 = vadd.f32 %v1626_v28, %v1583_v18 }
 0x294   : > { %v1700_v25 = vadd.f32 %v1681_v58, %v1631_v9 }
 0x296   : > { %v1695_v59 = vpop.f32.mrf.mxu1 }
 0x297   : > { %v1701_v31 = vadd.f32 %v1695_v59, %v1632_v24 }
 0x299   : > { %v1614_v60 = vpop.f32.mrf.mxu2  ;;  %v1628_v61 = vpop.f32.mrf.mxu3 }
 0x29a   : > { %v1683_v4 = vpop.f32.mrf.mxu0  ;;  %v1633_v0 = vadd.f32 %v1614_v60, %v1584_v14  ;;  %v1634_v42 = vadd.f32 %v1628_v61, %v1585_v35  ;;  %v2046_v61 = vpop.permute.xlu0 %2045 }
 0x29c   : > { %v1702_v44 = vadd.f32 %v1683_v4, %v1633_v0 }
 0x29e   : > { %v1697_v5 = vpop.f32.mrf.mxu1 }
 0x29f   : > { %v1703_v49 = vadd.f32 %v1697_v5, %v1634_v42 }
 0x2a1   : > { %v1744_v8 = vpop.f32.mrf.mxu2  ;;  %v1758_v11 = vpop.f32.mrf.mxu3 }
 0x2a2   : > { %v1807_v26 = vpop.f32.mrf.mxu0  ;;  %v1763_v32 = vadd.f32 %v1744_v8, %v1700_v25  ;;  %v1764_v34 = vadd.f32 %v1758_v11, %v1701_v31  ;;  %v2051_v11 = vpop.permute.xlu1 %2050 }
 0x2a3   : > { %v2065_v13 = vpop.permute.xlu0 %2064 }
 0x2a4   : > { %v1826_v36 = vadd.f32 %v1807_v26, %v1763_v32  ;;  %v2105_v26 = vpop.permute.xlu2 %2104 }
 0x2a6   : > { %v1821_v29 = vpop.f32.mrf.mxu1 }
 0x2a7   : > { %v1827_v37 = vadd.f32 %v1821_v29, %v1764_v34 }
 0x2a9   : > { %v1746_v22 = vpop.f32.mrf.mxu2  ;;  %v1760_v23 = vpop.f32.mrf.mxu3 }
 0x2aa   : > { %v1765_v52 = vadd.f32 %v1746_v22, %v1702_v44  ;;  %v1809_v15 = vpop.f32.mrf.mxu0  ;;  %v1766_v50 = vadd.f32 %v1760_v23, %v1703_v49  ;;  %v2075_v22 = vld [vmem:[%s4627_s0] sm:$0xf]  ;;  %v2098_v23 = vpop.permute.xlu1 %2097  ;;  %s3626_s0 = smov 120   ;;  %v2952_v49 = vld [vmem:[%s4577_s18 + $0x8] sm:$0xff] }
 0x2ac   : > { %v1828_v55 = vadd.f32 %v1809_v15, %v1765_v52  ;;  %v2528_v52 = vld [vmem:[%s4574_s15 + $0x8] sm:$0xff]  ;;  %v2527_v15 = vld [vmem:[%s4574_s15] sm:$0xff] }
 0x2ae   : > { %v1823_v27 = vpop.f32.mrf.mxu1 }
 0x2af   : > { %v1829_v30 = vadd.f32 %v1823_v27, %v1766_v50  ;;  %v2966_v27 = vld [vmem:[%s4578_s19 + $0x8] sm:$0xff] }
 0x2b0   : > { %v2549_v50 = vld [vmem:[%s4575_s16 + $0x8] sm:$0xff] }
 0x2b1   : > { %v1870_v39 = vpop.f32.mrf.mxu2  ;;  %v1884_v41 = vpop.f32.mrf.mxu3 }
 0x2b2   : > { %v1889_v45 = vadd.f32 %v1870_v39, %v1826_v36  ;;  %v1890_v47 = vadd.f32 %v1884_v41, %v1827_v37  ;;  %v2455_v36 = vld [vmem:[%s4571_s12] sm:$0xff]  ;;  %v2470_v37 = vld [vmem:[%s4572_s13 + $0x8] sm:$0xff] }
 0x2b3   : > { %v2469_v39 = vld [vmem:[%s4572_s13] sm:$0xff]  ;;  %v2456_v41 = vld [vmem:[%s4571_s12 + $0x8] sm:$0xff] }
 0x2b4   : > { %2011 = vmatmul.f32.vlgmr.msrb.gmra.mxu0 %v1889_v45  ;;  %2034 = vmatmul.f32.vlgmr.msrb.gmra.mxu1 %v1890_v47  ;;  %v2965_v47 = vld [vmem:[%s4578_s19] sm:$0xff] }
 0x2b9   : > { %v1872_v57 = vpop.f32.mrf.mxu2  ;;  %v1886_v28 = vpop.f32.mrf.mxu3 }
 0x2ba   : > { %v1891_v53 = vadd.f32 %v1872_v57, %v1828_v55  ;;  %v1892_v56 = vadd.f32 %v1886_v28, %v1829_v30  ;;  %v2548_v55 = vld [vmem:[%s4575_s16] sm:$0xff]  ;;  %v2529_v30 = vld [vmem:[%s4574_s15 + $0x10] sm:$0x1f]  ;;  %v3022_v28 = vld [vmem:[%s4580_s21 + $0x8] sm:$0xff] }
 0x2bb   : > { %v3023_v57 = vld [vmem:[%s4580_s21 + $0x10] sm:$0x1f] }
 0x2bc   : > { %2014 = vmatmul.f32.gmra.mxu0 %v1891_v53  ;;  %2037 = vmatmul.f32.gmra.mxu1 %v1892_v56  ;;  %v3021_v53 = vld [vmem:[%s4580_s21] sm:$0xff]  ;;  %v3043_v56 = vld [vmem:[%s4581_s22 + $0x8] sm:$0xff] }
 0x331   : > { %v2012_v58 = vpop.f32.mrf.mxu0  ;;  %v2035_v59 = vpop.f32.mrf.mxu1 }
 0x332   : > { %v2036_v60 = vadd.f32 %v2035_v59, %v2012_v58  ;;  %v3042_v58 = vld [vmem:[%s4581_s22] sm:$0xff]  ;;  %v2550_v59 = vld [vmem:[%s4575_s16 + $0x10] sm:$0x1f] }
 0x334   : > { %v2053_v62 = vmul.f32 %v2046_v61, %v2036_v60  ;;  %v4341_v60 = vadd.s32 4294967295, %v4084_v3 }
 0x336   : > { %v2067_v5 = vadd.f32 %v2060_v63, %v2053_v62  ;;  %vm2124_vm2 = vcmp.ge.s32.totalorder %v4341_v60, 0  ;;  %v3480_v60 = vld [vmem:[%s4576_s17 + $0x40] sm:$0xff] }
 0x338   : > { %v2071_v1 = vmul.f32 0.1, %v2067_v5  ;;  %vm2069_vm13 = vcmp.gt.f32.partialorder %v2067_v5, 0.0 }
 0x339   : > { %v2015_v2 = vpop.f32.mrf.mxu0  ;;  %v2038_v4 = vpop.f32.mrf.mxu1 }
 0x33a   : > { %v2039_v8 = vadd.f32 %v2038_v4, %v2015_v2  ;;  %v4254_v9 = vsel %vm2069_vm13, %v2067_v5, %v2071_v1  ;;  %v4345_v2 = vadd.s32 1, %v4084_v3  ;;  %v3044_v5 = vld [vmem:[%s4581_s22 + $0x10] sm:$0x1f]  ;;  %v3462_v3 = vld [vmem:[%s4570_s11] sm:$0xff] }
 0x33c   : > { %v2054_v12 = vmul.f32 %v2051_v11, %v2039_v8  ;;  %vm2207_vm3 = vcmp.lt.s32.totalorder %v4345_v2, 8 }
 0x33e   : > { %v2068_v17 = vadd.f32 %v2065_v13, %v2054_v12 }
 0x340   : > { %vm2070_vm14 = vcmp.gt.f32.partialorder %v2068_v17, 0.0  ;;  %v2072_v7 = vmul.f32 0.1, %v2068_v17 }
 0x342   : > { %v4256_v18 = vsel %vm2070_vm14, %v2068_v17, %v2072_v7 }
 0x343   : > { %v2076_v20 = vpack.c.bf16 %v4256_v18, %v4254_v9 }
 0x345   : > { %2088 = vmatpush.bf16.msra.mxu2 %v2076_v20  ;;  %v2155_v20 = vpop.permute.xlu0 %2154 }
 0x348   : > { %3305 = vmatmul.msk.bf16.vlgmr.msra.gmra.mxu2 %vm847_vm7, %v2075_v22  ;;  %v3466_v22 = vld [vmem:[%s4570_s11 + $0x20] sm:$0xff] }
 0x3cb   : > { %v2090_v24 = vpop.f32.mrf.mxu2 }
 0x3cc   : > { %v2100_v25 = vmul.f32 %v2098_v23, %v2090_v24  ;;  %v3467_v24 = vld [vmem:[%s4570_s11 + $0x28] sm:$0xff] }
 0x3ce   : > { %v2107_v29 = vadd.f32 %v2105_v26, %v2100_v25 }
 0x3d0   : > { %vm2108_vm15 = vcmp.gt.f32.partialorder %v2107_v29, 0.0  ;;  %v2109_v10 = vmul.f32 0.1, %v2107_v29 }
 0x3d2   : > { %v2110_v14 = vsel %vm2108_vm15, %v2107_v29, %v2109_v10 }
 0x3d3   : > { %2120 = vst.msk [vmem:[#allocation2 + $0x8] sm:$0xff] %vm2119_vm0, %v2110_v14  ;;  %v2092_v31 = vpop.f32.mrf.mxu2 }
 0x3da   : > { %v2122_v32 = vld [vmem:[#allocation2 + $0x8] sm:$0xff] }
 0x3db   : > { %2574 = vst [vmem:[#allocation2 + $0x8] sm:$0xff] %v3601_v19  ;;  %v3576_v0 = vpack.i.bf16 %v2122_v32, %v3601_v19  ;;  %v2146_v34 = vpack.c.bf16 %v2122_v32, %v2122_v32 }
 0x3dc   : > { %2581 = vst.msk [vmem:[#allocation2 + $0x8] sm:$0xff] %vm2119_vm0, %v2110_v14 }
 0x3dd   : > { %3577 = vrot.lane.b32.xlu0 %v3576_v0, %s4596_s8  ;;  %3572 = vrot.lane.b32.xlu2 %v3576_v0, %s3624_s3  ;;  %v2300_v35 = vsel %vm1383_vm6, %v2146_v34, 0  ;;  %s3627_s8 = smov 119  }
 0x3de   : > { %2156 = vrot.lane.b32.xlu1 %v2146_v34, %s4598_s7  ;;  %2309 = vmatpush.bf16.msra.mxu1 %v2300_v35 }
 0x3e1   : > { %3338 = vmatmul.msk.bf16.vlgmr.msra.gmra.mxu1 %vm1379_vm8, %v3466_v22 }
 0x3e3   : > { %v2583_v42 = vld [vmem:[#allocation2 + $0x8] sm:$0xff] }
 0x3e4   : > { %v3586_v44 = vpack.i.bf16 %v2583_v42, %v3601_v19  ;;  %v4285_v45 = vpack.c.bf16 %v2583_v42, %v2583_v42 }
 0x3e5   : > { %2353 = vrot.lane.b32.xlu0 %v2122_v32, %s3625_s4  ;;  %2318 = vrot.lane.b32.xlu2 %v2122_v32, %s4619_s6 }
 0x3e6   : > { %3582 = vrot.lane.b32.xlu1 %v3576_v0, %s4618_s27  ;;  %v3463_v0 = vld [vmem:[%s4570_s11 + $0x8] sm:$0xff] }
 0x3ed   : > { %2459 = vperm.xlu0 %3538, %v2455_v36   ;;  %2396 = vrot.lane.b32.xlu2 %v2146_v34, %s3626_s0 }
 0x3ee   : > { %2420 = vrot.lane.b32.xlu1 %v2122_v32, %s3627_s8 }
 0x3f5   : > { %2478 = vperm.xlu0 %3538, %v2470_v37   ;;  %2473 = vperm.xlu2 %3570, %v2469_v39  }
 0x3f6   : > { %2464 = vperm.xlu1 %3539, %v2456_v41  }
 0x3fd   : > { %3587 = vrot.lane.b32.xlu0 %v3586_v44, %s3624_s3  ;;  %2610 = vrot.lane.b32.xlu2 %v4285_v45, %s4628_s1  ;;  %s762_s3 = scalar_lea.vmem %s4582_s23, %s3482_s2 }
 0x3fe   : > { %2608 = vrot.lane.b32.xlu1 %v3620_v33, %s4628_s1  ;;  %v2951_v33 = vld [vmem:[%s4577_s18] sm:$0xff]  ;;  %s767_s1 = scalar_lea.vmem %s4583_s24, %s3482_s2 }
 0x405   : > { %2799 = vrot.lane.b32.xlu0 %v2583_v42, %s3625_s4  ;;  %3597 = vrot.lane.b32.xlu2 %v3586_v44, %s4629_s9 }
 0x406   : > { %3592 = vrot.lane.b32.xlu1 %v3586_v44, %s4618_s27 }
 0x40d   : > { %2866 = vrot.lane.b32.xlu0 %v2583_v42, %s3627_s8  ;;  %2842 = vrot.lane.b32.xlu2 %v4285_v45, %s3626_s0 }
 0x40e   : > { %2764 = vrot.lane.b32.xlu1 %v2583_v42, %s4619_s6 }
 0x415   : > { %2969 = vperm.xlu0 %3538, %v2965_v47   ;;  %2960 = vperm.xlu2 %3570, %v2952_v49  }
 0x416   : > { %2955 = vperm.xlu1 %3539, %v2951_v33  }
 0x41d   : > { %2537 = vperm.xlu0 %3538, %v2528_v52   ;;  %2532 = vperm.xlu2 %3570, %v2527_v15  }
 0x41e   : > { %2974 = vperm.xlu1 %3539, %v2966_v27  }
 0x425   : > { %2558 = vperm.xlu0 %3538, %v2549_v50   ;;  %2553 = vperm.xlu2 %3570, %v2548_v55  }
 0x426   : > { %2542 = vperm.xlu1 %3539, %v2529_v30  }
 0x42d   : > { %3036 = vperm.xlu0 %3538, %v3023_v57   ;;  %3031 = vperm.xlu2 %3570, %v3022_v28   ;;  %v3465_v57 = vld [vmem:[%s4570_s11 + $0x18] sm:$0xff] }
 0x42e   : > { %3026 = vperm.xlu1 %3539, %v3021_v53  }
 0x435   : > { %3052 = vperm.xlu0 %3538, %v3043_v56   ;;  %3047 = vperm.xlu2 %3570, %v3042_v58  }
 0x436   : > { %2563 = vperm.xlu1 %3539, %v2550_v59  }
 0x437   : > { %v3573_v61 = vpop.permute.xlu2 %3572 }
 0x438   : > { %v3575_v62 = vunpack.i.h.bf16 %v3573_v61  ;;  %v3574_v63 = vunpack.i.l.bf16 %v3573_v61 }
 0x43a   : > { %v2136_v4 = vsel %vm2135_vm1, %v3574_v63, %v3575_v62  ;;  %v3464_v63 = vld [vmem:[%s4570_s11 + $0x10] sm:$0xff] }
 0x43b   : > { %v2138_v8 = vsel %vm2124_vm2, %v2136_v4, 0.0 }
 0x43c   : > { %v2141_v11 = vpack.c.bf16 %v2138_v8, %v2138_v8 }
 0x43e   : > { %3057 = vperm.xlu1 %3539, %v3044_v5   ;;  %v2189_v12 = vsel %vm1383_vm6, %v2141_v11, 0  ;;  %v3470_v11 = vld [vmem:[%s4570_s11 + $0x40] sm:$0xff] }
 0x43f   : > { %v2319_v13 = vpop.permute.xlu2 %2318  ;;  %2198 = vmatpush.bf16.msrb.mxu2 %v2189_v12 }
 0x440   : > { %v2321_v1 = vsel %vm2207_vm3, %v2319_v13, 0.0 }
 0x441   : > { %v2325_v17 = vpack.c.bf16 %v2321_v1, %v2321_v1 }
 0x442   : > { %3317 = vmatmul.msk.bf16.vlgmr.msrb.gmra.mxu2 %vm1379_vm8, %v3462_v3 }
 0x443   : > { %v2335_v7 = vsel %vm1383_vm6, %v2325_v17, 0  ;;  %v3469_v17 = vld [vmem:[%s4570_s11 + $0x38] sm:$0xff] }
 0x444   : > { %2344 = vmatpush.bf16.msra.mxu2 %v2335_v7 }
 0x447   : > { %v2397_v23 = vpop.permute.xlu2 %2396 }
 0x448   : > { %v2402_v28 = vsel %vm1383_vm6, %v2397_v23, 0 }
 0x44f   : > { %v3578_v25 = vpop.permute.xlu0 %3577  ;;  %v4369_v26 = vpop.permute.xlu2 %2473 }
 0x450   : > { %v3580_v29 = vunpack.i.h.bf16 %v3578_v25  ;;  %v3579_v10 = vunpack.i.l.bf16 %v3578_v25  ;;  %v2157_v14 = vpop.permute.xlu1 %2156 }
 0x451   : > { %v2159_v31 = vsel %vm1379_vm8, %v2155_v20, %v2157_v14 }
 0x452   : > { %v2216_v32 = vsel %vm2215_vm4, %v3579_v10, %v3580_v29  ;;  %v2164_v19 = vsel %vm1383_vm6, %v2159_v31, 0  ;;  %3345 = vmatmul.msk.bf16.vlgmr.msra.gmra.mxu2 %vm1379_vm8, %v3467_v24  ;;  %v3468_v29 = vld [vmem:[%s4570_s11 + $0x30] sm:$0xff] }
 0x453   : > { %2173 = vmatpush.bf16.msra.mxu3 %v2164_v19  ;;  %v2218_v34 = vsel %vm2207_vm3, %v2216_v32, 0.0  ;;  %v2746_v19 = vsel %vm1383_vm6, %v4285_v45, 0 }
 0x454   : > { %v2222_v35 = vpack.c.bf16 %v2218_v34, %v2218_v34 }
 0x456   : > { %3312 = vmatmul.msk.bf16.vlgmr.msra.gmra.mxu3 %vm1379_vm8, %v3463_v0  ;;  %v2232_v36 = vsel %vm1383_vm6, %v2222_v35, 0 }
 0x457   : > { %v2354_v37 = vpop.permute.xlu0 %2353  ;;  %v2611_v39 = vpop.permute.xlu2 %2610  ;;  %2241 = vmatpush.bf16.msrb.mxu3 %v2232_v36 }
 0x458   : > { %v2356_v41 = vsel %vm2124_vm2, %v2354_v37, 0.0  ;;  %v3583_v42 = vpop.permute.xlu1 %3582 }
 0x459   : > { %v2360_v44 = vpack.c.bf16 %v2356_v41, %v2356_v41  ;;  %v3585_v47 = vunpack.i.h.bf16 %v3583_v42  ;;  %v3584_v49 = vunpack.i.l.bf16 %v3583_v42 }
 0x45b   : > { %v2370_v33 = vsel %vm1383_vm6, %v2360_v44, 0  ;;  %v2254_v52 = vsel %vm994_vm10, %v3584_v49, %v3585_v47  ;;  %v3472_v44 = vld [vmem:[%s4576_s17] sm:$0xff] }
 0x45c   : > { %2379 = vmatpush.bf16.msra.mxu3 %v2370_v33  ;;  %v2256_v15 = vsel %vm2124_vm2, %v2254_v52, 0.0 }
 0x45d   : > { %v2260_v27 = vpack.c.bf16 %v2256_v15, %v2256_v15  ;;  %v3473_v15 = vld [vmem:[%s4576_s17 + $0x8] sm:$0xff] }
 0x45f   : > { %v4388_v50 = vpop.permute.xlu0 %2459  ;;  %v3598_v55 = vpop.permute.xlu2 %3597  ;;  %v2270_v30 = vsel %vm1383_vm6, %v2260_v27, 0 }
 0x460   : > { %v3600_v53 = vunpack.i.h.bf16 %v3598_v55  ;;  %v3599_v56 = vunpack.i.l.bf16 %v3598_v55  ;;  %v2421_v58 = vpop.permute.xlu1 %2420  ;;  %2279 = vmatpush.bf16.msra.mxu0 %v2270_v30 }
 0x461   : > { %v2423_v59 = vsel %vm2207_vm3, %v2421_v58, 0.0  ;;  %v2311_v58 = vpop.f32.mrf.mxu1 }
 0x462   : > { %v2662_v61 = vsel %vm2215_vm4, %v3599_v56, %v3600_v53  ;;  %v2427_v62 = vpack.c.bf16 %v2423_v59, %v2423_v59 }
 0x463   : > { %3331 = vmatmul.msk.bf16.vlgmr.msra.gmra.mxu0 %vm1379_vm8, %v3465_v57  ;;  %v2664_v4 = vsel %vm2207_vm3, %v2662_v61, 0.0 }
 0x464   : > { %2411 = vmatpush.bf16.msrb.mxu0 %v2402_v28  ;;  %v2437_v5 = vsel %vm1383_vm6, %v2427_v62, 0  ;;  %v2668_v8 = vpack.c.bf16 %v2664_v4, %v2664_v4  ;;  %v3474_v4 = vld [vmem:[%s4576_s17 + $0x10] sm:$0xff] }
 0x465   : > { %2446 = vmatpush.bf16.msrb.mxu1 %v2437_v5 }
 0x466   : > { %3324 = vmatmul.msk.bf16.vlgmr.msrb.gmra.mxu3 %vm1379_vm8, %v3464_v63  ;;  %v2678_v12 = vsel %vm1383_vm6, %v2668_v8, 0 }
 0x467   : > { %v4410_v3 = vpop.permute.xlu0 %2478  ;;  %v2843_v27 = vpop.permute.xlu2 %2842 }
 0x468   : > { %v4412_v13 = vpop.permute.xlu1 %2464  ;;  %3366 = vmatmul.msk.bf16.vlgmr.msrb.gmra.mxu1 %vm1379_vm8, %v3470_v11  ;;  %v2848_v57 = vsel %vm1383_vm6, %v2843_v27, 0 }
 0x469   : > { %2687 = vmatpush.bf16.msra.mxu1 %v2678_v12  ;;  %v2313_v11 = vpop.f32.mrf.mxu1 }
 0x46f   : > { %v3588_v1 = vpop.permute.xlu0 %3587 }
 0x470   : > { %v3590_v7 = vunpack.i.h.bf16 %v3588_v1  ;;  %v3589_v20 = vunpack.i.l.bf16 %v3588_v1  ;;  %v2609_v22 = vpop.permute.xlu1 %2608 }
 0x471   : > { %v2612_v23 = vsel %vm1379_vm8, %v2609_v22, %v2611_v39 }
 0x472   : > { %v2590_v24 = vsel %vm2135_vm1, %v3589_v20, %v3590_v7  ;;  %v2617_v25 = vsel %vm1383_vm6, %v2612_v23, 0  ;;  %v3475_v7 = vld [vmem:[%s4576_s17 + $0x18] sm:$0xff]  ;;  %v3476_v23 = vld [vmem:[%s4576_s17 + $0x20] sm:$0xff]  ;;  %vm2571_vm1 = vcmask 520192  }
 0x473   : > { %2626 = vmatpush.bf16.msrb.mxu3 %v2617_v25  ;;  %3359 = vmatmul.msk.bf16.vlgmr.msrb.gmra.mxu0 %vm1379_vm8, %v3469_v17  ;;  %v2592_v10 = vsel %vm2124_vm2, %v2590_v24, 0.0 }
 0x474   : > { %v2595_v14 = vpack.c.bf16 %v2592_v10, %v2592_v10 }
 0x476   : > { %3352 = vmatmul.msk.bf16.vlgmr.msra.gmra.mxu3 %vm1379_vm8, %v3468_v29  ;;  %v2642_v31 = vsel %vm1383_vm6, %v2595_v14, 0 }
 0x477   : > { %v4429_v32 = vpop.permute.xlu0 %2799  ;;  %2651 = vmatpush.bf16.msra.mxu0 %v2642_v31  ;;  %v3477_v31 = vld [vmem:[%s4576_s17 + $0x28] sm:$0xff] }
 0x478   : > { %v3593_v0 = vpop.permute.xlu1 %3592  ;;  %3391 = vmatmul.msk.bf16.vlgmr.msra.gmra.mxu1 %vm1379_vm8, %v3474_v4 }
 0x479   : > { %v3595_v34 = vunpack.i.h.bf16 %v3593_v0  ;;  %v3594_v35 = vunpack.i.l.bf16 %v3593_v0 }
 0x47b   : > { %2755 = vmatpush.bf16.msrb.mxu0 %v2746_v19  ;;  %v2700_v36 = vsel %vm994_vm10, %v3594_v35, %v3595_v34 }
 0x47c   : > { %v2702_v37 = vsel %vm2124_vm2, %v2700_v36, 0.0 }
 0x47d   : > { %v2706_v39 = vpack.c.bf16 %v2702_v37, %v2702_v37 }
 0x47f   : > { %v2867_v41 = vpop.permute.xlu0 %2866  ;;  %v2716_v42 = vsel %vm1383_vm6, %v2706_v39, 0 }
 0x480   : > { %v2869_v45 = vsel %vm2207_vm3, %v2867_v41, 0.0  ;;  %v2765_v47 = vpop.permute.xlu1 %2764  ;;  %2725 = vmatpush.bf16.msra.mxu3 %v2716_v42 }
 0x481   : > { %v2873_v49 = vpack.c.bf16 %v2869_v45, %v2869_v45  ;;  %v2767_v33 = vsel %vm2207_vm3, %v2765_v47, 0.0 }
 0x482   : > { %v2771_v52 = vpack.c.bf16 %v2767_v33, %v2767_v33 }
 0x483   : > { %v2883_v55 = vsel %vm1383_vm6, %v2873_v49, 0  ;;  %3384 = vmatmul.msk.bf16.vlgmr.msra.gmra.mxu0 %vm1379_vm8, %v3472_v44 }
 0x484   : > { %v2781_v30 = vsel %vm1383_vm6, %v2771_v52, 0  ;;  %2892 = vmatpush.bf16.msra.mxu0 %v2883_v55  ;;  %v3479_v52 = vld [vmem:[%s4576_s17 + $0x38] sm:$0xff]  ;;  %v2802_v55 = vsel %vm2124_vm2, %v4429_v32, 0.0 }
 0x485   : > { %2790 = vmatpush.bf16.msrb.mxu1 %v2781_v30 }
 0x486   : > { %3379 = vmatmul.msk.bf16.vlgmr.msrb.gmra.mxu3 %vm1379_vm8, %v3473_v15 }
 0x487   : > { %2857 = vmatpush.bf16.msrb.mxu3 %v2848_v57 }
 0x488   : > { %3412 = vmatmul.msk.bf16.vlgmr.msrb.gmra.mxu1 %vm1379_vm8, %v3477_v31 }
 0x493   : > { %3405 = vmatmul.msk.bf16.vlgmr.msrb.gmra.mxu0 %vm1379_vm8, %v3476_v23 }
 0x496   : > { %3398 = vmatmul.msk.bf16.vlgmr.msra.gmra.mxu3 %vm1379_vm8, %v3475_v7 }
 0x4a3   : > { %3433 = vmatmul.msk.bf16.vlgmr.msra.gmra.mxu0 %vm1379_vm8, %v3480_v60 }
 0x4a6   : > { %3426 = vmatmul.msk.bf16.vlgmr.msrb.gmra.mxu3 %vm1379_vm8, %v3479_v52 }
 0x4c5   : > { %v2200_v28 = vpop.f32.mrf.mxu2 }
 0x4cd   : > { %v2202_v62 = vpop.f32.mrf.mxu2 }
 0x4d5   : > { %v2346_v17 = vpop.f32.mrf.mxu2 }
 0x4d9   : > { %v2175_v2 = vpop.f32.mrf.mxu3 }
 0x4da   : > { %v2201_v61 = vadd.f32 %v2200_v28, %v2175_v2  ;;  %v2806_v2 = vpack.c.bf16 %v2802_v55, %v2802_v55 }
 0x4dd   : > { %v2348_v35 = vpop.f32.mrf.mxu2 }
 0x4e0   : > { %v2281_v56 = vpop.f32.mrf.mxu0 }
 0x4e1   : > { %v2177_v53 = vpop.f32.mrf.mxu3 }
 0x4e2   : > { %v2203_v1 = vadd.f32 %v2202_v62, %v2177_v53  ;;  %v2901_v62 = vshra.s32 %v3806_v21, 2 }
 0x4e5   : > { %v2448_v19 = vpop.f32.mrf.mxu1 }
 0x4e8   : > { %v2283_v5 = vpop.f32.mrf.mxu0 }
 0x4e9   : > { %v2243_v59 = vpop.f32.mrf.mxu3 }
 0x4ea   : > { %v2248_v63 = vadd.f32 %v2243_v59, %v2201_v61  ;;  %v4498_v59 = vpop.permute.xlu1 %2955  ;;  %v4500_v61 = vpop.permute.xlu2 %2960 }
 0x4ec   : > { %v2286_v8 = vadd.f32 %v2281_v56, %v2248_v63  ;;  %v2902_v63 = vand.u32 3, %v3806_v21 }
 0x4ed   : > { %v2450_v49 = vpop.f32.mrf.mxu1 }
 0x4ee   : > { %v2316_v20 = vadd.f32 %v2311_v58, %v2286_v8  ;;  %v3478_v58 = vld [vmem:[%s4576_s17 + $0x30] sm:$0xff]  ;;  %v2904_v8 = vmul.u32 2, %v2902_v63 }
 0x4f0   : > { %v2351_v24 = vadd.f32 %v2346_v17, %v2316_v20  ;;  %v2413_v29 = vpop.f32.mrf.mxu0 }
 0x4f1   : > { %v2245_v12 = vpop.f32.mrf.mxu3 }
 0x4f2   : > { %v2249_v22 = vadd.f32 %v2245_v12, %v2203_v1  ;;  %v4504_v4 = vpop.permute.xlu1 %2974  ;;  %v2533_v1 = vpop.permute.xlu2 %2532 }
 0x4f4   : > { %v2287_v25 = vadd.f32 %v2283_v5, %v2249_v22  ;;  %v2903_v5 = vmul.u32 16, %v2901_v62 }
 0x4f5   : > { %v2689_v23 = vpop.f32.mrf.mxu1 }
 0x4f6   : > { %v2317_v0 = vadd.f32 %v2313_v11, %v2287_v25  ;;  %v4506_v11 = vpop.permute.xlu0 %2969  ;;  %v2905_v12 = vadd.s32 %v2904_v8, %v2903_v5 }
 0x4f8   : > { %v2352_v37 = vadd.f32 %v2348_v35, %v2317_v0  ;;  %v2415_v44 = vpop.f32.mrf.mxu0  ;;  %vm2911_vm9 = vcmp.eq.s32.totalorder %v4181_v43, %v2905_v12  ;;  %vm2910_vm11 = vcmp.eq.s32.totalorder %v4191_v46, %v2905_v12  ;;  %vm2909_vm12 = vcmp.eq.s32.totalorder %v4201_v48, %v2905_v12 }
 0x4f9   : > { %v2381_v10 = vpop.f32.mrf.mxu3  ;;  %vm2908_vm13 = vcmp.eq.s32.totalorder %v4210_v51, %v2905_v12  ;;  %vm2907_vm14 = vcmp.eq.s32.totalorder %v4219_v54, %v2905_v12  ;;  %vm2906_vm15 = vcmp.eq.s32.totalorder %v4088_v6, %v2905_v12 }
 0x4fa   : > { %v2386_v14 = vadd.f32 %v2381_v10, %v2351_v24  ;;  %v2543_v7 = vpop.permute.xlu1 %2542  ;;  %v2554_v22 = vpop.permute.xlu2 %2553 }
 0x4fc   : > { %v2418_v34 = vadd.f32 %v2413_v29, %v2386_v14 }
 0x4fd   : > { %v2691_v31 = vpop.f32.mrf.mxu1 }
 0x4fe   : > { %v2453_v36 = vadd.f32 %v2448_v19, %v2418_v34 }
 0x500   : > { %v2467_v39 = vmul.f32 %v4388_v50, %v2453_v36  ;;  %v2653_v21 = vpop.f32.mrf.mxu0 }
 0x501   : > { %v2383_v41 = vpop.f32.mrf.mxu3 }
 0x502   : > { %v2387_v42 = vadd.f32 %v2383_v41, %v2352_v37  ;;  %v2481_v45 = vadd.f32 %v4369_v26, %v2467_v39  ;;  %v4531_v24 = vpop.permute.xlu1 %3026 }
 0x504   : > { %v2419_v47 = vadd.f32 %v2415_v44, %v2387_v42  ;;  %v2485_v15 = vmul.f32 0.1, %v2481_v45  ;;  %vm2483_vm10 = vcmp.gt.f32.partialorder %v2481_v45, 0.0 }
 0x505   : > { %v2792_v42 = vpop.f32.mrf.mxu1 }
 0x506   : > { %v2454_v33 = vadd.f32 %v2450_v49, %v2419_v47  ;;  %v2487_v30 = vsel %vm2483_vm10, %v2481_v45, %v2485_v15 }
 0x507   : > { %v2489_v28 = vadd.f32 %v2487_v30, %v4254_v9  ;;  %v2493_v9 = vld [vmem:[%s4573_s14 + $0x8] sm:$0x7] }
 0x508   : > { %v2468_v27 = vmul.f32 %v4412_v13, %v2454_v33  ;;  %v3471_v13 = vld [vmem:[%s4573_s14] sm:$0xff]  ;;  %v2655_v48 = vpop.f32.mrf.mxu0 }
 0x509   : > { %v2628_v17 = vpop.f32.mrf.mxu3 }
 0x50a   : > { %v2482_v50 = vadd.f32 %v4410_v3, %v2468_v27  ;;  %v2816_v3 = vsel %vm1383_vm6, %v2806_v2, 0  ;;  %vm2913_vm6 = vcmp.eq.s32.totalorder %v4161_v38, %v2905_v12  ;;  %v2538_v38 = vpop.permute.xlu0 %2537  ;;  %v2654_v54 = vadd.f32 %v2653_v21, %v2628_v17  ;;  %v2564_v35 = vpop.permute.xlu1 %2563  ;;  %v3481_v21 = vld [vmem:[%s4579_s20] sm:$0xff] }
 0x50b   : > { %3434 = vmatpush.msk.msra.mxu1 %vm2913_vm6, %v3621_v16 }
 0x50c   : > { %v2486_v26 = vmul.f32 0.1, %v2482_v50  ;;  %vm2484_vm5 = vcmp.gt.f32.partialorder %v2482_v50, 0.0  ;;  %v2694_v6 = vadd.f32 %v2689_v23, %v2654_v54 }
 0x50d   : > { %v2794_v30 = vpop.f32.mrf.mxu1 }
 0x50e   : > { %v2488_v57 = vsel %vm2484_vm5, %v2482_v50, %v2486_v26 }
 0x50f   : > { %v2490_v53 = vadd.f32 %v2488_v57, %v4256_v18  ;;  %v2500_v18 = vunpack.c.l.b16 %v2493_v9 }
 0x510   : > { %v2757_v19 = vpop.f32.mrf.mxu0 }
 0x511   : > { %v2494_v56 = vpack.c.bf16 %v2490_v53, %v2489_v28  ;;  %v2502_v32 = vpack.c.b16 %v2500_v18, %v2500_v18  ;;  %v2630_v46 = vpop.f32.mrf.mxu3 }
 0x512   : > { %v2559_v29 = vpop.permute.xlu0 %2558 }
 0x513   : > { %2516 = vmatpush.bf16.msrb.mxu2 %v2494_v56 }
 0x516   : > { %3371 = vmatmul.msk.bf16.vlgmr.msrb.gmra.mxu2 %vm847_vm7, %v3471_v13 }
 0x517   : > { %2825 = vmatpush.bf16.msra.mxu2 %v2816_v3 }
 0x518   : > { %v2759_v44 = vpop.f32.mrf.mxu0 }
 0x519   : > { %v2727_v14 = vpop.f32.mrf.mxu3 }
 0x51a   : > { %v2732_v37 = vadd.f32 %v2727_v14, %v2694_v6 }
 0x51c   : > { %v2762_v47 = vadd.f32 %v2757_v19, %v2732_v37 }
 0x51e   : > { %v2797_v49 = vadd.f32 %v2792_v42, %v2762_v47 }
 0x520   : > { %v2894_v50 = vpop.f32.mrf.mxu0 }
 0x521   : > { %v2729_v39 = vpop.f32.mrf.mxu3 }
 0x526   : > { %3372 = vmatmul.msk.bf16.gmra.mxu2 %vm847_vm7, %v2502_v32 }
 0x528   : > { %v2896_v3 = vpop.f32.mrf.mxu0 }
 0x529   : > { %v2859_v52 = vpop.f32.mrf.mxu3 }
 0x531   : > { %v2861_v56 = vpop.f32.mrf.mxu3 }
 0x536   : > { %3419 = vmatmul.msk.bf16.vlgmr.msra.gmra.mxu2 %vm1379_vm8, %v3478_v58  ;;  %vm2912_vm8 = vcmp.eq.s32.totalorder %v4170_v40, %v2905_v12 }
 0x537   : > { %3435 = vmatpush.msk.msra.mxu1 %vm2912_vm8, %v3621_v16 }
 0x539   : > { %3436 = vmatpush.msk.msra.mxu1 %vm2911_vm9, %v3621_v16 }
 0x53b   : > { %3437 = vmatpush.msk.msra.mxu1 %vm2910_vm11, %v3621_v16 }
 0x53d   : > { %3438 = vmatpush.msk.msra.mxu1 %vm2909_vm12, %v3621_v16 }
 0x53f   : > { %3439 = vmatpush.msk.msra.mxu1 %vm2908_vm13, %v3621_v16 }
 0x541   : > { %3440 = vmatpush.msk.msra.mxu1 %vm2907_vm14, %v3621_v16 }
 0x543   : > { %3441 = vmatpush.msk.msra.mxu1 %vm2906_vm15, %v3621_v16  ;;  %v2656_v16 = vadd.f32 %v2655_v48, %v2630_v46 }
 0x545   : > { %v2695_v45 = vadd.f32 %v2691_v31, %v2656_v16 }
 0x547   : > { %v2733_v33 = vadd.f32 %v2729_v39, %v2695_v45 }
 0x549   : > { %v2763_v55 = vadd.f32 %v2759_v44, %v2733_v33 }
 0x54b   : > { %v2798_v2 = vadd.f32 %v2794_v30, %v2763_v55 }
 0x599   : > { %v2518_v20 = vpop.f32.mrf.mxu2 }
 0x59a   : > { %v2545_v40 = vmul.f32 %v2533_v1, %v2518_v20 }
 0x59c   : > { %v2566_v43 = vadd.f32 %v2554_v22, %v2545_v40 }
 0x59e   : > { %2569 = vst.msk [vmem:[%s762_s3] sm:$0xff] %vm2119_vm0, %v2566_v43 }
 0x5a1   : > { %v2520_v25 = vpop.f32.mrf.mxu2 }
 0x5a2   : > { %v2546_v51 = vmul.f32 %v2538_v38, %v2520_v25 }
 0x5a4   : > { %v2567_v10 = vadd.f32 %v2559_v29, %v2546_v51  ;;  %v3058_v29 = vpop.permute.xlu1 %3057 }
 0x5a6   : > { %2570 = vst.msk [vmem:[%s762_s3 + $0x8] sm:$0xff] %vm2119_vm0, %v2567_v10 }
 0x5a9   : > { %v2523_v0 = vpop.f32.mrf.mxu2 }
 0x5aa   : > { %v2547_v34 = vmul.f32 %v2543_v7, %v2523_v0  ;;  %v3037_v7 = vpop.permute.xlu0 %3036 }
 0x5ac   : > { %v2568_v36 = vadd.f32 %v2564_v35, %v2547_v34 }
 0x5ae   : > { %2572 = vst.msk [vmem:[%s762_s3 + $0x10] sm:$0x1f] %vm2571_vm1, %v2568_v36 }
 0x5b1   : > { %v2525_v41 = vpop.f32.mrf.mxu2 }
 0x5b2   : > { %v3053_v23 = vpop.permute.xlu0 %3052 }
 0x5b9   : > { %v2827_v15 = vpop.f32.mrf.mxu2 }
 0x5ba   : > { %v2832_v27 = vadd.f32 %v2827_v15, %v2797_v49 }
 0x5bc   : > { %v2864_v26 = vadd.f32 %v2859_v52, %v2832_v27 }
 0x5be   : > { %v2899_v57 = vadd.f32 %v2894_v50, %v2864_v26 }
 0x5c0   : > { %3442 = vmatmul.msk.f32.vlgmr.msra.gmra.mxu1 %vm2119_vm0, %v2899_v57 }
 0x5c1   : > { %v2829_v28 = vpop.f32.mrf.mxu2 }
 0x5c2   : > { %v2833_v53 = vadd.f32 %v2829_v28, %v2798_v2 }
 0x5c4   : > { %v2865_v13 = vadd.f32 %v2861_v56, %v2833_v53 }
 0x5c6   : > { %v2900_v60 = vadd.f32 %v2896_v3, %v2865_v13 }
 0x5c8   : > { %3443 = vmatmul.msk.f32.gmra.mxu1 %vm2119_vm0, %v2900_v60  ;;  %vm3065_vm0 = vcmask 126976  }
 0x63d   : > { %v2945_v9 = vpop.f32.mrf.mxu1 }
 0x63e   : > { %v2963_v18 = vmul.f32 %v4498_v59, %v2945_v9  ;;  %v2987_v59 = vld [vmem:[%s4579_s20 + $0x8] sm:$0x7] }
 0x640   : > { %v2977_v32 = vadd.f32 %v4506_v11, %v2963_v18  ;;  %v3032_v11 = vpop.permute.xlu2 %3031 }
 0x642   : > { %v2981_v63 = vmul.f32 0.1, %v2977_v32  ;;  %vm2979_vm2 = vcmp.gt.f32.partialorder %v2977_v32, 0.0 }
 0x644   : > { %v2983_v12 = vsel %vm2979_vm2, %v2977_v32, %v2981_v63 }
 0x645   : > { %v2948_v58 = vpop.f32.mrf.mxu1 }
 0x646   : > { %v2964_v62 = vmul.f32 %v4500_v61, %v2948_v58  ;;  %v2994_v61 = vunpack.c.l.b16 %v2987_v59 }
 0x648   : > { %v2978_v5 = vadd.f32 %v4504_v4, %v2964_v62  ;;  %v2996_v4 = vpack.c.b16 %v2994_v61, %v2994_v61  ;;  %v3048_v40 = vpop.permute.xlu2 %3047 }
 0x64a   : > { %vm2980_vm3 = vcmp.gt.f32.partialorder %v2978_v5, 0.0  ;;  %v2982_v8 = vmul.f32 0.1, %v2978_v5 }
 0x64c   : > { %v2984_v1 = vsel %vm2980_vm3, %v2978_v5, %v2982_v8 }
 0x64d   : > { %v2988_v17 = vpack.c.bf16 %v2984_v1, %v2983_v12 }
 0x64f   : > { %3010 = vmatpush.bf16.msrb.mxu2 %v2988_v17 }
 0x652   : > { %3448 = vmatmul.msk.bf16.vlgmr.msrb.gmra.mxu2 %vm847_vm7, %v3481_v21 }
 0x662   : > { %3449 = vmatmul.msk.bf16.gmra.mxu2 %vm847_vm7, %v2996_v4 }
 0x6d5   : > { %v3012_v38 = vpop.f32.mrf.mxu2 }
 0x6d6   : > { %v3039_v20 = vmul.f32 %v4531_v24, %v3012_v38 }
 0x6d8   : > { %v3060_v22 = vadd.f32 %v3048_v40, %v3039_v20 }
 0x6da   : > { %3063 = vst.msk [vmem:[%s767_s1] sm:$0xff] %vm847_vm7, %v3060_v22 }
 0x6dd   : > { %v3014_v43 = vpop.f32.mrf.mxu2 }
 0x6de   : > { %v3040_v46 = vmul.f32 %v3032_v11, %v3014_v43 }
 0x6e0   : > { %v3061_v48 = vadd.f32 %v3053_v23, %v3040_v46 }
 0x6e2   : > { %3064 = vst.msk [vmem:[%s767_s1 + $0x8] sm:$0xff] %vm847_vm7, %v3061_v48 }
 0x6e5   : > { %v3017_v25 = vpop.f32.mrf.mxu2 }
 0x6e6   : > { %v3041_v51 = vmul.f32 %v3037_v7, %v3017_v25 }
 0x6e8   : > { %v3062_v24 = vadd.f32 %v3058_v29, %v3041_v51 }
 0x6ea   : > { %3066 = vst.msk [vmem:[%s767_s1 + $0x10] sm:$0x1f] %vm3065_vm0, %v3062_v24 }
 0x6ed   : > { %v3019_v10 = vpop.f32.mrf.mxu2 }
 0x6ee PF: > { %s35_s5 = sadd.s32 1, %s3608_s5  }
 0x6ef   : > { %p32_p4 = scmp.ge.s32.totalorder %s35_s5, 4  }
 0x6f1   :  { %34 = sbr.rel (!%p32_p4) target bundleno = 12 (0xc), region = 190 }

</bundles_post_ra>
